<compile_context>
chip_gen: v7x
topology: tpu7x:2x2x1
jax: 0.10.0
libtpu: 0.0.40
codegen_flags: <defaults>
</compile_context>

<pallas_src>
import functools
import math

import jax
import jax.numpy as jnp
from jax import lax
from jax.experimental import pallas as pl
from jax.experimental.pallas import tpu as pltpu


_VMEM_LIMIT_BYTES = 48 * 1024 * 1024  # fits v5e/v6e (128 MiB) and v7x (64 MiB)
_DC_DILATIONS = (1, 2, 4, 8, 16, 1, 1)


# ----------------------------------------------------------------------------
# Pallas kernel 1: fused 3x3 conv (stride 1, dilation d, pad d) + bias
#                  (+ LeakyReLU 0.1), one batch element per grid step.
# ----------------------------------------------------------------------------
def _conv3x3_kernel(x_ref, w_ref, b_ref, o_ref, xp_ref, col_ref, acc_ref, *,
                    dilation, relu):
    # x_ref  : (1, H, W, Cin)
    # w_ref  : (3, 3*Cin, Cout)   taps laid out as (ky, kx*Cin + c, o)
    # b_ref  : (1, Cout)
    # o_ref  : (1, H, W, Cout)
    # xp_ref : (H+2d, W+2d, Cin)  zero-halo padded input scratch
    # col_ref: (H*W, 3*Cin)       one kernel-row of the im2col matrix
    # acc_ref: (H*W, Cout)        f32 accumulator
    H = x_ref.shape[1]
    W = x_ref.shape[2]
    Cin = x_ref.shape[3]
    Cout = o_ref.shape[3]
    d = dilation
    Hp = H + 2 * d
    Wp = W + 2 * d

    # Zero only the d-wide halo; the interior is fully overwritten below.
    xp_ref[0:d, :, :] = jnp.zeros((d, Wp, Cin), jnp.float32)
    xp_ref[H + d:Hp, :, :] = jnp.zeros((d, Wp, Cin), jnp.float32)
    xp_ref[:, 0:d, :] = jnp.zeros((Hp, d, Cin), jnp.float32)
    xp_ref[:, W + d:Wp, :] = jnp.zeros((Hp, d, Cin), jnp.float32)
    xp_ref[d:H + d, d:W + d, :] = x_ref[0]

    for ky in range(3):
        # Build one kernel-row (3 taps) of the im2col matrix, then one matmul
        # with K = 3*Cin on the MXU.
        for kx in range(3):
            col_ref[:, kx * Cin:(kx + 1) * Cin] = xp_ref[
                ky * d:ky * d + H, kx * d:kx * d + W, :].reshape(H * W, Cin)
        part = jnp.dot(col_ref[...], w_ref[ky],
                       preferred_element_type=jnp.float32)
        if ky == 0:
            acc_ref[...] = part
        else:
            acc_ref[...] += part

    y = acc_ref[...] + b_ref[...]
    if relu:
        y = jnp.maximum(y, 0.1 * y)  # LeakyReLU(0.1)
    o_ref[0] = y.reshape(H, W, Cout).astype(o_ref.dtype)


def conv3x3_pallas(x, w, b, *, dilation=1, relu=True, stride=1):
    """x: (N,H,W,Cin) f32, w: (3,3,Cin,Cout), b: (Cout,) -> (N,Ho,Wo,Cout)."""
    N, H, W, Cin = x.shape
    Cout = w.shape[-1]
    d = dilation
    w3 = w.reshape(3, 3 * Cin, Cout)
    b2 = b.reshape(1, Cout)
    kernel = functools.partial(_conv3x3_kernel, dilation=d, relu=relu)
    out = pl.pallas_call(
        kernel,
        out_shape=jax.ShapeDtypeStruct((N, H, W, Cout), jnp.float32),
        grid_spec=pltpu.PrefetchScalarGridSpec(
            num_scalar_prefetch=0,
            grid=(N,),
            in_specs=[
                pl.BlockSpec((1, H, W, Cin), lambda n: (n, 0, 0, 0)),
                pl.BlockSpec((3, 3 * Cin, Cout), lambda n: (0, 0, 0)),
                pl.BlockSpec((1, Cout), lambda n: (0, 0)),
            ],
            out_specs=pl.BlockSpec((1, H, W, Cout), lambda n: (n, 0, 0, 0)),
            scratch_shapes=[
                pltpu.VMEM((H + 2 * d, W + 2 * d, Cin), jnp.float32),
                pltpu.VMEM((H * W, 3 * Cin), jnp.float32),
                pltpu.VMEM((H * W, Cout), jnp.float32),
            ],
        ),
        compiler_params=pltpu.CompilerParams(
            dimension_semantics=("parallel",),
            vmem_limit_bytes=_VMEM_LIMIT_BYTES,
        ),
    )(x, w3, b2)
    if stride == 2:
        # stride-2 / pad-1 conv == stride-1 conv sampled at even positions.
        # TODO(synk): fold the stride into the in-kernel im2col to avoid the
        # 4x extra compute on the five stride-2 pyramid convs.
        out = out[:, ::2, ::2, :]
    return out


# ----------------------------------------------------------------------------
# Pallas kernel 2: fused 5-layer dense decoder block
#   x -> [x, lrelu(conv0(x)), lrelu(conv1(.)), ...]  (conv*_0 .. conv*_4)
# The growing feature map lives in a padded VMEM scratch; only the final
# lane-dense concatenation (C0 + 448 channels) is written to HBM.
# ----------------------------------------------------------------------------
def _dense_block_kernel(x_ref, w0_ref, b0_ref, w1_ref, b1_ref, w2_ref, b2_ref,
                        w3_ref, b3_ref, w4_ref, b4_ref, o_ref,
                        xp_ref, col_ref, acc_ref):
    H = x_ref.shape[1]
    W = x_ref.shape[2]
    C0 = x_ref.shape[3]
    Ctot = o_ref.shape[3]
    Hp = H + 2
    Wp = W + 2

    # Zero only the 1-wide halo over ALL channels (never touched afterwards).
    xp_ref[0:1, :, :] = jnp.zeros((1, Wp, Ctot), jnp.float32)
    xp_ref[H + 1:Hp, :, :] = jnp.zeros((1, Wp, Ctot), jnp.float32)
    xp_ref[:, 0:1, :] = jnp.zeros((Hp, 1, Ctot), jnp.float32)
    xp_ref[:, W + 1:Wp, :] = jnp.zeros((Hp, 1, Ctot), jnp.float32)
    xp_ref[1:H + 1, 1:W + 1, 0:C0] = x_ref[0]

    cin = C0
    layers = ((w0_ref, b0_ref), (w1_ref, b1_ref), (w2_ref, b2_ref),
              (w3_ref, b3_ref), (w4_ref, b4_ref))
    for (w_ref, b_ref) in layers:
        Cout = w_ref.shape[2]
        for ky in range(3):
            for kx in range(3):
                col_ref[:, kx * cin:(kx + 1) * cin] = xp_ref[
                    ky:ky + H, kx:kx + W, 0:cin].reshape(H * W, cin)
            part = jnp.dot(col_ref[:, 0:3 * cin], w_ref[ky],
                           preferred_element_type=jnp.float32)
            if ky == 0:
                acc_ref[:, 0:Cout] = part
            else:
                acc_ref[:, 0:Cout] += part
        y = acc_ref[:, 0:Cout] + b_ref[...]
        y = jnp.maximum(y, 0.1 * y)  # LeakyReLU(0.1)
        # Append the new channels directly into the VMEM-resident feature map.
        xp_ref[1:H + 1, 1:W + 1, cin:cin + Cout] = y.reshape(H, W, Cout)
        cin = cin + Cout

    # Single lane-dense store of the whole concatenated feature map.
    o_ref[0] = xp_ref[1:H + 1, 1:W + 1, :]


def dense_block_pallas(x, layer_params):
    """x: (N,H,W,C0); layer_params: 5 x (w (3,3,Cin_i,Cout_i), b (Cout_i,))."""
    assert len(layer_params) == 5
    N, H, W, C0 = x.shape
    couts = [w.shape[-1] for (w, _) in layer_params]
    Ctot = C0 + sum(couts)
    cin_max = C0 + sum(couts[:-1])
    cout_max = max(couts)

    args = []
    in_specs = [pl.BlockSpec((1, H, W, C0), lambda n: (n, 0, 0, 0))]
    for (w, b) in layer_params:
        cin_i, cout_i = w.shape[2], w.shape[3]
        args.append(w.reshape(3, 3 * cin_i, cout_i))
        args.append(b.reshape(1, cout_i))
        in_specs.append(pl.BlockSpec((3, 3 * cin_i, cout_i),
                                     lambda n: (0, 0, 0)))
        in_specs.append(pl.BlockSpec((1, cout_i), lambda n: (0, 0)))

    return pl.pallas_call(
        _dense_block_kernel,
        out_shape=jax.ShapeDtypeStruct((N, H, W, Ctot), jnp.float32),
        grid_spec=pltpu.PrefetchScalarGridSpec(
            num_scalar_prefetch=0,
            grid=(N,),
            in_specs=in_specs,
            out_specs=pl.BlockSpec((1, H, W, Ctot), lambda n: (n, 0, 0, 0)),
            scratch_shapes=[
                pltpu.VMEM((H + 2, W + 2, Ctot), jnp.float32),
                pltpu.VMEM((H * W, 3 * cin_max), jnp.float32),
                pltpu.VMEM((H * W, cout_max), jnp.float32),
            ],
        ),
        compiler_params=pltpu.CompilerParams(
            dimension_semantics=("parallel",),
            vmem_limit_bytes=_VMEM_LIMIT_BYTES,
        ),
    )(x, *args)


# ----------------------------------------------------------------------------
# Pure-JAX references for the Pallas kernels (correctness checks).
# ----------------------------------------------------------------------------
def conv3x3_ref(x, w, b, *, dilation=1, relu=True, stride=1):
    y = lax.conv_general_dilated(
        x, w, window_strides=(stride, stride),
        padding=((dilation, dilation), (dilation, dilation)),
        rhs_dilation=(dilation, dilation),
        dimension_numbers=("NHWC", "HWIO", "NHWC")) + b
    if relu:
        y = jnp.maximum(y, 0.1 * y)
    return y


def dense_block_ref(x, layer_params):
    feat = x
    for (w, b) in layer_params:
        y = conv3x3_ref(feat, w, b)
        feat = jnp.concatenate([feat, y], axis=-1)
    return feat


# ----------------------------------------------------------------------------
# Plain-JAX glue: bilinear warping / bilateral cost volume / deconv / resize.
# ----------------------------------------------------------------------------
def _bilinear_sample_nhwc(img, ix, iy, padding_mode):
    # img: (B,H,W,C); ix/iy: (B,Hg,Wg) absolute pixel coords.
    B, H, W, C = img.shape
    Hg, Wg = ix.shape[1], ix.shape[2]
    x0 = jnp.floor(ix)
    y0 = jnp.floor(iy)
    x1 = x0 + 1.0
    y1 = y0 + 1.0
    wx1 = ix - x0
    wy1 = iy - y0
    wx0 = 1.0 - wx1
    wy0 = 1.0 - wy1
    flat = img.reshape(B, H * W, C)

    def corner(xc, yc):
        if padding_mode == "zeros":
            valid = ((xc >= 0.0) & (xc <= W - 1.0) &
                     (yc >= 0.0) & (yc <= H - 1.0)).astype(img.dtype)
        else:  # 'border'
            valid = jnp.ones_like(xc, dtype=img.dtype)
        xcc = jnp.clip(xc, 0.0, W - 1.0).astype(jnp.int32)
        ycc = jnp.clip(yc, 0.0, H - 1.0).astype(jnp.int32)
        idx = (ycc * W + xcc).reshape(B, Hg * Wg)
        g = jax.vmap(lambda f, i: jnp.take(f, i, axis=0))(flat, idx)
        return g.reshape(B, Hg, Wg, C) * valid[..., None]

    v00 = corner(x0, y0)
    v10 = corner(x1, y0)
    v01 = corner(x0, y1)
    v11 = corner(x1, y1)
    return (v00 * (wx0 * wy0)[..., None] + v10 * (wx1 * wy0)[..., None] +
            v01 * (wx0 * wy1)[..., None] + v11 * (wx1 * wy1)[..., None])


def warp_nhwc(x, flow, padding_mode="border"):
    """Bilinear warp, NHWC.  flow[...,0]=x-offset, flow[...,1]=y-offset (px).

    Matches BilateralCostVolume.warp: align_corners=True style normalisation,
    grid_sample with align_corners=False, zero-padded validity mask >= 0.999.
    """
    # TODO(synk): the free-standing warp() of networks.py is not in the spec;
    # it is approximated with the BilateralCostVolume.warp semantics.
    B, H, W, C = x.shape
    xs = jnp.arange(W, dtype=jnp.float32)
    ys = jnp.arange(H, dtype=jnp.float32)
    vx = xs[None, None, :] + flow[..., 0]
    vy = ys[None, :, None] + flow[..., 1]
    gx = 2.0 * vx / max(W - 1, 1) - 1.0
    gy = 2.0 * vy / max(H - 1, 1) - 1.0
    ix = ((gx + 1.0) * W - 1.0) * 0.5
    iy = ((gy + 1.0) * H - 1.0) * 0.5
    out = _bilinear_sample_nhwc(x, ix, iy, padding_mode)
    mask = _bilinear_sample_nhwc(jnp.ones_like(x), ix, iy, "zeros")
    mask = (mask >= 0.999).astype(x.dtype)
    return out * mask


def _l2normalize(x):
    return x / jnp.sqrt(jnp.sum(x * x, axis=-1, keepdims=True) + 1e-6)


def bilateral_cost_volume(f1, f2, bm, *, md, time=0.5):
    """BilateralCostVolume.forward for 0 < time < 1 (NHWC)."""
    # TODO(synk): time==0 / time==1 branches of the PyTorch module are unused.
    assert 0.0 < time < 1.0
    n_disp = 2 * md + 1
    rng = n_disp * n_disp
    f1 = _l2normalize(f1)
    f2 = _l2normalize(f2)
    lin = jnp.linspace(-float(md), float(md), n_disp)
    d_u = jnp.tile(lin[None, :], (n_disp, 1)).reshape(rng)
    d_v = jnp.tile(lin[:, None], (1, n_disp)).reshape(rng)
    d = jnp.stack([d_u, d_v], axis=-1)  # (rng, 2)
    N, H, W, C = f1.shape
    bm_d = bm[:, None, :, :, :] + d[None, :, None, None, :]  # (N,rng,H,W,2)
    outs = []
    for i in range(N):
        f1i = jnp.broadcast_to(f1[i][None], (rng, H, W, C))
        f2i = jnp.broadcast_to(f2[i][None], (rng, H, W, C))
        bw = warp_nhwc(f1i, 2.0 * (-time) * bm_d[i])
        fw = warp_nhwc(f2i, 2.0 * (1.0 - time) * bm_d[i])
        corr = jnp.sum(fw * bw, axis=-1)  # (rng, H, W)
        outs.append(jnp.transpose(corr, (1, 2, 0))[None])
    return jnp.concatenate(outs, axis=0)  # (N, H, W, rng)


def conv_transpose2x(x, w, b):
    """ConvTranspose2d(k=4, s=2, p=1) equivalent, NHWC, plain-JAX glue."""
    # TODO(synk): 2-output-channel deconvs are negligible compute, left in JAX.
    y = lax.conv_general_dilated(
        x, w[::-1, ::-1, :, :], window_strides=(1, 1),
        padding=((2, 2), (2, 2)), lhs_dilation=(2, 2),
        dimension_numbers=("NHWC", "HWIO", "NHWC"))
    return y + b


def upsample_bilinear_align_corners(x, out_h, out_w):
    """F.interpolate(..., mode='bilinear', align_corners=True), NHWC."""
    N, H, W, C = x.shape
    ys = (jnp.arange(out_h, dtype=jnp.float32) * ((H - 1) / (out_h - 1))
          if out_h > 1 and H > 1 else jnp.zeros((out_h,), jnp.float32))
    xs = (jnp.arange(out_w, dtype=jnp.float32) * ((W - 1) / (out_w - 1))
          if out_w > 1 and W > 1 else jnp.zeros((out_w,), jnp.float32))
    y0f = jnp.floor(ys)
    x0f = jnp.floor(xs)
    wy = (ys - y0f)[None, :, None, None]
    wx = (xs - x0f)[None, None, :, None]
    y0 = y0f.astype(jnp.int32)
    x0 = x0f.astype(jnp.int32)
    y1 = jnp.minimum(y0 + 1, H - 1)
    x1 = jnp.minimum(x0 + 1, W - 1)
    top = x[:, y0]
    bot = x[:, y1]
    tl, tr = top[:, :, x0], top[:, :, x1]
    bl, br = bot[:, :, x0], bot[:, :, x1]
    return (1 - wy) * ((1 - wx) * tl + wx * tr) + wy * ((1 - wx) * bl + wx * br)


# ----------------------------------------------------------------------------
# Parameters (deterministic synthetic init, same shapes as the nn.Module).
# ----------------------------------------------------------------------------
class _KeyGen:
    def __init__(self, key):
        self._key = key

    def __call__(self):
        self._key, sub = jax.random.split(self._key)
        return sub


def _conv_param(kg, cin, cout, ksize=3):
    fan_in = ksize * ksize * cin
    w = jax.random.normal(kg(), (ksize, ksize, cin, cout),
                          jnp.float32) * math.sqrt(2.0 / fan_in)
    b = jnp.zeros((cout,), jnp.float32)
    return (w, b)


def init_bmnet_params(key):
    kg = _KeyGen(key)
    p = {}
    # Feature pyramid: conv1 .. conv6 (3 convs each; first of 2..6 is stride 2)
    chans = [(3, 16), (16, 32), (32, 64), (64, 96), (96, 128), (128, 196)]
    pyramid = []
    for (ci, co) in chans:
        pyramid.append([_conv_param(kg, ci, co),
                        _conv_param(kg, co, co),
                        _conv_param(kg, co, co)])
    p["pyramid"] = pyramid

    def dec(od, with_up):
        couts = [128, 128, 96, 64, 32]
        dense = []
        cin = od
        for co in couts:
            dense.append(_conv_param(kg, cin, co))
            cin += co
        d = {"dense": dense, "flow": _conv_param(kg, cin, 2)}
        if with_up:
            d["deconv"] = _conv_param(kg, 2, 2, ksize=4)
            d["upfeat"] = _conv_param(kg, cin, 2, ksize=4)
        return d

    p["dec6"] = dec(169, True)   # (2*6+1)^2
    p["dec5"] = dec(341, True)   # 81 + 2*128 + 4
    p["dec4"] = dec(277, True)   # 81 + 2*96  + 4
    p["dec3"] = dec(157, True)   # 25 + 2*64  + 4
    p["dec2"] = dec(93, False)   # 25 + 2*32  + 4   ("flow" == predict_flow2)
    dc_specs = [(541, 128), (128, 128), (128, 128), (128, 96), (96, 64),
                (64, 32), (32, 2)]
    p["dc_conv"] = [_conv_param(kg, ci, co) for (ci, co) in dc_specs]
    return p


# ----------------------------------------------------------------------------
# BMNet forward (time = 0.5), NCHW in / NCHW out like the PyTorch module.
# ----------------------------------------------------------------------------
def bmnet_forward(params, x_nchw, *, time=0.5, use_pallas=True):
    conv = conv3x3_pallas if use_pallas else conv3x3_ref
    dense = dense_block_pallas if use_pallas else dense_block_ref
    lrelu = lambda v: jnp.maximum(v, 0.1 * v)

    x = jnp.transpose(x_nchw, (0, 2, 3, 1)).astype(jnp.float32)
    im1, im2 = x[..., :3], x[..., 3:]
    N, H0, W0, _ = x.shape

    def pyramid(im):
        feats = []
        h = im
        for li, layers in enumerate(params["pyramid"]):
            for j, (w, b) in enumerate(layers):
                stride = 2 if (li > 0 and j == 0) else 1
                h = conv(h, w, b, stride=stride)
            feats.append(h)
        return feats

    c11, c12, c13, c14, c15, c16 = pyramid(im1)
    c21, c22, c23, c24, c25, c26 = pyramid(im2)

    def decoder_head(dec_p, feat):
        wf, bf = dec_p["flow"]
        flow_pre = conv(feat, wf, bf, relu=False)
        up_flow = conv_transpose2x(flow_pre, *dec_p["deconv"])
        up_feat = conv_transpose2x(feat, *dec_p["upfeat"])
        return up_flow, up_feat

    # ---- level 6 -------------------------------------------------------
    bm6 = jnp.zeros((N, c16.shape[1], c16.shape[2], 2), jnp.float32)
    bicorr6 = lrelu(bilateral_cost_volume(c16, c26, bm6, md=6, time=time))
    feat6 = dense(bicorr6, params["dec6"]["dense"])
    up_flow6, up_feat6 = decoder_head(params["dec6"], feat6)

    # ---- levels 5..3 ---------------------------------------------------
    def refine(dec_p, f1, f2, up_flow, up_feat, scale, md):
        w1 = warp_nhwc(f1, up_flow * (-scale * time * 2.0))
        w2 = warp_nhwc(f2, up_flow * (scale * (1.0 - time) * 2.0))
        bic = lrelu(bilateral_cost_volume(f1, f2, up_flow * scale,
                                          md=md, time=time))
        xcat = jnp.concatenate([bic, w1, w2, up_flow, up_feat], axis=-1)
        return dense(xcat, dec_p["dense"])

    feat5 = refine(params["dec5"], c15, c25, up_flow6, up_feat6, 1.25, 4)
    up_flow5, up_feat5 = decoder_head(params["dec5"], feat5)

    feat4 = refine(params["dec4"], c14, c24, up_flow5, up_feat5, 2.5, 4)
    up_flow4, up_feat4 = decoder_head(params["dec4"], feat4)

    feat3 = refine(params["dec3"], c13, c23, up_flow4, up_feat4, 5.0, 2)
    up_flow3, up_feat3 = decoder_head(params["dec3"], feat3)

    # ---- level 2 + context network -------------------------------------
    feat2 = refine(params["dec2"], c12, c22, up_flow3, up_feat3, 10.0, 2)
    wf, bf = params["dec2"]["flow"]
    flow2 = conv(feat2, wf, bf, relu=False)
    h = feat2
    n_dc = len(params["dc_conv"])
    for i, (w, b) in enumerate(params["dc_conv"]):
        h = conv(h, w, b, dilation=_DC_DILATIONS[i], relu=(i != n_dc - 1))
    flow2 = flow2 + h

    flow = upsample_bilinear_align_corners(flow2, H0, W0) * 20.0
    return jnp.transpose(flow, (0, 3, 1, 2))  # NCHW


# ----------------------------------------------------------------------------
if __name__ == "__main__":
    N, H, W = 2, 64, 64
    key = jax.random.PRNGKey(0)
    k_x, k_params, k_u1, k_u2, k_u3, k_ud = jax.random.split(key, 6)

    # ---- unit checks of the Pallas kernels vs lax.conv -------------------
    xu = jax.random.normal(k_u1, (2, 16, 16, 24), jnp.float32)
    wu = jax.random.normal(k_u2, (3, 3, 24, 32), jnp.float32) * 0.1
    bu = jax.random.normal(k_u3, (32,), jnp.float32) * 0.1
    got = conv3x3_pallas(xu, wu, bu, dilation=2, relu=True)
    want = conv3x3_ref(xu, wu, bu, dilation=2, relu=True)
    assert bool(jnp.allclose(got, want, atol=1e-3, rtol=1e-3)), "conv mismatch"

    kg = _KeyGen(k_ud)
    dense_p = []
    cin = 24
    for co in (128, 128, 96, 64, 32):
        dense_p.append(_conv_param(kg, cin, co))
        cin += co
    got_d = dense_block_pallas(xu, dense_p)
    want_d = dense_block_ref(xu, dense_p)
    assert bool(jnp.allclose(got_d, want_d, atol=1e-3, rtol=1e-3)), \
        "dense block mismatch"

    # ---- full BMNet forward ----------------------------------------------
    params = init_bmnet_params(k_params)
    x = jax.random.normal(k_x, (N, 6, H, W), jnp.float32)  # two RGB frames

    fwd = jax.jit(functools.partial(bmnet_forward, use_pallas=True))
    ref_fwd = jax.jit(functools.partial(bmnet_forward, use_pallas=False))

    out = jax.block_until_ready(fwd(params, x))
    ref = jax.block_until_ready(ref_fwd(params, x))

    assert out.shape == (N, 2, H, W), out.shape
    assert bool(jnp.all(jnp.isfinite(out))), "non-finite output"
    err = jnp.abs(out - ref)
    rel = err / (1.0 + jnp.abs(ref))
    med_rel = float(jnp.median(rel))
    frac_bad = float(jnp.mean((rel > 2e-2).astype(jnp.float32)))
    # Median is robust against the rare warp-mask threshold flips caused by
    # tiny conv-summation-order differences; both checks catch gross errors.
    assert med_rel < 1e-2, med_rel
    assert frac_bad < 0.10, frac_bad

    print("KERNEL_OK")
</pallas_src>

<mosaic_0001>
module attributes {stable_mosaic.version = 11 : i64} {
  func.func @_conv3x3_kernel(%arg0: i32, %arg1: memref<1x16x16x24xf32, #tpu.memory_space<vmem>>, %arg2: memref<3x72x32xf32, #tpu.memory_space<vmem>>, %arg3: memref<1x32xf32, #tpu.memory_space<vmem>>, %arg4: memref<1x16x16x32xf32, #tpu.memory_space<vmem>>, %arg5: memref<20x20x24xf32, #tpu.memory_space<vmem>>, %arg6: memref<256x72xf32, #tpu.memory_space<vmem>>, %arg7: memref<256x32xf32, #tpu.memory_space<vmem>>) attributes {dimension_semantics = [#tpu.dimension_semantics<parallel>], iteration_bounds = array<i64: 2>, scalar_prefetch = 0 : i64, scratch_operands = 3 : i64, tpu.core_type = #tpu.core_type<tc>, window_params = [{transform_indices = @transform_0, window_bounds = array<i64: 1, 16, 16, 24>}, {pipeline_mode = #tpu.pipeline_mode<synchronous>, transform_indices = @transform_1, window_bounds = array<i64: 3, 72, 32>}, {pipeline_mode = #tpu.pipeline_mode<synchronous>, transform_indices = @transform_2, window_bounds = array<i64: 1, 32>}, {transform_indices = @transform_3, window_bounds = array<i64: 1, 16, 16, 32>}]} {
    %cst = arith.constant 0.000000e+00 : f32
    %0 = vector.broadcast %cst : f32 to vector<2x20x24xf32>
    %c0 = arith.constant 0 : index
    %c0_0 = arith.constant 0 : index
    %c0_1 = arith.constant 0 : index
    %1 = vector.load %arg5[%c0, %c0_0, %c0_1] : memref<20x20x24xf32, #tpu.memory_space<vmem>>, vector<2x20x24xf32>
    tpu.vector_store %arg5[%c0, %c0_0, %c0_1], %0 {strides = array<i32>} : memref<20x20x24xf32, #tpu.memory_space<vmem>>, vector<2x20x24xf32>,
    %cst_2 = arith.constant 0.000000e+00 : f32
    %2 = vector.broadcast %cst_2 : f32 to vector<2x20x24xf32>
    %c18 = arith.constant 18 : index
    %c0_3 = arith.constant 0 : index
    %c0_4 = arith.constant 0 : index
    %3 = vector.load %arg5[%c18, %c0_3, %c0_4] : memref<20x20x24xf32, #tpu.memory_space<vmem>>, vector<2x20x24xf32>
    tpu.vector_store %arg5[%c18, %c0_3, %c0_4], %2 {strides = array<i32>} : memref<20x20x24xf32, #tpu.memory_space<vmem>>, vector<2x20x24xf32>,
    %cst_5 = arith.constant 0.000000e+00 : f32
    %4 = vector.broadcast %cst_5 : f32 to vector<20x2x24xf32>
    %c0_6 = arith.constant 0 : index
    %c0_7 = arith.constant 0 : index
    %c0_8 = arith.constant 0 : index
    %5 = vector.load %arg5[%c0_6, %c0_7, %c0_8] : memref<20x20x24xf32, #tpu.memory_space<vmem>>, vector<20x2x24xf32>
    tpu.vector_store %arg5[%c0_6, %c0_7, %c0_8], %4 {strides = array<i32>} : memref<20x20x24xf32, #tpu.memory_space<vmem>>, vector<20x2x24xf32>,
    %cst_9 = arith.constant 0.000000e+00 : f32
    %6 = vector.broadcast %cst_9 : f32 to vector<20x2x24xf32>
    %c0_10 = arith.constant 0 : index
    %c18_11 = arith.constant 18 : index
    %c0_12 = arith.constant 0 : index
    %7 = vector.load %arg5[%c0_10, %c18_11, %c0_12] : memref<20x20x24xf32, #tpu.memory_space<vmem>>, vector<20x2x24xf32>
    tpu.vector_store %arg5[%c0_10, %c18_11, %c0_12], %6 {strides = array<i32>} : memref<20x20x24xf32, #tpu.memory_space<vmem>>, vector<20x2x24xf32>,
    %c0_13 = arith.constant 0 : index
    %c0_14 = arith.constant 0 : index
    %c0_15 = arith.constant 0 : index
    %c0_16 = arith.constant 0 : index
    %8 = vector.load %arg1[%c0_13, %c0_14, %c0_15, %c0_16] : memref<1x16x16x24xf32, #tpu.memory_space<vmem>>, vector<1x16x16x24xf32>
    %9 = vector.shape_cast %8 : vector<1x16x16x24xf32> to vector<16x16x24xf32>
    %c2 = arith.constant 2 : index
    %c2_17 = arith.constant 2 : index
    %c0_18 = arith.constant 0 : index
    %10 = vector.load %arg5[%c2, %c2_17, %c0_18] : memref<20x20x24xf32, #tpu.memory_space<vmem>>, vector<16x16x24xf32>
    tpu.vector_store %arg5[%c2, %c2_17, %c0_18], %9 {strides = array<i32>} : memref<20x20x24xf32, #tpu.memory_space<vmem>>, vector<16x16x24xf32>,
    %c0_19 = arith.constant 0 : index
    %c0_20 = arith.constant 0 : index
    %c0_21 = arith.constant 0 : index
    %11 = vector.load %arg5[%c0_19, %c0_20, %c0_21] : memref<20x20x24xf32, #tpu.memory_space<vmem>>, vector<16x16x24xf32>
    %12 = vector.shape_cast %11 : vector<16x16x24xf32> to vector<256x24xf32>
    %c0_22 = arith.constant 0 : index
    %c0_23 = arith.constant 0 : index
    %13 = vector.load %arg6[%c0_22, %c0_23] : memref<256x72xf32, #tpu.memory_space<vmem>>, vector<256x24xf32>
    tpu.vector_store %arg6[%c0_22, %c0_23], %12 {strides = array<i32>} : memref<256x72xf32, #tpu.memory_space<vmem>>, vector<256x24xf32>,
    %c0_24 = arith.constant 0 : index
    %c2_25 = arith.constant 2 : index
    %c0_26 = arith.constant 0 : index
    %14 = vector.load %arg5[%c0_24, %c2_25, %c0_26] : memref<20x20x24xf32, #tpu.memory_space<vmem>>, vector<16x16x24xf32>
    %15 = vector.shape_cast %14 : vector<16x16x24xf32> to vector<256x24xf32>
    %c0_27 = arith.constant 0 : index
    %c24 = arith.constant 24 : index
    %16 = vector.load %arg6[%c0_27, %c24] : memref<256x72xf32, #tpu.memory_space<vmem>>, vector<256x24xf32>
    tpu.vector_store %arg6[%c0_27, %c24], %15 {strides = array<i32>} : memref<256x72xf32, #tpu.memory_space<vmem>>, vector<256x24xf32>,
    %c0_28 = arith.constant 0 : index
    %c4 = arith.constant 4 : index
    %c0_29 = arith.constant 0 : index
    %17 = vector.load %arg5[%c0_28, %c4, %c0_29] : memref<20x20x24xf32, #tpu.memory_space<vmem>>, vector<16x16x24xf32>
    %18 = vector.shape_cast %17 : vector<16x16x24xf32> to vector<256x24xf32>
    %c0_30 = arith.constant 0 : index
    %c48 = arith.constant 48 : index
    %19 = vector.load %arg6[%c0_30, %c48] : memref<256x72xf32, #tpu.memory_space<vmem>>, vector<256x24xf32>
    tpu.vector_store %arg6[%c0_30, %c48], %18 {strides = array<i32>} : memref<256x72xf32, #tpu.memory_space<vmem>>, vector<256x24xf32>,
    %c0_31 = arith.constant 0 : index
    %c0_32 = arith.constant 0 : index
    %20 = vector.load %arg6[%c0_31, %c0_32] : memref<256x72xf32, #tpu.memory_space<vmem>>, vector<256x72xf32>
    %c0_33 = arith.constant 0 : index
    %c0_34 = arith.constant 0 : index
    %c0_35 = arith.constant 0 : index
    %21 = vector.load %arg2[%c0_33, %c0_34, %c0_35] : memref<3x72x32xf32, #tpu.memory_space<vmem>>, vector<1x72x32xf32>
    %22 = vector.shape_cast %21 : vector<1x72x32xf32> to vector<72x32xf32>
    %cst_36 = arith.constant dense<0.000000e+00> : vector<256x32xf32>
    %23 = tpu.matmul %20, %22, %cst_36 {dimension_numbers = #tpu.dot_dimension_numbers<[1], [0], [0], [1], [0, 0, 1, 1], [], []>} : vector<256x72xf32>, vector<72x32xf32>, vector<256x32xf32> -> vector<256x32xf32>
    %c0_37 = arith.constant 0 : index
    %c0_38 = arith.constant 0 : index
    %24 = vector.load %arg7[%c0_37, %c0_38] : memref<256x32xf32, #tpu.memory_space<vmem>>, vector<256x32xf32>
    tpu.vector_store %arg7[%c0_37, %c0_38], %23 {strides = array<i32>} : memref<256x32xf32, #tpu.memory_space<vmem>>, vector<256x32xf32>,
    %c2_39 = arith.constant 2 : index
    %c0_40 = arith.constant 0 : index
    %c0_41 = arith.constant 0 : index
    %25 = vector.load %arg5[%c2_39, %c0_40, %c0_41] : memref<20x20x24xf32, #tpu.memory_space<vmem>>, vector<16x16x24xf32>
    %26 = vector.shape_cast %25 : vector<16x16x24xf32> to vector<256x24xf32>
    %c0_42 = arith.constant 0 : index
    %c0_43 = arith.constant 0 : index
    %27 = vector.load %arg6[%c0_42, %c0_43] : memref<256x72xf32, #tpu.memory_space<vmem>>, vector<256x24xf32>
    tpu.vector_store %arg6[%c0_42, %c0_43], %26 {strides = array<i32>} : memref<256x72xf32, #tpu.memory_space<vmem>>, vector<256x24xf32>,
    %c2_44 = arith.constant 2 : index
    %c2_45 = arith.constant 2 : index
    %c0_46 = arith.constant 0 : index
    %28 = vector.load %arg5[%c2_44, %c2_45, %c0_46] : memref<20x20x24xf32, #tpu.memory_space<vmem>>, vector<16x16x24xf32>
    %29 = vector.shape_cast %28 : vector<16x16x24xf32> to vector<256x24xf32>
    %c0_47 = arith.constant 0 : index
    %c24_48 = arith.constant 24 : index
    %30 = vector.load %arg6[%c0_47, %c24_48] : memref<256x72xf32, #tpu.memory_space<vmem>>, vector<256x24xf32>
    tpu.vector_store %arg6[%c0_47, %c24_48], %29 {strides = array<i32>} : memref<256x72xf32, #tpu.memory_space<vmem>>, vector<256x24xf32>,
    %c2_49 = arith.constant 2 : index
    %c4_50 = arith.constant 4 : index
    %c0_51 = arith.constant 0 : index
    %31 = vector.load %arg5[%c2_49, %c4_50, %c0_51] : memref<20x20x24xf32, #tpu.memory_space<vmem>>, vector<16x16x24xf32>
    %32 = vector.shape_cast %31 : vector<16x16x24xf32> to vector<256x24xf32>
    %c0_52 = arith.constant 0 : index
    %c48_53 = arith.constant 48 : index
    %33 = vector.load %arg6[%c0_52, %c48_53] : memref<256x72xf32, #tpu.memory_space<vmem>>, vector<256x24xf32>
    tpu.vector_store %arg6[%c0_52, %c48_53], %32 {strides = array<i32>} : memref<256x72xf32, #tpu.memory_space<vmem>>, vector<256x24xf32>,
    %c0_54 = arith.constant 0 : index
    %c0_55 = arith.constant 0 : index
    %34 = vector.load %arg6[%c0_54, %c0_55] : memref<256x72xf32, #tpu.memory_space<vmem>>, vector<256x72xf32>
    %c1 = arith.constant 1 : index
    %c0_56 = arith.constant 0 : index
    %c0_57 = arith.constant 0 : index
    %35 = vector.load %arg2[%c1, %c0_56, %c0_57] : memref<3x72x32xf32, #tpu.memory_space<vmem>>, vector<1x72x32xf32>
    %36 = vector.shape_cast %35 : vector<1x72x32xf32> to vector<72x32xf32>
    %cst_58 = arith.constant dense<0.000000e+00> : vector<256x32xf32>
    %37 = tpu.matmul %34, %36, %cst_58 {dimension_numbers = #tpu.dot_dimension_numbers<[1], [0], [0], [1], [0, 0, 1, 1], [], []>} : vector<256x72xf32>, vector<72x32xf32>, vector<256x32xf32> -> vector<256x32xf32>
    %c0_59 = arith.constant 0 : index
    %c0_60 = arith.constant 0 : index
    %38 = vector.load %arg7[%c0_59, %c0_60] : memref<256x32xf32, #tpu.memory_space<vmem>>, vector<256x32xf32>
    %39 = arith.addf %38, %37 : vector<256x32xf32>
    %c0_61 = arith.constant 0 : index
    %c0_62 = arith.constant 0 : index
    %40 = vector.load %arg7[%c0_61, %c0_62] : memref<256x32xf32, #tpu.memory_space<vmem>>, vector<256x32xf32>
    tpu.vector_store %arg7[%c0_61, %c0_62], %39 {strides = array<i32>} : memref<256x32xf32, #tpu.memory_space<vmem>>, vector<256x32xf32>,
    %c4_63 = arith.constant 4 : index
    %c0_64 = arith.constant 0 : index
    %c0_65 = arith.constant 0 : index
    %41 = vector.load %arg5[%c4_63, %c0_64, %c0_65] : memref<20x20x24xf32, #tpu.memory_space<vmem>>, vector<16x16x24xf32>
    %42 = vector.shape_cast %41 : vector<16x16x24xf32> to vector<256x24xf32>
    %c0_66 = arith.constant 0 : index
    %c0_67 = arith.constant 0 : index
    %43 = vector.load %arg6[%c0_66, %c0_67] : memref<256x72xf32, #tpu.memory_space<vmem>>, vector<256x24xf32>
    tpu.vector_store %arg6[%c0_66, %c0_67], %42 {strides = array<i32>} : memref<256x72xf32, #tpu.memory_space<vmem>>, vector<256x24xf32>,
    %c4_68 = arith.constant 4 : index
    %c2_69 = arith.constant 2 : index
    %c0_70 = arith.constant 0 : index
    %44 = vector.load %arg5[%c4_68, %c2_69, %c0_70] : memref<20x20x24xf32, #tpu.memory_space<vmem>>, vector<16x16x24xf32>
    %45 = vector.shape_cast %44 : vector<16x16x24xf32> to vector<256x24xf32>
    %c0_71 = arith.constant 0 : index
    %c24_72 = arith.constant 24 : index
    %46 = vector.load %arg6[%c0_71, %c24_72] : memref<256x72xf32, #tpu.memory_space<vmem>>, vector<256x24xf32>
    tpu.vector_store %arg6[%c0_71, %c24_72], %45 {strides = array<i32>} : memref<256x72xf32, #tpu.memory_space<vmem>>, vector<256x24xf32>,
    %c4_73 = arith.constant 4 : index
    %c4_74 = arith.constant 4 : index
    %c0_75 = arith.constant 0 : index
    %47 = vector.load %arg5[%c4_73, %c4_74, %c0_75] : memref<20x20x24xf32, #tpu.memory_space<vmem>>, vector<16x16x24xf32>
    %48 = vector.shape_cast %47 : vector<16x16x24xf32> to vector<256x24xf32>
    %c0_76 = arith.constant 0 : index
    %c48_77 = arith.constant 48 : index
    %49 = vector.load %arg6[%c0_76, %c48_77] : memref<256x72xf32, #tpu.memory_space<vmem>>, vector<256x24xf32>
    tpu.vector_store %arg6[%c0_76, %c48_77], %48 {strides = array<i32>} : memref<256x72xf32, #tpu.memory_space<vmem>>, vector<256x24xf32>,
    %c0_78 = arith.constant 0 : index
    %c0_79 = arith.constant 0 : index
    %50 = vector.load %arg6[%c0_78, %c0_79] : memref<256x72xf32, #tpu.memory_space<vmem>>, vector<256x72xf32>
    %c2_80 = arith.constant 2 : index
    %c0_81 = arith.constant 0 : index
    %c0_82 = arith.constant 0 : index
    %51 = vector.load %arg2[%c2_80, %c0_81, %c0_82] : memref<3x72x32xf32, #tpu.memory_space<vmem>>, vector<1x72x32xf32>
    %52 = vector.shape_cast %51 : vector<1x72x32xf32> to vector<72x32xf32>
    %cst_83 = arith.constant dense<0.000000e+00> : vector<256x32xf32>
    %53 = tpu.matmul %50, %52, %cst_83 {dimension_numbers = #tpu.dot_dimension_numbers<[1], [0], [0], [1], [0, 0, 1, 1], [], []>} : vector<256x72xf32>, vector<72x32xf32>, vector<256x32xf32> -> vector<256x32xf32>
    %c0_84 = arith.constant 0 : index
    %c0_85 = arith.constant 0 : index
    %54 = vector.load %arg7[%c0_84, %c0_85] : memref<256x32xf32, #tpu.memory_space<vmem>>, vector<256x32xf32>
    %55 = arith.addf %54, %53 : vector<256x32xf32>
    %c0_86 = arith.constant 0 : index
    %c0_87 = arith.constant 0 : index
    %56 = vector.load %arg7[%c0_86, %c0_87] : memref<256x32xf32, #tpu.memory_space<vmem>>, vector<256x32xf32>
    tpu.vector_store %arg7[%c0_86, %c0_87], %55 {strides = array<i32>} : memref<256x32xf32, #tpu.memory_space<vmem>>, vector<256x32xf32>,
    %c0_88 = arith.constant 0 : index
    %c0_89 = arith.constant 0 : index
    %57 = vector.load %arg7[%c0_88, %c0_89] : memref<256x32xf32, #tpu.memory_space<vmem>>, vector<256x32xf32>
    %c0_90 = arith.constant 0 : index
    %c0_91 = arith.constant 0 : index
    %58 = vector.load %arg3[%c0_90, %c0_91] : memref<1x32xf32, #tpu.memory_space<vmem>>, vector<1x32xf32>
    %59 = vector.broadcast %58 : vector<1x32xf32> to vector<256x32xf32>
    %60 = arith.addf %57, %59 : vector<256x32xf32>
    %cst_92 = arith.constant 1.000000e-01 : f32
    %61 = vector.broadcast %cst_92 : f32 to vector<256x32xf32>
    %62 = arith.mulf %61, %60 : vector<256x32xf32>
    %63 = arith.maximumf %60, %62 : vector<256x32xf32>
    %64 = vector.shape_cast %63 : vector<256x32xf32> to vector<16x16x32xf32>
    %c0_93 = arith.constant 0 : index
    %c0_94 = arith.constant 0 : index
    %c0_95 = arith.constant 0 : index
    %c0_96 = arith.constant 0 : index
    %65 = vector.load %arg4[%c0_93, %c0_94, %c0_95, %c0_96] : memref<1x16x16x32xf32, #tpu.memory_space<vmem>>, vector<1x16x16x32xf32>
    %66 = vector.shape_cast %65 : vector<1x16x16x32xf32> to vector<16x16x32xf32>
    %67 = vector.shape_cast %64 : vector<16x16x32xf32> to vector<1x16x16x32xf32>
    tpu.vector_store %arg4[%c0_93, %c0_94, %c0_95, %c0_96], %67 {strides = array<i32>} : memref<1x16x16x32xf32, #tpu.memory_space<vmem>>, vector<1x16x16x32xf32>,
    return
  }
  func.func @transform_0(%arg0: i32) -> (i32, i32, i32, i32) {
    %c0_i32 = arith.constant 0 : i32
    %c0_i32_0 = arith.constant 0 : i32
    %c0_i32_1 = arith.constant 0 : i32
    %c0_i32_2 = arith.constant 0 : i32
    return %arg0, %c0_i32, %c0_i32_0, %c0_i32_1 : i32, i32, i32, i32
  }
  func.func @transform_1(%arg0: i32) -> (i32, i32, i32) {
    %c0_i32 = arith.constant 0 : i32
    %c0_i32_0 = arith.constant 0 : i32
    %c0_i32_1 = arith.constant 0 : i32
    %c0_i32_2 = arith.constant 0 : i32
    return %c0_i32, %c0_i32_0, %c0_i32_1 : i32, i32, i32
  }
  func.func @transform_2(%arg0: i32) -> (i32, i32) {
    %c0_i32 = arith.constant 0 : i32
    %c0_i32_0 = arith.constant 0 : i32
    %c0_i32_1 = arith.constant 0 : i32
    return %c0_i32, %c0_i32_0 : i32, i32
  }
  func.func @transform_3(%arg0: i32) -> (i32, i32, i32, i32) {
    %c0_i32 = arith.constant 0 : i32
    %c0_i32_0 = arith.constant 0 : i32
    %c0_i32_1 = arith.constant 0 : i32
    %c0_i32_2 = arith.constant 0 : i32
    return %arg0, %c0_i32, %c0_i32_0, %c0_i32_1 : i32, i32, i32, i32
  }
}

</mosaic_0001>

<bundles_post_ra>
// kernel: tpu_custom_call.1
= control target key start
LH: loop header
LB: loop body
LE: loop exit
PB: predicated region body
PF: predicated region fallthrough
CT: control target
= control target key end

     0   :  { %8 = vsyncpa [#allocation6], 0  ;;  %s5304_s0 = inlined_call_operand.hbm [shape: f32[2,16,16,24], index: 0, kind: input, shape index: {}]   ;;  %s5305_s1 = inlined_call_operand.vmem [shape: f32[3,72,32], index: 1, kind: input, shape index: {}]   ;;  %s5306_s2 = inlined_call_operand.vmem [shape: f32[1,32], index: 2, kind: input, shape index: {}]   ;;  %s5307_s3 = inlined_call_operand.hbm [shape: f32[2,16,16,32], index: 3, kind: output, shape index: {}]  }
   0x1   :  { %10 = vsyncpa [#allocation6 + $0x1], 0 }
   0x2   :  { %11 = vsyncpa [#allocation7], 0 }
   0x3   :  { %13 = vsyncpa [#allocation7 + $0x1], 0  ;;  %s3915_s12 = smov 0   ;;  %s3917_s13 = smov 0  }
   0x4   :  { %s3919_s14 = smov 0   ;;  %s3921_s15 = smov 0  }
   0x5 LB: > { %s3936_s16 = sadd.s32 4294967295, %s3884_s15   ;;  %s3225_s17 = sadd.s32 4294967294, %s3884_s15   ;;  %s3884_s15 = sphi %s3921_s15, %s5320_s15   ;;  %s3880_s14 = sphi %s3919_s14, %s5319_s14   ;;  %s3876_s13 = sphi %s3917_s13, %s5318_s13   ;;  %s3872_s12 = sphi %s3915_s12, %s5317_s12  }
   0x6   : > { %s3940_s18 = sadd.s32 1, %s3884_s15   ;;  %s26_s19 = sadd.s32 1, %s3880_s14 }
   0x7   : > { %s23_s20 = ssub.s32 %s3884_s15, %s3940_s18  ;;  %p33_p0 = scmp.ne.s32.totalorder %s3880_s14, %s3876_s13 }
   0x8   : > { %p24_p1 = scmp.eq.s32.totalorder %s23_s20, 0  ;;  %p34_p2 = scmp.eq.s32.totalorder %s3884_s15, 0 }
   0x9   : > { %p39_p3 = scmp.ne.s32.totalorder %s3876_s13, %s3872_s12  ;;  %p40_p4 = scmp.eq.s32.totalorder %s3936_s16, 0 }
   0xa   : > { %s3952_s21 = scalar_select %p24_p1, %s3880_s14, %s26_s19  }
   0xb   : > { %p3954_p5 = por %p34_p2, %p33_p0  ;;  %p3958_p6 = por %p40_p4, %p39_p3 }
   0xc   : > { %p105_p7 = scmp.eq.s32.totalorder %s3936_s16, 1  ;;  %p111_p8 = scmp.eq.s32.totalorder %s3225_s17, 1 }
   0xd   : > { %p3747_p10 = scmp.lt.s32.totalorder %s3884_s15, 2  ;;  %s137_s26 = sand.u32 1, %s3880_s14  }
   0xe   : > { %p3965_p11 = por %p105_p7, %p33_p0  ;;  %p3969_p12 = por %p111_p8, %p39_p3 }
   0xf   : > { %s3354_s27 = sshll.u32 %s3884_s15, 12  ;;  %s3228_s28 = sshll.u32 %s137_s26, 8 }
  0x10   : > { %s5311_s24 = scalar_select %p3965_p11, 1, 0 }
  0x11   : > { %s5312_s25 = scalar_select %p3969_p12, 1, 0 }
  0x12   : > { %s3978_s4 = scalar_lea.hbm %s5304_s0, %s3354_s27  ;;  %s141_s5 = scalar_lea.vmem [#allocation5], %s3228_s28 }
  0x13   : > { %s148_s6 = sshll.u32 %s141_s5, 4  ;;  %p3982_p13 = pnand %p3747_p10, %p3954_p5  ;;  %s3986_s6 = int_to_ptr.vmem [resolvable:$true] %s148_s6 }
  0x14   : > { %s3988_s8 = scalar_lea.sflag [#allocation6], %s137_s26  ;;  %s3788_s9 = scalar_lea.hbm %s3978_s4, 4096 }
  0x15   : > { %p3789_p0 = scmp.ne.s32.totalorder %s3978_s4, %s3788_s9  ;;  %p3790_p1 = pneg %p3982_p13 }
  0x16   : > { %s3793_s17 = scalar_lea.hbm %s5304_s0, 8192  ;;  %p3794_p4 = scmp.lt.u32.totalorder %s3978_s4, %s5304_s0 }
  0x17   : > { %p3791_p2 = pnand %p3790_p1, %p3789_p0  ;;  %p3795_p5 = scmp.lt.u32.totalorder %s3793_s17, %s3788_s9 }
  0x18   : > { %p3797_p8 = scmp.lt.u32.totalorder %s3788_s9, %s3978_s4 }
  0x19   : > { %p3792_p3 = pneg %p3791_p2  ;;  %p3796_p7 = por %p3795_p5, %p3794_p4 }
  0x1b   : > { %p3798_p10 = por %p3797_p8, %p3796_p7 }
  0x1d   : > { %p3799_p9 = pnand %p3798_p10, %p3792_p3 }
  0x1f   : > { %3802 = shalt.err (!%p3799_p9)
}
  0x20   : > { %s3803_s22 = scalar_lea.vmem %s3986_s6, 4096  ;;  %s3886_s26 = smov [#allocation5]  }
  0x21   : > { %p3804_p0 = scmp.ne.s32.totalorder %s3986_s6, %s3803_s22  ;;  %s3808_s27 = sshll.u32 %s3886_s26, 4  ;;  %s3809_s27 = int_to_ptr.vmem [resolvable:$false] %s3808_s27 }
  0x22   : > { %s3810_s28 = scalar_lea.vmem %s3809_s27, 8192  ;;  %p3811_p11 = scmp.lt.s32.totalorder %s3986_s6, %s3809_s27 }
  0x23   : > { %p3806_p2 = pnand %p3804_p0, %p3790_p1  ;;  %p3812_p4 = scmp.lt.s32.totalorder %s3810_s28, %s3803_s22 }
  0x25   : > { %p3807_p12 = pneg %p3806_p2  ;;  %p3813_p5 = por %p3812_p4, %p3811_p11 }
  0x27   : > { %p3814_p7 = pnand %p3813_p5, %p3807_p12 }
  0x29   : > { %3817 = shalt.err (!%p3814_p7)
}
  0x2a   : > { %s3887_s29 = smov 128   ;;  %s3888_s30 = smov 8  }
  0x2b   : > { %3742 = dma.hbm_to_vmem [thread:$0]  (!%p3982_p13), %s3978_s4, 4096, %s3986_s6, %s3988_s8, %s3887_s29, %s3887_s29, %s3888_s30  }
  0x2c   : > { %p3231_p9 = scmp.ge.s32.totalorder %s3884_s15, 1  ;;  %p156_p1 = scmp.lt.s32.totalorder %s3884_s15, 3 }
  0x2e   : > { %p157_p3 = pnand %p3231_p9, %p156_p1 }
  0x2f   : > { %s4019_s5 = sand.u32 (!%p157_p3), 1, %s3876_s13  }
  0x30   : > { %160 = sbr.rel (%p157_p3) target bundleno = 839 (0x347), region = 32  ;;  %s3232_s9 = sshll.u32 (!%p157_p3), %s4019_s5, 8 }
  0x31   : > { %s163_s10 = scalar_lea.sflag (!%p157_p3), [#allocation6], %s4019_s5  ;;  %s4025_s11 = scalar_lea.vmem (!%p157_p3), [#allocation5], %s3232_s9 }
  0x37   : > { %3863 = dma.done.wait (%p3958_p6), %s163_s10, 4096  }
  0x38   : > { %3865 = vsyncadd (%p3958_p6), %s163_s10, 4294963200  ;;  %vm189_vm0 = vcmask 195584   ;;  %vm204_vm1 = vcmask 189440   ;;  %v3889_v0 = vmov 0.0   ;;  %vm192_vm2 = vcmask 191488   ;;  %v257_v1 = vld [vmem:[%s4025_s11 + $0x60] sm:$0xff] }
  0x39   : > { %233 = vst.msk [vmem:[#allocation2 + $0xd2] sm:$0x3] %vm204_vm1, %v3889_v0  ;;  %207 = vst.msk [vmem:[#allocation2 + $0x30] sm:$0x3] %vm204_vm1, %v3889_v0  ;;  %v258_v2 = vld [vmem:[%s4025_s11 + $0x68] sm:$0xff]  ;;  %v259_v3 = vld [vmem:[%s4025_s11 + $0x70] sm:$0xff] }
  0x3a   : > { %190 = vst.msk [vmem:[#allocation2] sm:$0xff] %vm189_vm0, %v3889_v0  ;;  %191 = vst.msk [vmem:[#allocation2 + $0x8] sm:$0xff] %vm189_vm0, %v3889_v0  ;;  %v260_v4 = vld [vmem:[%s4025_s11 + $0x78] sm:$0xff]  ;;  %v261_v5 = vld [vmem:[%s4025_s11 + $0x80] sm:$0xff]  ;;  %s3890_s23 = smov 24   ;;  %s3891_s4 = smov 48  }
  0x3b   : > { %194 = vst.msk [vmem:[#allocation2 + $0x18] sm:$0xff] %vm189_vm0, %v3889_v0  ;;  %195 = vst.msk [vmem:[#allocation2 + $0x20] sm:$0xff] %vm189_vm0, %v3889_v0  ;;  %v262_v6 = vld [vmem:[%s4025_s11 + $0x88] sm:$0xff]  ;;  %v263_v7 = vld [vmem:[%s4025_s11 + $0x90] sm:$0xff]  ;;  %vm534_vm3 = vcmask 392384   ;;  %vm727_vm4 = vcmask 589184  }
  0x3c   : > { %198 = vst.msk [vmem:[#allocation2 + $0x1b0] sm:$0xff] %vm189_vm0, %v3889_v0  ;;  %199 = vst.msk [vmem:[#allocation2 + $0x1b8] sm:$0xff] %vm189_vm0, %v3889_v0  ;;  %v264_v8 = vld [vmem:[%s4025_s11 + $0x98] sm:$0xff]  ;;  %v265_v9 = vld [vmem:[%s4025_s11 + $0xa0] sm:$0xff]  ;;  %vm801_vm5 = vcmask 588800   ;;  %vm1123_vm6 = vcmask 261120  }
  0x3d   : > { %201 = vst.msk [vmem:[#allocation2 + $0x1c8] sm:$0xff] %vm189_vm0, %v3889_v0  ;;  %202 = vst.msk [vmem:[#allocation2 + $0x1d0] sm:$0xff] %vm189_vm0, %v3889_v0  ;;  %v266_v10 = vld [vmem:[%s4025_s11 + $0xa8] sm:$0xff]  ;;  %v245_v11 = vld [vmem:[%s4025_s11] sm:$0xff]  ;;  %p5314_p11 = scmp.ne.s32.totalorder %s5311_s24, 0  ;;  %s3892_s26 = smov [#allocation8]  }
  0x3e   : > { %208 = vst.msk [vmem:[#allocation2 + $0x48] sm:$0x3] %vm204_vm1, %v3889_v0  ;;  %209 = vst.msk [vmem:[#allocation2 + $0x60] sm:$0x3] %vm204_vm1, %v3889_v0  ;;  %v246_v12 = vld [vmem:[%s4025_s11 + $0x8] sm:$0xff]  ;;  %v267_v13 = vld [vmem:[%s4025_s11 + $0xb0] sm:$0xff] }
  0x3f   : > { %210 = vst.msk [vmem:[#allocation2 + $0x78] sm:$0x3] %vm204_vm1, %v3889_v0  ;;  %211 = vst.msk [vmem:[#allocation2 + $0x90] sm:$0x3] %vm204_vm1, %v3889_v0  ;;  %v268_v14 = vld [vmem:[%s4025_s11 + $0xb8] sm:$0xff]  ;;  %v247_v15 = vld [vmem:[%s4025_s11 + $0x10] sm:$0xff] }
  0x40   : > { %212 = vst.msk [vmem:[#allocation2 + $0xa8] sm:$0x3] %vm204_vm1, %v3889_v0  ;;  %213 = vst.msk [vmem:[#allocation2 + $0xc0] sm:$0x3] %vm204_vm1, %v3889_v0  ;;  %v248_v16 = vld [vmem:[%s4025_s11 + $0x18] sm:$0xff]  ;;  %v269_v25 = vld [vmem:[%s4025_s11 + $0xc0] sm:$0xff] }
  0x41   : > { %214 = vst.msk [vmem:[#allocation2 + $0xd8] sm:$0x3] %vm204_vm1, %v3889_v0  ;;  %215 = vst.msk [vmem:[#allocation2 + $0xf0] sm:$0x3] %vm204_vm1, %v3889_v0  ;;  %v270_v26 = vld [vmem:[%s4025_s11 + $0xc8] sm:$0xff]  ;;  %v249_v27 = vld [vmem:[%s4025_s11 + $0x20] sm:$0xff] }
  0x42   : > { %216 = vst.msk [vmem:[#allocation2 + $0x108] sm:$0x3] %vm204_vm1, %v3889_v0  ;;  %217 = vst.msk [vmem:[#allocation2 + $0x120] sm:$0x3] %vm204_vm1, %v3889_v0  ;;  %v250_v28 = vld [vmem:[%s4025_s11 + $0x28] sm:$0xff]  ;;  %v271_v31 = vld [vmem:[%s4025_s11 + $0xd0] sm:$0xff] }
  0x43   : > { %218 = vst.msk [vmem:[#allocation2 + $0x138] sm:$0x3] %vm204_vm1, %v3889_v0  ;;  %219 = vst.msk [vmem:[#allocation2 + $0x150] sm:$0x3] %vm204_vm1, %v3889_v0  ;;  %v272_v32 = vld [vmem:[%s4025_s11 + $0xd8] sm:$0xff]  ;;  %v251_v33 = vld [vmem:[%s4025_s11 + $0x30] sm:$0xff] }
  0x44   : > { %220 = vst.msk [vmem:[#allocation2 + $0x168] sm:$0x3] %vm204_vm1, %v3889_v0  ;;  %221 = vst.msk [vmem:[#allocation2 + $0x180] sm:$0x3] %vm204_vm1, %v3889_v0  ;;  %v252_v34 = vld [vmem:[%s4025_s11 + $0x38] sm:$0xff]  ;;  %v792_v35 = vld [vmem:[%s5305_s1] sm:$0xff] }
  0x45   : > { %222 = vst.msk [vmem:[#allocation2 + $0x198] sm:$0x3] %vm204_vm1, %v3889_v0  ;;  %227 = vst.msk [vmem:[#allocation2 + $0x42] sm:$0x3] %vm204_vm1, %v3889_v0  ;;  %v793_v37 = vld [vmem:[%s5305_s1 + $0x8] sm:$0xff]  ;;  %v794_v38 = vld [vmem:[%s5305_s1 + $0x10] sm:$0xff] }
  0x46   : > { %228 = vst.msk [vmem:[#allocation2 + $0x5a] sm:$0x3] %vm204_vm1, %v3889_v0  ;;  %229 = vst.msk [vmem:[#allocation2 + $0x72] sm:$0x3] %vm204_vm1, %v3889_v0  ;;  %v795_v39 = vld [vmem:[%s5305_s1 + $0x18] sm:$0xff]  ;;  %v3677_v40 = vpack.c.bf16 %v793_v37, %v792_v35  ;;  %v253_v41 = vld [vmem:[%s4025_s11 + $0x40] sm:$0xff] }
  0x47   : > { %230 = vst.msk [vmem:[#allocation2 + $0x8a] sm:$0x3] %vm204_vm1, %v3889_v0  ;;  %231 = vst.msk [vmem:[#allocation2 + $0xa2] sm:$0x3] %vm204_vm1, %v3889_v0  ;;  %v3681_v42 = vpack.c.bf16 %v795_v39, %v794_v38  ;;  %v796_v43 = vld [vmem:[%s5305_s1 + $0x20] sm:$0xff]  ;;  %v254_v45 = vld [vmem:[%s4025_s11 + $0x48] sm:$0xff] }
  0x48   : > { %232 = vst.msk [vmem:[#allocation2 + $0xba] sm:$0x3] %vm204_vm1, %v3889_v0  ;;  %234 = vst.msk [vmem:[#allocation2 + $0xea] sm:$0x3] %vm204_vm1, %v3889_v0  ;;  %v797_v46 = vld [vmem:[%s5305_s1 + $0x28] sm:$0xff]  ;;  %3725 = vmatprep.subr.bf16.mxu1 %v3677_v40  ;;  %3678 = vmatprep.subr.bf16.mxu0 %v3677_v40  ;;  %v798_v53 = vld [vmem:[%s5305_s1 + $0x30] sm:$0xff] }
  0x49   : > { %235 = vst.msk [vmem:[#allocation2 + $0x102] sm:$0x3] %vm204_vm1, %v3889_v0  ;;  %236 = vst.msk [vmem:[#allocation2 + $0x11a] sm:$0x3] %vm204_vm1, %v3889_v0  ;;  %v374_v50 = vld [vmem:[#allocation2 + $0x2] sm:$0xff]  ;;  %3730 = vmatpush3.bf16.msra.mxu1 %v3677_v40  ;;  %3680 = vmatpush3.bf16.msra.mxu0 %v3677_v40  ;;  %v3685_v52 = vpack.c.bf16 %v797_v46, %v796_v43  ;;  %v799_v54 = vld [vmem:[%s5305_s1 + $0x38] sm:$0xff] }
  0x4a   : > { %237 = vst.msk [vmem:[#allocation2 + $0x132] sm:$0x3] %vm204_vm1, %v3889_v0  ;;  %238 = vst.msk [vmem:[#allocation2 + $0x14a] sm:$0x3] %vm204_vm1, %v3889_v0  ;;  %3726 = vmatprep.subr.bf16.mxu1 %v3681_v42  ;;  %3682 = vmatprep.subr.bf16.mxu0 %v3681_v42  ;;  %v567_v57 = vld [vmem:[#allocation2 + $0x4] sm:$0xff]  ;;  %v3689_v58 = vpack.c.bf16 %v799_v54, %v798_v53  ;;  %v255_v61 = vld [vmem:[%s4025_s11 + $0x50] sm:$0xff] }
  0x4b   : > { %239 = vst.msk [vmem:[#allocation2 + $0x162] sm:$0x3] %vm204_vm1, %v3889_v0  ;;  %240 = vst.msk [vmem:[#allocation2 + $0x17a] sm:$0x3] %vm204_vm1, %v3889_v0  ;;  %v256_v63 = vld [vmem:[%s4025_s11 + $0x58] sm:$0xff]  ;;  %s3822_s27 = sshll.u32 %s3892_s26, 4  ;;  %s3823_s27 = int_to_ptr.vmem [resolvable:$false] %s3822_s27 }
  0x4c   : > { %241 = vst.msk [vmem:[#allocation2 + $0x192] sm:$0x3] %vm204_vm1, %v3889_v0  ;;  %242 = vst.msk [vmem:[#allocation2 + $0x1aa] sm:$0x3] %vm204_vm1, %v3889_v0  ;;  %s3824_s28 = scalar_lea.vmem %s3823_s27, 8192 }
  0x4d   : > { %205 = vst.msk [vmem:[#allocation2] sm:$0x3] %vm204_vm1, %v3889_v0  ;;  %206 = vst.msk [vmem:[#allocation2 + $0x18] sm:$0x3] %vm204_vm1, %v3889_v0  ;;  %3731 = vmatpush3.bf16.msra.mxu1 %v3681_v42  ;;  %3684 = vmatpush3.bf16.msra.mxu0 %v3681_v42 }
  0x4e   : > { %223 = vst.msk [vmem:[#allocation2 + $0x1b0] sm:$0x3] %vm204_vm1, %v3889_v0  ;;  %224 = vst.msk [vmem:[#allocation2 + $0x1c8] sm:$0x3] %vm204_vm1, %v3889_v0  ;;  %3727 = vmatprep.subr.bf16.mxu1 %v3685_v52  ;;  %3686 = vmatprep.subr.bf16.mxu0 %v3685_v52 }
  0x4f   : > { %193 = vst.msk [vmem:[#allocation2 + $0x10] sm:$0xf] %vm192_vm2, %v3889_v0  ;;  %196 = vst.msk [vmem:[#allocation2 + $0x28] sm:$0xf] %vm192_vm2, %v3889_v0 }
  0x50   : > { %200 = vst.msk [vmem:[#allocation2 + $0x1c0] sm:$0xf] %vm192_vm2, %v3889_v0  ;;  %203 = vst.msk [vmem:[#allocation2 + $0x1d8] sm:$0xf] %vm192_vm2, %v3889_v0 }
  0x51   : > { %225 = vst.msk [vmem:[#allocation2 + $0x12] sm:$0x3] %vm204_vm1, %v3889_v0  ;;  %226 = vst.msk [vmem:[#allocation2 + $0x2a] sm:$0x3] %vm204_vm1, %v3889_v0  ;;  %3732 = vmatpush3.bf16.msra.mxu1 %v3685_v52  ;;  %3688 = vmatpush3.bf16.msra.mxu0 %v3685_v52 }
  0x52   : > { %243 = vst.msk [vmem:[#allocation2 + $0x1c2] sm:$0x3] %vm204_vm1, %v3889_v0  ;;  %244 = vst.msk [vmem:[#allocation2 + $0x1da] sm:$0x3] %vm204_vm1, %v3889_v0  ;;  %v311_v0 = vld [vmem:[#allocation2 + $0x8] sm:$0xff]  ;;  %3728 = vmatprep.subr.bf16.mxu1 %v3689_v58  ;;  %3690 = vmatprep.subr.bf16.mxu0 %v3689_v58 }
  0x53   : > { %290 = vst.msk [vmem:[#allocation2 + $0xc2] sm:$0xff] %vm189_vm0, %v257_v1  ;;  %291 = vst.msk [vmem:[#allocation2 + $0xca] sm:$0xff] %vm189_vm0, %v258_v2 }
  0x54   : > { %292 = vst.msk [vmem:[#allocation2 + $0xda] sm:$0xff] %vm189_vm0, %v259_v3  ;;  %293 = vst.msk [vmem:[#allocation2 + $0xe2] sm:$0xff] %vm189_vm0, %v260_v4  ;;  %v310_v62 = vld [vmem:[#allocation2] sm:$0xff]  ;;  %v312_v3 = vld [vmem:[#allocation2 + $0x18] sm:$0xff] }
  0x55   : > { %294 = vst.msk [vmem:[#allocation2 + $0xf2] sm:$0xff] %vm189_vm0, %v261_v5  ;;  %295 = vst.msk [vmem:[#allocation2 + $0xfa] sm:$0xff] %vm189_vm0, %v262_v6  ;;  %v313_v5 = vld [vmem:[#allocation2 + $0x20] sm:$0xff]  ;;  %3733 = vmatpush3.bf16.msra.mxu1 %v3689_v58  ;;  %3692 = vmatpush3.bf16.msra.mxu0 %v3689_v58  ;;  %v3267_v58 = vld [vmem:[%s5305_s1 + $0x50] sm:$0xff] }
  0x56   : > { %296 = vst.msk [vmem:[#allocation2 + $0x10a] sm:$0xff] %vm189_vm0, %v263_v7  ;;  %297 = vst.msk [vmem:[#allocation2 + $0x112] sm:$0xff] %vm189_vm0, %v264_v8  ;;  %v375_v56 = vld [vmem:[#allocation2 + $0xa] sm:$0xff]  ;;  %v800_v6 = vld [vmem:[%s5305_s1 + $0x40] sm:$0xff] }
  0x57   : > { %298 = vst.msk [vmem:[#allocation2 + $0x122] sm:$0xff] %vm189_vm0, %v265_v9  ;;  %299 = vst.msk [vmem:[#allocation2 + $0x12a] sm:$0xff] %vm189_vm0, %v266_v10  ;;  %3729 = vmatprep.subr.mxu1 %v800_v6  ;;  %3495 = vmatprep.subr.mxu0 %v800_v6 }
  0x58   : > { %278 = vst.msk [vmem:[#allocation2 + $0x32] sm:$0xff] %vm189_vm0, %v245_v11  ;;  %279 = vst.msk [vmem:[#allocation2 + $0x3a] sm:$0xff] %vm189_vm0, %v246_v12  ;;  %v568_v7 = vld [vmem:[#allocation2 + $0xc] sm:$0xff]  ;;  %v376_v11 = vld [vmem:[#allocation2 + $0x1a] sm:$0xff] }
  0x59   : > { %300 = vst.msk [vmem:[#allocation2 + $0x13a] sm:$0xff] %vm189_vm0, %v267_v13  ;;  %301 = vst.msk [vmem:[#allocation2 + $0x142] sm:$0xff] %vm189_vm0, %v268_v14  ;;  %3734 = vmatpush3.msra.mxu1 %v800_v6  ;;  %3496 = vmatpush3.msra.mxu0 %v800_v6  ;;  %v377_v14 = vld [vmem:[#allocation2 + $0x22] sm:$0xff] }
  0x5a   : > { %v390_v17 = vld [vmem:[#allocation2 + $0xc2] sm:$0xff]  ;;  %280 = vst.msk [vmem:[#allocation2 + $0x4a] sm:$0xff] %vm189_vm0, %v247_v15  ;;  %281 = vst.msk [vmem:[#allocation2 + $0x52] sm:$0xff] %vm189_vm0, %v248_v16  ;;  %v391_v19 = vld [vmem:[#allocation2 + $0xca] sm:$0xff] }
  0x5b   : > { %v583_v18 = vld [vmem:[#allocation2 + $0xc4] sm:$0xff]  ;;  %470 = vrot.lane.b32.xlu0 %v390_v17, %s3890_s23  ;;  %v584_v20 = vld [vmem:[#allocation2 + $0xcc] sm:$0xff]  ;;  %v392_v21 = vld [vmem:[#allocation2 + $0xda] sm:$0xff]  ;;  %302 = vst.msk [vmem:[#allocation2 + $0x152] sm:$0xff] %vm189_vm0, %v269_v25 }
  0x5c   : > { %663 = vrot.lane.b32.xlu1 %v583_v18, %s3891_s4  ;;  %v393_v22 = vld [vmem:[#allocation2 + $0xe2] sm:$0xff]  ;;  %v394_v29 = vld [vmem:[#allocation2 + $0xf2] sm:$0xff]  ;;  %v395_v30 = vld [vmem:[#allocation2 + $0xfa] sm:$0xff]  ;;  %303 = vst.msk [vmem:[#allocation2 + $0x15a] sm:$0xff] %vm189_vm0, %v270_v26 }
  0x5d   : > { %v585_v23 = vld [vmem:[#allocation2 + $0xdc] sm:$0xff]  ;;  %v586_v24 = vld [vmem:[#allocation2 + $0xe4] sm:$0xff]  ;;  %282 = vst.msk [vmem:[#allocation2 + $0x62] sm:$0xff] %vm189_vm0, %v249_v27  ;;  %283 = vst.msk [vmem:[#allocation2 + $0x6a] sm:$0xff] %vm189_vm0, %v250_v28 }
  0x5e   : > { %304 = vst.msk [vmem:[#allocation2 + $0x16a] sm:$0xff] %vm189_vm0, %v271_v31  ;;  %305 = vst.msk [vmem:[#allocation2 + $0x172] sm:$0xff] %vm189_vm0, %v272_v32  ;;  %v326_v36 = vld [vmem:[#allocation2 + $0xc0] sm:$0xff]  ;;  %v327_v44 = vld [vmem:[#allocation2 + $0xc8] sm:$0xff] }
  0x5f   : > { %472 = vrot.lane.b32.xlu0 %v391_v19, %s3890_s23  ;;  %284 = vst.msk [vmem:[#allocation2 + $0x7a] sm:$0xff] %vm189_vm0, %v251_v33  ;;  %285 = vst.msk [vmem:[#allocation2 + $0x82] sm:$0xff] %vm189_vm0, %v252_v34  ;;  %v328_v47 = vld [vmem:[#allocation2 + $0xd8] sm:$0xff]  ;;  %v329_v48 = vld [vmem:[#allocation2 + $0xe0] sm:$0xff] }
  0x60   : > { %665 = vrot.lane.b32.xlu1 %v584_v20, %s3891_s4  ;;  %358 = vst.msk [vmem:[#allocation3 + $0x80] sm:$0xff] %vm189_vm0, %v326_v36  ;;  %286 = vst.msk [vmem:[#allocation2 + $0x92] sm:$0xff] %vm189_vm0, %v253_v41  ;;  %v587_v49 = vld [vmem:[#allocation2 + $0xf4] sm:$0xff]  ;;  %v588_v55 = vld [vmem:[#allocation2 + $0xfc] sm:$0xff] }
  0x61   : > { %359 = vst.msk [vmem:[#allocation3 + $0x88] sm:$0xff] %vm189_vm0, %v327_v44  ;;  %287 = vst.msk [vmem:[#allocation2 + $0x9a] sm:$0xff] %vm189_vm0, %v254_v45  ;;  %v4163_v51 = vld [vmem:[#allocation2 + $0xf0] sm:$0xff]  ;;  %v331_v60 = vld [vmem:[#allocation2 + $0xf8] sm:$0xff] }
  0x62   : > { %360 = vst.msk [vmem:[#allocation3 + $0x90] sm:$0xff] %vm189_vm0, %v328_v47  ;;  %361 = vst.msk [vmem:[#allocation3 + $0x98] sm:$0xff] %vm189_vm0, %v329_v48  ;;  %v396_v59 = vld [vmem:[#allocation2 + $0x10a] sm:$0xff]  ;;  %v397_v8 = vld [vmem:[#allocation2 + $0x112] sm:$0xff] }
  0x63   : > { %474 = vrot.lane.b32.xlu0 %v392_v21, %s3890_s23  ;;  %362 = vst.msk [vmem:[#allocation3 + $0xa0] sm:$0xff] %vm189_vm0, %v4163_v51  ;;  %363 = vst.msk [vmem:[#allocation3 + $0xa8] sm:$0xff] %vm189_vm0, %v331_v60  ;;  %v332_v1 = vld [vmem:[#allocation2 + $0x108] sm:$0xff]  ;;  %v333_v2 = vld [vmem:[#allocation2 + $0x110] sm:$0xff] }
  0x64   : > { %476 = vrot.lane.b32.xlu1 %v393_v22, %s3890_s23  ;;  %288 = vst.msk [vmem:[#allocation2 + $0xaa] sm:$0xff] %vm189_vm0, %v255_v61  ;;  %342 = vst.msk [vmem:[#allocation3] sm:$0xff] %vm189_vm0, %v310_v62  ;;  %v4187_v4 = vld [vmem:[#allocation2 + $0x30] sm:$0xff]  ;;  %v334_v9 = vld [vmem:[#allocation2 + $0x120] sm:$0xff] }
  0x65   : > { %289 = vst.msk [vmem:[#allocation2 + $0xb2] sm:$0xff] %vm189_vm0, %v256_v63  ;;  %343 = vst.msk [vmem:[#allocation3 + $0x8] sm:$0xff] %vm189_vm0, %v311_v0  ;;  %v589_v10 = vld [vmem:[#allocation2 + $0x10c] sm:$0xff]  ;;  %v590_v13 = vld [vmem:[#allocation2 + $0x114] sm:$0xff] }
  0x66   : > { %364 = vst.msk [vmem:[#allocation3 + $0xb0] sm:$0xff] %vm189_vm0, %v332_v1  ;;  %365 = vst.msk [vmem:[#allocation3 + $0xb8] sm:$0xff] %vm189_vm0, %v333_v2  ;;  %v335_v12 = vld [vmem:[#allocation2 + $0x128] sm:$0xff]  ;;  %v569_v15 = vld [vmem:[#allocation2 + $0x1c] sm:$0xff] }
  0x67   : > { %667 = vrot.lane.b32.xlu0 %v585_v23, %s3891_s4  ;;  %344 = vst.msk [vmem:[#allocation3 + $0x10] sm:$0xff] %vm189_vm0, %v312_v3  ;;  %345 = vst.msk [vmem:[#allocation3 + $0x18] sm:$0xff] %vm189_vm0, %v313_v5  ;;  %v398_v16 = vld [vmem:[#allocation2 + $0x122] sm:$0xff]  ;;  %v4205_v17 = vld [vmem:[#allocation2 + $0x38] sm:$0xff] }
  0x68   : > { %669 = vrot.lane.b32.xlu1 %v586_v24, %s3891_s4  ;;  %346 = vst.msk [vmem:[#allocation3 + $0x20] sm:$0xff] %vm189_vm0, %v4187_v4  ;;  %366 = vst.msk [vmem:[#allocation3 + $0xc0] sm:$0xff] %vm189_vm0, %v334_v9  ;;  %v570_v18 = vld [vmem:[#allocation2 + $0x24] sm:$0xff]  ;;  %v336_v20 = vld [vmem:[#allocation2 + $0x138] sm:$0xff] }
  0x69   : > { %367 = vst.msk [vmem:[#allocation3 + $0xc8] sm:$0xff] %vm189_vm0, %v335_v12  ;;  %347 = vst.msk [vmem:[#allocation3 + $0x28] sm:$0xff] %vm189_vm0, %v4205_v17  ;;  %v399_v19 = vld [vmem:[#allocation2 + $0x12a] sm:$0xff]  ;;  %v4214_v22 = vld [vmem:[#allocation2 + $0x32] sm:$0xff] }
  0x6a   : > { %368 = vst.msk [vmem:[#allocation3 + $0xd0] sm:$0xff] %vm189_vm0, %v336_v20  ;;  %v591_v21 = vld [vmem:[#allocation2 + $0x124] sm:$0xff]  ;;  %v592_v24 = vld [vmem:[#allocation2 + $0x12c] sm:$0xff]  ;;  %v4220_v25 = vld [vmem:[#allocation2 + $0x3a] sm:$0xff] }
  0x6b   : > { %478 = vrot.lane.b32.xlu0 %v394_v29, %s3890_s23  ;;  %v337_v23 = vld [vmem:[#allocation2 + $0x140] sm:$0xff]  ;;  %v4222_v26 = vld [vmem:[#allocation2 + $0x48] sm:$0xff]  ;;  %v4229_v27 = vld [vmem:[#allocation2 + $0x34] sm:$0xff] }
  0x6c   : > { %480 = vrot.lane.b32.xlu1 %v395_v30, %s3890_s23  ;;  %369 = vst.msk [vmem:[#allocation3 + $0xd8] sm:$0xff] %vm189_vm0, %v337_v23  ;;  %348 = vst.msk [vmem:[#allocation3 + $0x30] sm:$0xff] %vm189_vm0, %v4222_v26  ;;  %v400_v28 = vld [vmem:[#allocation2 + $0x13a] sm:$0xff]  ;;  %v4231_v29 = vld [vmem:[#allocation2 + $0x50] sm:$0xff] }
  0x6d   : > { %349 = vst.msk [vmem:[#allocation3 + $0x38] sm:$0xff] %vm189_vm0, %v4231_v29  ;;  %v4238_v30 = vld [vmem:[#allocation2 + $0x3c] sm:$0xff]  ;;  %v338_v32 = vld [vmem:[#allocation2 + $0x150] sm:$0xff]  ;;  %v594_v36 = vld [vmem:[#allocation2 + $0x144] sm:$0xff] }
  0x6e   : > { %v401_v31 = vld [vmem:[#allocation2 + $0x142] sm:$0xff]  ;;  %370 = vst.msk [vmem:[#allocation3 + $0xe0] sm:$0xff] %vm189_vm0, %v338_v32  ;;  %v4244_v34 = vld [vmem:[#allocation2 + $0x4a] sm:$0xff]  ;;  %v339_v35 = vld [vmem:[#allocation2 + $0x158] sm:$0xff] }
  0x6f   : > { %671 = vrot.lane.b32.xlu0 %v587_v49, %s3891_s4  ;;  %v593_v33 = vld [vmem:[#allocation2 + $0x13c] sm:$0xff]  ;;  %371 = vst.msk [vmem:[#allocation3 + $0xe8] sm:$0xff] %vm189_vm0, %v339_v35  ;;  %v4250_v37 = vld [vmem:[#allocation2 + $0x52] sm:$0xff]  ;;  %v4261_v41 = vld [vmem:[#allocation2 + $0x68] sm:$0xff] }
  0x70   : > { %438 = vrot.lane.b32.xlu1 %v374_v50, %s3890_s23  ;;  %v4252_v38 = vld [vmem:[#allocation2 + $0x60] sm:$0xff]  ;;  %v4259_v39 = vld [vmem:[#allocation2 + $0x4c] sm:$0xff]  ;;  %351 = vst.msk [vmem:[#allocation3 + $0x48] sm:$0xff] %vm189_vm0, %v4261_v41  ;;  %v4268_v42 = vld [vmem:[#allocation2 + $0x54] sm:$0xff] }
  0x71   : > { %350 = vst.msk [vmem:[#allocation3 + $0x40] sm:$0xff] %vm189_vm0, %v4252_v38  ;;  %v402_v40 = vld [vmem:[#allocation2 + $0x152] sm:$0xff]  ;;  %v403_v43 = vld [vmem:[#allocation2 + $0x15a] sm:$0xff]  ;;  %v340_v44 = vld [vmem:[#allocation2 + $0x168] sm:$0xff] }
  0x72   : > { %372 = vst.msk [vmem:[#allocation3 + $0xf0] sm:$0xff] %vm189_vm0, %v340_v44  ;;  %v595_v45 = vld [vmem:[#allocation2 + $0x154] sm:$0xff]  ;;  %v4274_v46 = vld [vmem:[#allocation2 + $0x62] sm:$0xff]  ;;  %v4280_v49 = vld [vmem:[#allocation2 + $0x6a] sm:$0xff] }
  0x73   : > { %673 = vrot.lane.b32.xlu0 %v588_v55, %s3891_s4  ;;  %v341_v47 = vld [vmem:[#allocation2 + $0x170] sm:$0xff]  ;;  %v596_v48 = vld [vmem:[#allocation2 + $0x15c] sm:$0xff]  ;;  %v4289_v52 = vld [vmem:[#allocation2 + $0x64] sm:$0xff] }
  0x74   : > { %440 = vrot.lane.b32.xlu1 %v375_v56, %s3890_s23  ;;  %373 = vst.msk [vmem:[#allocation3 + $0xf8] sm:$0xff] %vm189_vm0, %v341_v47  ;;  %v4282_v50 = vld [vmem:[#allocation2 + $0x78] sm:$0xff]  ;;  %v404_v53 = vld [vmem:[#allocation2 + $0x16a] sm:$0xff]  ;;  %v4291_v54 = vld [vmem:[#allocation2 + $0x80] sm:$0xff] }
  0x75   : > { %352 = vst.msk [vmem:[#allocation3 + $0x50] sm:$0xff] %vm189_vm0, %v4282_v50  ;;  %353 = vst.msk [vmem:[#allocation3 + $0x58] sm:$0xff] %vm189_vm0, %v4291_v54  ;;  %v4298_v55 = vld [vmem:[#allocation2 + $0x6c] sm:$0xff]  ;;  %v4311_v61 = vld [vmem:[#allocation2 + $0x7a] sm:$0xff] }
  0x76   : > { %v405_v56 = vld [vmem:[#allocation2 + $0x172] sm:$0xff]  ;;  %v4317_v63 = vld [vmem:[#allocation2 + $0x82] sm:$0xff] }
  0x77   : > { %631 = vrot.lane.b32.xlu0 %v567_v57, %s3891_s4  ;;  %v3266_v57 = vld [vmem:[%s5305_s1 + $0x48] sm:$0xff]  ;;  %v598_v62 = vld [vmem:[#allocation2 + $0x174] sm:$0xff]  ;;  %v4326_v1 = vld [vmem:[#allocation2 + $0x7c] sm:$0xff] }
  0x78   : > { %482 = vrot.lane.b32.xlu1 %v396_v59, %s3890_s23  ;;  %v4306_v59 = vpack.c.bf16 %v3267_v58, %v3266_v57  ;;  %v597_v60 = vld [vmem:[#allocation2 + $0x16c] sm:$0xff]  ;;  %v4328_v2 = vld [vmem:[#allocation2 + $0x84] sm:$0xff]  ;;  %v4330_v3 = vld [vmem:[#allocation2 + $0x98] sm:$0xff] }
  0x79   : > { %v4319_v0 = vld [vmem:[#allocation2 + $0x90] sm:$0xff]  ;;  %355 = vst.msk [vmem:[#allocation3 + $0x68] sm:$0xff] %vm189_vm0, %v4330_v3  ;;  %v3269_v20 = vld [vmem:[%s5305_s1 + $0x60] sm:$0xff]  ;;  %v3272_v32 = vld [vmem:[%s5305_s1 + $0x78] sm:$0xff] }
  0x7a   : > { %3694 = vmatprep.subr.bf16.mxu1 %v4306_v59  ;;  %354 = vst.msk [vmem:[#allocation3 + $0x60] sm:$0xff] %vm189_vm0, %v4319_v0  ;;  %v4342_v5 = vld [vmem:[#allocation2 + $0x92] sm:$0xff] }
  0x7b   : > { %633 = vrot.lane.b32.xlu0 %v568_v7, %s3891_s4  ;;  %v4362_v12 = vld [vmem:[#allocation2 + $0x94] sm:$0xff]  ;;  %v4429_v47 = vld [vmem:[#allocation2 + $0xac] sm:$0xff] }
  0x7c   : > { %484 = vrot.lane.b32.xlu1 %v397_v8, %s3890_s23  ;;  %v4350_v8 = vld [vmem:[#allocation2 + $0x9a] sm:$0xff]  ;;  %v3307_v44 = vld [vmem:[%s5305_s1 + $0x90] sm:$0xff] }
  0x7f   : > { %675 = vrot.lane.b32.xlu0 %v589_v10, %s3891_s4 }
  0x80   : > { %442 = vrot.lane.b32.xlu1 %v376_v11, %s3890_s23  ;;  %v4352_v11 = vld [vmem:[#allocation2 + $0xa8] sm:$0xff] }
  0x81   : > { %356 = vst.msk [vmem:[#allocation3 + $0x70] sm:$0xff] %vm189_vm0, %v4352_v11 }
  0x83   : > { %677 = vrot.lane.b32.xlu0 %v590_v13, %s3891_s4 }
  0x84   : > { %444 = vrot.lane.b32.xlu1 %v377_v14, %s3890_s23 }
  0x87   : > { %635 = vrot.lane.b32.xlu0 %v569_v15, %s3891_s4  ;;  %v4364_v15 = vld [vmem:[#allocation2 + $0x9c] sm:$0xff] }
  0x88   : > { %486 = vrot.lane.b32.xlu1 %v398_v16, %s3890_s23  ;;  %v4366_v16 = vld [vmem:[#allocation2 + $0xb0] sm:$0xff] }
  0x89   : > { %357 = vst.msk [vmem:[#allocation3 + $0x78] sm:$0xff] %vm189_vm0, %v4366_v16 }
  0x8b   : > { %637 = vrot.lane.b32.xlu0 %v570_v18, %s3891_s4 }
  0x8c   : > { %488 = vrot.lane.b32.xlu1 %v399_v19, %s3890_s23  ;;  %v3268_v19 = vld [vmem:[%s5305_s1 + $0x58] sm:$0xff] }
  0x8d   : > { %v3697_v23 = vpack.c.bf16 %v3269_v20, %v3268_v19 }
  0x8f   : > { %679 = vrot.lane.b32.xlu0 %v591_v21, %s3891_s4 }
  0x90   : > { %446 = vrot.lane.b32.xlu1 %v4214_v22, %s3890_s23 }
  0x93   : > { %681 = vrot.lane.b32.xlu0 %v592_v24, %s3891_s4 }
  0x94   : > { %448 = vrot.lane.b32.xlu1 %v4220_v25, %s3890_s23 }
  0x97   : > { %639 = vrot.lane.b32.xlu0 %v4229_v27, %s3891_s4 }
  0x98   : > { %490 = vrot.lane.b32.xlu1 %v400_v28, %s3890_s23 }
  0x9b   : > { %641 = vrot.lane.b32.xlu0 %v4238_v30, %s3891_s4 }
  0x9c   : > { %492 = vrot.lane.b32.xlu1 %v401_v31, %s3890_s23 }
  0x9f   : > { %683 = vrot.lane.b32.xlu0 %v593_v33, %s3891_s4  ;;  %v3273_v33 = vld [vmem:[%s5305_s1 + $0x80] sm:$0xff] }
  0xa0   : > { %450 = vrot.lane.b32.xlu1 %v4244_v34, %s3890_s23 }
  0xa3   : > { %685 = vrot.lane.b32.xlu0 %v594_v36, %s3891_s4 }
  0xa4   : > { %452 = vrot.lane.b32.xlu1 %v4250_v37, %s3890_s23 }
  0xa7   : > { %643 = vrot.lane.b32.xlu0 %v4259_v39, %s3891_s4 }
  0xa8   : > { %494 = vrot.lane.b32.xlu1 %v402_v40, %s3890_s23 }
  0xab   : > { %645 = vrot.lane.b32.xlu0 %v4268_v42, %s3891_s4 }
  0xac   : > { %496 = vrot.lane.b32.xlu1 %v403_v43, %s3890_s23  ;;  %v3705_v43 = vpack.c.bf16 %v3273_v33, %v3272_v32  ;;  %v3315_v33 = vld [vmem:[%s5305_s1 + $0xd0] sm:$0xff] }
  0xaf   : > { %687 = vrot.lane.b32.xlu0 %v595_v45, %s3891_s4 }
  0xb0   : > { %454 = vrot.lane.b32.xlu1 %v4274_v46, %s3890_s23 }
  0xb3   : > { %689 = vrot.lane.b32.xlu0 %v596_v48, %s3891_s4 }
  0xb4   : > { %456 = vrot.lane.b32.xlu1 %v4280_v49, %s3890_s23 }
  0xb7   : > { %647 = vrot.lane.b32.xlu0 %v4289_v52, %s3891_s4 }
  0xb8   : > { %498 = vrot.lane.b32.xlu1 %v404_v53, %s3890_s23 }
  0xbb   : > { %649 = vrot.lane.b32.xlu0 %v4298_v55, %s3891_s4 }
  0xbc   : > { %500 = vrot.lane.b32.xlu1 %v405_v56, %s3890_s23  ;;  %v4431_v56 = vld [vmem:[#allocation2 + $0xb4] sm:$0xff] }
  0xbf   : > { %691 = vrot.lane.b32.xlu0 %v597_v60, %s3891_s4 }
  0xc0   : > { %458 = vrot.lane.b32.xlu1 %v4311_v61, %s3890_s23 }
  0xc3   : > { %693 = vrot.lane.b32.xlu0 %v598_v62, %s3891_s4 }
  0xc4   : > { %460 = vrot.lane.b32.xlu1 %v4317_v63, %s3890_s23 }
  0xc7   : > { %651 = vrot.lane.b32.xlu0 %v4326_v1, %s3891_s4 }
  0xc8   : > { %653 = vrot.lane.b32.xlu1 %v4328_v2, %s3891_s4 }
  0xcb   : > { %1284 = vrot.lane.b32.xlu0 %v4214_v22, %s3890_s23 }
  0xcc   : > { %1286 = vrot.lane.b32.xlu1 %v4220_v25, %s3890_s23  ;;  %v3270_v25 = vld [vmem:[%s5305_s1 + $0x68] sm:$0xff] }
  0xcd   : > { %v471_v6 = vpop.permute.xlu0 %470 }
  0xce   : > { %v664_v7 = vpop.permute.xlu1 %663  ;;  %551 = vst.msk [vmem:[#allocation3 + $0x80] sm:$0xff] %vm534_vm3, %v471_v6 }
  0xcf   : > { %744 = vst.msk [vmem:[#allocation3 + $0x80] sm:$0xff] %vm727_vm4, %v664_v7  ;;  %1476 = vrot.lane.b32.xlu0 %v4229_v27, %s3891_s4 }
  0xd0   : > { %462 = vrot.lane.b32.xlu1 %v4342_v5, %s3890_s23 }
  0xd1   : > { %v473_v9 = vpop.permute.xlu0 %472 }
  0xd2   : > { %v666_v10 = vpop.permute.xlu1 %665  ;;  %552 = vst.msk [vmem:[#allocation3 + $0x88] sm:$0xff] %vm534_vm3, %v473_v9 }
  0xd3   : > { %745 = vst.msk [vmem:[#allocation3 + $0x88] sm:$0xff] %vm727_vm4, %v666_v10  ;;  %1478 = vrot.lane.b32.xlu0 %v4238_v30, %s3891_s4  ;;  %v4399_v30 = vld [vmem:[#allocation2 + $0xaa] sm:$0xff] }
  0xd4   : > { %464 = vrot.lane.b32.xlu1 %v4350_v8, %s3890_s23 }
  0xd5   : > { %v475_v13 = vpop.permute.xlu0 %474 }
  0xd6   : > { %v477_v14 = vpop.permute.xlu1 %476  ;;  %553 = vst.msk [vmem:[#allocation3 + $0x90] sm:$0xff] %vm534_vm3, %v475_v13  ;;  %v776_v18 = vld [vmem:[#allocation3 + $0x80] sm:$0xff] }
  0xd7   : > { %554 = vst.msk [vmem:[#allocation3 + $0x98] sm:$0xff] %vm534_vm3, %v477_v14  ;;  %3521 = vmatprep.mubr.msk.f32.mxu1 %vm801_vm5, %v776_v18  ;;  %655 = vrot.lane.b32.xlu0 %v4362_v12, %s3891_s4  ;;  %v3309_v13 = vld [vmem:[%s5305_s1 + $0xa0] sm:$0xff]  ;;  %v3310_v14 = vld [vmem:[%s5305_s1 + $0xa8] sm:$0xff] }
  0xd8   : > { %1204 = vst.msk [vmem:[#allocation3 + $0x80] sm:$0xff] %vm189_vm0, %v4163_v51  ;;  %657 = vrot.lane.b32.xlu1 %v4364_v15, %s3891_s4  ;;  %v3271_v51 = vld [vmem:[%s5305_s1 + $0x70] sm:$0xff]  ;;  %v3713_v18 = vpack.c.bf16 %v3310_v14, %v3309_v13 }
  0xd9   : > { %v668_v21 = vpop.permute.xlu0 %667  ;;  %v3701_v31 = vpack.c.bf16 %v3271_v51, %v3270_v25  ;;  %v3313_v25 = vld [vmem:[%s5305_s1 + $0xc0] sm:$0xff]  ;;  %v1233_v14 = vld [vmem:[#allocation2 + $0xca] sm:$0xff] }
  0xda   : > { %v670_v22 = vpop.permute.xlu1 %669  ;;  %746 = vst.msk [vmem:[#allocation3 + $0x90] sm:$0xff] %vm727_vm4, %v668_v21  ;;  %v777_v24 = vld [vmem:[#allocation3 + $0x88] sm:$0xff] }
  0xdb   : > { %747 = vst.msk [vmem:[#allocation3 + $0x98] sm:$0xff] %vm727_vm4, %v670_v22  ;;  %3522 = vmatmul.mubr.msk.f32.vlgmr.msra.gmra.mrb[0].mxu1 %vm801_vm5, %v777_v24  ;;  %1288 = vrot.lane.b32.xlu0 %v4244_v34, %s3890_s23  ;;  %v4413_v34 = vld [vmem:[#allocation2 + $0xb2] sm:$0xff] }
  0xdc   : > { %1290 = vrot.lane.b32.xlu1 %v4250_v37, %s3890_s23  ;;  %3696 = vmatpush3.bf16.msra.mxu1 %v4306_v59  ;;  %v3311_v22 = vld [vmem:[%s5305_s1 + $0xb0] sm:$0xff] }
  0xdd   : > { %v479_v27 = vpop.permute.xlu0 %478  ;;  %3698 = vmatprep.subr.bf16.mxu1 %v3697_v23 }
  0xde   : > { %v481_v28 = vpop.permute.xlu1 %480  ;;  %555 = vst.msk [vmem:[#allocation3 + $0xa0] sm:$0xff] %vm534_vm3, %v479_v27 }
  0xdf   : > { %556 = vst.msk [vmem:[#allocation3 + $0xa8] sm:$0xff] %vm534_vm3, %v481_v28  ;;  %1480 = vrot.lane.b32.xlu0 %v4259_v39, %s3891_s4  ;;  %v3308_v39 = vld [vmem:[%s5305_s1 + $0x98] sm:$0xff] }
  0xe0   : > { %466 = vrot.lane.b32.xlu1 %v4399_v30, %s3890_s23  ;;  %3700 = vmatpush3.bf16.msra.mxu1 %v3697_v23  ;;  %v3709_v45 = vpack.c.bf16 %v3308_v39, %v3307_v44  ;;  %v3312_v23 = vld [vmem:[%s5305_s1 + $0xb8] sm:$0xff] }
  0xe1   : > { %v672_v35 = vpop.permute.xlu0 %671  ;;  %v778_v36 = vld [vmem:[#allocation3 + $0x90] sm:$0xff]  ;;  %3702 = vmatprep.subr.bf16.mxu1 %v3701_v31 }
  0xe2   : > { %v439_v37 = vpop.permute.xlu1 %438  ;;  %v779_v40 = vld [vmem:[#allocation3 + $0x98] sm:$0xff]  ;;  %748 = vst.msk [vmem:[#allocation3 + $0xa0] sm:$0xff] %vm727_vm4, %v672_v35  ;;  %3524 = vmatprep.mubr.msk.f32.mxu1 %vm801_vm5, %v778_v36  ;;  %3710 = vmatprep.subr.bf16.mxu0 %v3709_v45 }
  0xe3   : > { %535 = vst.msk [vmem:[#allocation3] sm:$0xff] %vm534_vm3, %v439_v37  ;;  %3525 = vmatmul.mubr.msk.f32.gmra.mrb[2].mxu1 %vm801_vm5, %v779_v40  ;;  %1482 = vrot.lane.b32.xlu0 %v4268_v42, %s3891_s4  ;;  %v3274_v42 = vld [vmem:[%s5305_s1 + $0x88] sm:$0xff] }
  0xe4   : > { %468 = vrot.lane.b32.xlu1 %v4413_v34, %s3890_s23  ;;  %3704 = vmatpush3.bf16.msra.mxu1 %v3701_v31 }
  0xe5   : > { %v674_v48 = vpop.permute.xlu0 %673  ;;  %3706 = vmatprep.subr.bf16.mxu1 %v3705_v43 }
  0xe6   : > { %v441_v53 = vpop.permute.xlu1 %440  ;;  %749 = vst.msk [vmem:[#allocation3 + $0xa8] sm:$0xff] %vm727_vm4, %v674_v48 }
  0xe7   : > { %536 = vst.msk [vmem:[#allocation3 + $0x8] sm:$0xff] %vm534_vm3, %v441_v53  ;;  %659 = vrot.lane.b32.xlu0 %v4429_v47, %s3891_s4 }
  0xe8   : > { %661 = vrot.lane.b32.xlu1 %v4431_v56, %s3891_s4  ;;  %3708 = vmatpush3.bf16.msra.mxu1 %v3705_v43 }
  0xe9   : > { %v632_v57 = vpop.permute.xlu0 %631  ;;  %v780_v58 = vld [vmem:[#allocation3 + $0xa0] sm:$0xff]  ;;  %3561 = vmatprep.subr.mxu1 %v3274_v42 }
  0xea   : > { %v483_v59 = vpop.permute.xlu1 %482  ;;  %728 = vst.msk [vmem:[#allocation3] sm:$0xff] %vm727_vm4, %v632_v57  ;;  %3527 = vmatprep.mubr.msk.f32.mxu1 %vm801_vm5, %v780_v58  ;;  %v273_v58 = vld [vmem:[%s4025_s11 + $0xe0] sm:$0xff] }
  0xeb   : > { %557 = vst.msk [vmem:[#allocation3 + $0xb0] sm:$0xff] %vm534_vm3, %v483_v59  ;;  %1292 = vrot.lane.b32.xlu0 %v4274_v46, %s3890_s23 }
  0xec   : > { %1294 = vrot.lane.b32.xlu1 %v4280_v49, %s3890_s23  ;;  %3562 = vmatpush3.msra.mxu1 %v3274_v42  ;;  %306 = vst.msk [vmem:[#allocation2 + $0x182] sm:$0xff] %vm189_vm0, %v273_v58 }
  0xed   : > { %v634_v60 = vpop.permute.xlu0 %633  ;;  %v781_v62 = vld [vmem:[#allocation3 + $0xa8] sm:$0xff] }
  0xee   : > { %v485_v6 = vpop.permute.xlu1 %484  ;;  %729 = vst.msk [vmem:[#allocation3 + $0x8] sm:$0xff] %vm727_vm4, %v634_v60  ;;  %3528 = vmatmul.mubr.msk.f32.gmra.mrb[4].mxu1 %vm801_vm5, %v781_v62  ;;  %v274_v62 = vld [vmem:[%s4025_s11 + $0xe8] sm:$0xff] }
  0xef   : > { %558 = vst.msk [vmem:[#allocation3 + $0xb8] sm:$0xff] %vm534_vm3, %v485_v6  ;;  %1484 = vrot.lane.b32.xlu0 %v4289_v52, %s3891_s4 }
  0xf0   : > { %1486 = vrot.lane.b32.xlu1 %v4298_v55, %s3891_s4  ;;  %307 = vst.msk [vmem:[#allocation2 + $0x18a] sm:$0xff] %vm189_vm0, %v274_v62  ;;  %v1238_v62 = vld [vmem:[#allocation2 + $0x10a] sm:$0xff] }
  0xf1   : > { %v676_v7 = vpop.permute.xlu0 %675  ;;  %v760_v10 = vld [vmem:[#allocation3] sm:$0xff] }
  0xf2   : > { %v443_v9 = vpop.permute.xlu1 %442  ;;  %750 = vst.msk [vmem:[#allocation3 + $0xb0] sm:$0xff] %vm727_vm4, %v676_v7  ;;  %3497 = vmatprep.mubr.msk.f32.mxu0 %vm801_vm5, %v760_v10  ;;  %v1232_v10 = vld [vmem:[#allocation2 + $0xc2] sm:$0xff] }
  0xf3   : > { %537 = vst.msk [vmem:[#allocation3 + $0x10] sm:$0xff] %vm534_vm3, %v443_v9  ;;  %2192 = vrot.lane.b32.xlu0 %v4274_v46, %s3890_s23 }
  0xf4   : > { %1188 = vst.msk [vmem:[#allocation3] sm:$0xff] %vm189_vm0, %v4187_v4  ;;  %2194 = vrot.lane.b32.xlu1 %v4280_v49, %s3890_s23  ;;  %v3717_v4 = vpack.c.bf16 %v3312_v23, %v3311_v22  ;;  %v275_v22 = vld [vmem:[%s4025_s11 + $0xf0] sm:$0xff] }
  0xf5   : > { %v678_v19 = vpop.permute.xlu0 %677  ;;  %v761_v21 = vld [vmem:[#allocation3 + $0x8] sm:$0xff]  ;;  %308 = vst.msk [vmem:[#allocation2 + $0x19a] sm:$0xff] %vm189_vm0, %v275_v22 }
  0xf6   : > { %v445_v20 = vpop.permute.xlu1 %444  ;;  %751 = vst.msk [vmem:[#allocation3 + $0xb8] sm:$0xff] %vm727_vm4, %v678_v19  ;;  %3498 = vmatmul.mubr.msk.f32.vlgmr.msra.gmra.mrb[0].mxu0 %vm801_vm5, %v761_v21  ;;  %v1425_v21 = vld [vmem:[#allocation2 + $0xcc] sm:$0xff] }
  0xf7   : > { %538 = vst.msk [vmem:[#allocation3 + $0x18] sm:$0xff] %vm534_vm3, %v445_v20  ;;  %2384 = vrot.lane.b32.xlu0 %v4289_v52, %s3891_s4  ;;  %3712 = vmatpush3.bf16.msra.mxu0 %v3709_v45 }
  0xf8   : > { %1189 = vst.msk [vmem:[#allocation3 + $0x8] sm:$0xff] %vm189_vm0, %v4205_v17  ;;  %1296 = vrot.lane.b32.xlu1 %v4311_v61, %s3890_s23  ;;  %3714 = vmatprep.subr.bf16.mxu0 %v3713_v18  ;;  %v3314_v17 = vld [vmem:[%s5305_s1 + $0xc8] sm:$0xff] }
  0xf9   : > { %v636_v46 = vpop.permute.xlu0 %635  ;;  %v782_v49 = vld [vmem:[#allocation3 + $0xb0] sm:$0xff]  ;;  %v3721_v52 = vpack.c.bf16 %v3314_v17, %v3313_v25  ;;  %v1234_v17 = vld [vmem:[#allocation2 + $0xda] sm:$0xff] }
  0xfa   : > { %v487_v24 = vpop.permute.xlu1 %486  ;;  %730 = vst.msk [vmem:[#allocation3 + $0x10] sm:$0xff] %vm727_vm4, %v636_v46  ;;  %3530 = vmatprep.mubr.msk.f32.mxu1 %vm801_vm5, %v782_v49  ;;  %v276_v46 = vld [vmem:[%s4025_s11 + $0xf8] sm:$0xff] }
  0xfb   : > { %559 = vst.msk [vmem:[#allocation3 + $0xc0] sm:$0xff] %vm534_vm3, %v487_v24  ;;  %2386 = vrot.lane.b32.xlu0 %v4298_v55, %s3891_s4  ;;  %3716 = vmatpush3.bf16.msra.mxu0 %v3713_v18  ;;  %v1424_v18 = vld [vmem:[#allocation2 + $0xc4] sm:$0xff] }
  0xfc   : > { %1298 = vrot.lane.b32.xlu1 %v4317_v63, %s3890_s23  ;;  %3718 = vmatprep.subr.bf16.mxu0 %v3717_v4  ;;  %309 = vst.msk [vmem:[#allocation2 + $0x1a2] sm:$0xff] %vm189_vm0, %v276_v46  ;;  %v1240_v46 = vld [vmem:[#allocation2 + $0x122] sm:$0xff] }
  0xfd   : > { %v638_v51 = vpop.permute.xlu0 %637  ;;  %v783_v27 = vld [vmem:[#allocation3 + $0xb8] sm:$0xff] }
  0xfe   : > { %v489_v28 = vpop.permute.xlu1 %488  ;;  %731 = vst.msk [vmem:[#allocation3 + $0x18] sm:$0xff] %vm727_vm4, %v638_v51  ;;  %3531 = vmatmul.mubr.msk.f32.gmra.mrb[6].mxu1 %vm801_vm5, %v783_v27 }
  0xff   : > { %560 = vst.msk [vmem:[#allocation3 + $0xc8] sm:$0xff] %vm534_vm3, %v489_v28  ;;  %1488 = vrot.lane.b32.xlu0 %v4326_v1, %s3891_s4  ;;  %3720 = vmatpush3.bf16.msra.mxu0 %v3717_v4  ;;  %v1235_v28 = vld [vmem:[#allocation2 + $0xe2] sm:$0xff] }
 0x100   : > { %1490 = vrot.lane.b32.xlu1 %v4328_v2, %s3891_s4  ;;  %3722 = vmatprep.subr.bf16.mxu0 %v3721_v52 }
 0x101   : > { %v680_v55 = vpop.permute.xlu0 %679  ;;  %v762_v32 = vld [vmem:[#allocation3 + $0x10] sm:$0xff] }
 0x102   : > { %v447_v31 = vpop.permute.xlu1 %446  ;;  %752 = vst.msk [vmem:[#allocation3 + $0xc0] sm:$0xff] %vm727_vm4, %v680_v55  ;;  %3500 = vmatprep.mubr.msk.f32.mxu0 %vm801_vm5, %v762_v32  ;;  %v1426_v55 = vld [vmem:[#allocation2 + $0xdc] sm:$0xff] }
 0x103   : > { %539 = vst.msk [vmem:[#allocation3 + $0x20] sm:$0xff] %vm534_vm3, %v447_v31  ;;  %2196 = vrot.lane.b32.xlu0 %v4311_v61, %s3890_s23  ;;  %3724 = vmatpush3.bf16.msra.mxu0 %v3721_v52 }
 0x104   : > { %1190 = vst.msk [vmem:[#allocation3 + $0x10] sm:$0xff] %vm189_vm0, %v4222_v26  ;;  %2198 = vrot.lane.b32.xlu1 %v4317_v63, %s3890_s23  ;;  %3627 = vmatprep.subr.mxu0 %v3315_v33 }
 0x105   : > { %v682_v35 = vpop.permute.xlu0 %681  ;;  %v763_v37 = vld [vmem:[#allocation3 + $0x18] sm:$0xff] }
 0x106   : > { %v449_v36 = vpop.permute.xlu1 %448  ;;  %753 = vst.msk [vmem:[#allocation3 + $0xc8] sm:$0xff] %vm727_vm4, %v682_v35  ;;  %3501 = vmatmul.mubr.msk.f32.gmra.mrb[2].mxu0 %vm801_vm5, %v763_v37  ;;  %v1427_v35 = vld [vmem:[#allocation2 + $0xe4] sm:$0xff] }
 0x107   : > { %540 = vst.msk [vmem:[#allocation3 + $0x28] sm:$0xff] %vm534_vm3, %v449_v36  ;;  %2388 = vrot.lane.b32.xlu0 %v4326_v1, %s3891_s4  ;;  %3628 = vmatpush3.msra.mxu0 %v3315_v33  ;;  %v4628_v36 = vld [vmem:[#allocation2 + $0xf8] sm:$0xff] }
 0x108   : > { %1191 = vst.msk [vmem:[#allocation3 + $0x18] sm:$0xff] %vm189_vm0, %v4231_v29  ;;  %1300 = vrot.lane.b32.xlu1 %v4342_v5, %s3890_s23  ;;  %1205 = vst.msk [vmem:[#allocation3 + $0x88] sm:$0xff] %vm189_vm0, %v4628_v36 }
 0x109   : > { %v640_v26 = vpop.permute.xlu0 %639  ;;  %v784_v61 = vld [vmem:[#allocation3 + $0xc0] sm:$0xff] }
 0x10a   : > { %v491_v63 = vpop.permute.xlu1 %490  ;;  %732 = vst.msk [vmem:[#allocation3 + $0x20] sm:$0xff] %vm727_vm4, %v640_v26  ;;  %3533 = vmatprep.mubr.msk.f32.mxu1 %vm801_vm5, %v784_v61 }
 0x10b   : > { %561 = vst.msk [vmem:[#allocation3 + $0xd0] sm:$0xff] %vm534_vm3, %v491_v63  ;;  %2390 = vrot.lane.b32.xlu0 %v4328_v2, %s3891_s4 }
 0x10c   : > { %1302 = vrot.lane.b32.xlu1 %v4350_v8, %s3890_s23 }
 0x10d   : > { %v642_v29 = vpop.permute.xlu0 %641  ;;  %v785_v1 = vld [vmem:[#allocation3 + $0xc8] sm:$0xff] }
 0x10e   : > { %v493_v40 = vpop.permute.xlu1 %492  ;;  %733 = vst.msk [vmem:[#allocation3 + $0x28] sm:$0xff] %vm727_vm4, %v642_v29  ;;  %3534 = vmatmul.mubr.msk.f32.gmra.mrb[8].mxu1 %vm801_vm5, %v785_v1 }
 0x10f   : > { %562 = vst.msk [vmem:[#allocation3 + $0xd8] sm:$0xff] %vm534_vm3, %v493_v40  ;;  %1492 = vrot.lane.b32.xlu0 %v4362_v12, %s3891_s4  ;;  %v1236_v40 = vld [vmem:[#allocation2 + $0xf2] sm:$0xff] }
 0x110   : > { %1494 = vrot.lane.b32.xlu1 %v4364_v15, %s3891_s4 }
 0x111   : > { %v684_v43 = vpop.permute.xlu0 %683  ;;  %v764_v44 = vld [vmem:[#allocation3 + $0x20] sm:$0xff] }
 0x112   : > { %v451_v2 = vpop.permute.xlu1 %450  ;;  %754 = vst.msk [vmem:[#allocation3 + $0xd0] sm:$0xff] %vm727_vm4, %v684_v43  ;;  %3503 = vmatprep.mubr.msk.f32.mxu0 %vm801_vm5, %v764_v44  ;;  %v1237_v44 = vld [vmem:[#allocation2 + $0xfa] sm:$0xff] }
 0x113   : > { %541 = vst.msk [vmem:[#allocation3 + $0x30] sm:$0xff] %vm534_vm3, %v451_v2  ;;  %2200 = vrot.lane.b32.xlu0 %v4342_v5, %s3890_s23 }
 0x114   : > { %1192 = vst.msk [vmem:[#allocation3 + $0x20] sm:$0xff] %vm189_vm0, %v4252_v38  ;;  %2202 = vrot.lane.b32.xlu1 %v4350_v8, %s3890_s23 }
 0x115   : > { %v686_v39 = vpop.permute.xlu0 %685  ;;  %v765_v48 = vld [vmem:[#allocation3 + $0x28] sm:$0xff] }
 0x116   : > { %v453_v45 = vpop.permute.xlu1 %452  ;;  %755 = vst.msk [vmem:[#allocation3 + $0xd8] sm:$0xff] %vm727_vm4, %v686_v39  ;;  %3504 = vmatmul.mubr.msk.f32.gmra.mrb[4].mxu0 %vm801_vm5, %v765_v48  ;;  %v4651_v39 = vld [vmem:[#allocation2 + $0x108] sm:$0xff]  ;;  %v1428_v48 = vld [vmem:[#allocation2 + $0xf4] sm:$0xff] }
 0x117   : > { %542 = vst.msk [vmem:[#allocation3 + $0x38] sm:$0xff] %vm534_vm3, %v453_v45  ;;  %2392 = vrot.lane.b32.xlu0 %v4362_v12, %s3891_s4 }
 0x118   : > { %1193 = vst.msk [vmem:[#allocation3 + $0x28] sm:$0xff] %vm189_vm0, %v4261_v41  ;;  %1304 = vrot.lane.b32.xlu1 %v4399_v30, %s3890_s23  ;;  %1206 = vst.msk [vmem:[#allocation3 + $0x90] sm:$0xff] %vm189_vm0, %v4651_v39 }
 0x119   : > { %v644_v5 = vpop.permute.xlu0 %643  ;;  %v786_v8 = vld [vmem:[#allocation3 + $0xd0] sm:$0xff] }
 0x11a   : > { %v495_v53 = vpop.permute.xlu1 %494  ;;  %734 = vst.msk [vmem:[#allocation3 + $0x30] sm:$0xff] %vm727_vm4, %v644_v5  ;;  %3536 = vmatprep.mubr.msk.f32.mxu1 %vm801_vm5, %v786_v8 }
 0x11b   : > { %563 = vst.msk [vmem:[#allocation3 + $0xe0] sm:$0xff] %vm534_vm3, %v495_v53  ;;  %2394 = vrot.lane.b32.xlu0 %v4364_v15, %s3891_s4  ;;  %v1429_v53 = vld [vmem:[#allocation2 + $0xfc] sm:$0xff] }
 0x11c   : > { %1306 = vrot.lane.b32.xlu1 %v4413_v34, %s3890_s23 }
 0x11d   : > { %v646_v12 = vpop.permute.xlu0 %645  ;;  %v787_v42 = vld [vmem:[#allocation3 + $0xd8] sm:$0xff] }
 0x11e   : > { %v497_v57 = vpop.permute.xlu1 %496  ;;  %735 = vst.msk [vmem:[#allocation3 + $0x38] sm:$0xff] %vm727_vm4, %v646_v12  ;;  %3537 = vmatmul.mubr.msk.f32.gmra.mrb[10].mxu1 %vm801_vm5, %v787_v42  ;;  %v4662_v12 = vld [vmem:[#allocation2 + $0x110] sm:$0xff] }
 0x11f   : > { %564 = vst.msk [vmem:[#allocation3 + $0xe8] sm:$0xff] %vm534_vm3, %v497_v57  ;;  %1496 = vrot.lane.b32.xlu0 %v4429_v47, %s3891_s4  ;;  %v4675_v57 = vld [vmem:[#allocation2 + $0xc8] sm:$0xff] }
 0x120   : > { %1498 = vrot.lane.b32.xlu1 %v4431_v56, %s3891_s4  ;;  %1207 = vst.msk [vmem:[#allocation3 + $0x98] sm:$0xff] %vm189_vm0, %v4662_v12 }
 0x121   : > { %v688_v15 = vpop.permute.xlu0 %687  ;;  %v766_v60 = vld [vmem:[#allocation3 + $0x30] sm:$0xff] }
 0x122   : > { %v455_v59 = vpop.permute.xlu1 %454  ;;  %756 = vst.msk [vmem:[#allocation3 + $0xe0] sm:$0xff] %vm727_vm4, %v688_v15  ;;  %3506 = vmatprep.mubr.msk.f32.mxu0 %vm801_vm5, %v766_v60 }
 0x123   : > { %543 = vst.msk [vmem:[#allocation3 + $0x40] sm:$0xff] %vm534_vm3, %v455_v59  ;;  %2204 = vrot.lane.b32.xlu0 %v4399_v30, %s3890_s23 }
 0x124   : > { %1194 = vst.msk [vmem:[#allocation3 + $0x30] sm:$0xff] %vm189_vm0, %v4282_v50  ;;  %2206 = vrot.lane.b32.xlu1 %v4413_v34, %s3890_s23 }
 0x125   : > { %v690_v6 = vpop.permute.xlu0 %689  ;;  %v767_v9 = vld [vmem:[#allocation3 + $0x38] sm:$0xff] }
 0x126   : > { %v457_v7 = vpop.permute.xlu1 %456  ;;  %757 = vst.msk [vmem:[#allocation3 + $0xe8] sm:$0xff] %vm727_vm4, %v690_v6  ;;  %3507 = vmatmul.mubr.msk.f32.gmra.mrb[6].mxu0 %vm801_vm5, %v767_v9 }
 0x127   : > { %544 = vst.msk [vmem:[#allocation3 + $0x48] sm:$0xff] %vm534_vm3, %v457_v7  ;;  %2396 = vrot.lane.b32.xlu0 %v4429_v47, %s3891_s4 }
 0x128   : > { %1195 = vst.msk [vmem:[#allocation3 + $0x38] sm:$0xff] %vm189_vm0, %v4291_v54  ;;  %1308 = vrot.lane.b32.xlu1 %v1232_v10, %s3890_s23 }
 0x129   : > { %v648_v30 = vpop.permute.xlu0 %647  ;;  %v788_v34 = vld [vmem:[#allocation3 + $0xe0] sm:$0xff] }
 0x12a   : > { %v499_v13 = vpop.permute.xlu1 %498  ;;  %736 = vst.msk [vmem:[#allocation3 + $0x40] sm:$0xff] %vm727_vm4, %v648_v30  ;;  %3539 = vmatprep.mubr.msk.f32.mxu1 %vm801_vm5, %v788_v34  ;;  %v4691_v30 = vld [vmem:[#allocation2 + $0x120] sm:$0xff] }
 0x12b   : > { %565 = vst.msk [vmem:[#allocation3 + $0xf0] sm:$0xff] %vm534_vm3, %v499_v13  ;;  %2398 = vrot.lane.b32.xlu0 %v4431_v56, %s3891_s4  ;;  %v1430_v13 = vld [vmem:[#allocation2 + $0x10c] sm:$0xff] }
 0x12c   : > { %1310 = vrot.lane.b32.xlu1 %v1233_v14, %s3890_s23  ;;  %1208 = vst.msk [vmem:[#allocation3 + $0xa0] sm:$0xff] %vm189_vm0, %v4691_v30 }
 0x12d   : > { %v650_v47 = vpop.permute.xlu0 %649  ;;  %v789_v19 = vld [vmem:[#allocation3 + $0xe8] sm:$0xff] }
 0x12e   : > { %v501_v20 = vpop.permute.xlu1 %500  ;;  %737 = vst.msk [vmem:[#allocation3 + $0x48] sm:$0xff] %vm727_vm4, %v650_v47  ;;  %3540 = vmatmul.mubr.msk.f32.gmra.mrb[12].mxu1 %vm801_vm5, %v789_v19  ;;  %v1431_v47 = vld [vmem:[#allocation2 + $0x114] sm:$0xff]  ;;  %v4702_v19 = vld [vmem:[#allocation2 + $0x128] sm:$0xff] }
 0x12f   : > { %566 = vst.msk [vmem:[#allocation3 + $0xf8] sm:$0xff] %vm534_vm3, %v501_v20  ;;  %1500 = vrot.lane.b32.xlu0 %v1424_v18, %s3891_s4 }
 0x130   : > { %1502 = vrot.lane.b32.xlu1 %v1425_v21, %s3891_s4  ;;  %1209 = vst.msk [vmem:[#allocation3 + $0xa8] sm:$0xff] %vm189_vm0, %v4702_v19 }
 0x131   : > { %v692_v56 = vpop.permute.xlu0 %691  ;;  %v768_v4 = vld [vmem:[#allocation3 + $0x40] sm:$0xff] }
 0x132   : > { %v459_v23 = vpop.permute.xlu1 %458  ;;  %758 = vst.msk [vmem:[#allocation3 + $0xf0] sm:$0xff] %vm727_vm4, %v692_v56  ;;  %3509 = vmatprep.mubr.msk.f32.mxu0 %vm801_vm5, %v768_v4 }
 0x133   : > { %545 = vst.msk [vmem:[#allocation3 + $0x50] sm:$0xff] %vm534_vm3, %v459_v23  ;;  %2208 = vrot.lane.b32.xlu0 %v1232_v10, %s3890_s23  ;;  %v1239_v10 = vld [vmem:[#allocation2 + $0x112] sm:$0xff] }
 0x134   : > { %1196 = vst.msk [vmem:[#allocation3 + $0x40] sm:$0xff] %vm189_vm0, %v4319_v0  ;;  %2210 = vrot.lane.b32.xlu1 %v1233_v14, %s3890_s23 }
 0x135   : > { %v694_v49 = vpop.permute.xlu0 %693  ;;  %v769_v25 = vld [vmem:[#allocation3 + $0x48] sm:$0xff] }
 0x136   : > { %v461_v24 = vpop.permute.xlu1 %460  ;;  %759 = vst.msk [vmem:[#allocation3 + $0xf8] sm:$0xff] %vm727_vm4, %v694_v49  ;;  %3510 = vmatmul.mubr.msk.f32.gmra.mrb[8].mxu0 %vm801_vm5, %v769_v25 }
 0x137   : > { %546 = vst.msk [vmem:[#allocation3 + $0x58] sm:$0xff] %vm534_vm3, %v461_v24  ;;  %2400 = vrot.lane.b32.xlu0 %v1424_v18, %s3891_s4 }
 0x138   : > { %1197 = vst.msk [vmem:[#allocation3 + $0x48] sm:$0xff] %vm189_vm0, %v4330_v3  ;;  %1312 = vrot.lane.b32.xlu1 %v1234_v17, %s3890_s23 }
 0x139   : > { %v652_v52 = vpop.permute.xlu0 %651  ;;  %v790_v51 = vld [vmem:[#allocation3 + $0xf0] sm:$0xff] }
 0x13a   : > { %v654_v27 = vpop.permute.xlu1 %653  ;;  %738 = vst.msk [vmem:[#allocation3 + $0x50] sm:$0xff] %vm727_vm4, %v652_v52  ;;  %3542 = vmatprep.mubr.msk.f32.mxu1 %vm801_vm5, %v790_v51  ;;  %v4731_v52 = vld [vmem:[#allocation2 + $0x138] sm:$0xff] }
 0x13b   : > { %739 = vst.msk [vmem:[#allocation3 + $0x58] sm:$0xff] %vm727_vm4, %v654_v27  ;;  %2402 = vrot.lane.b32.xlu0 %v1425_v21, %s3891_s4  ;;  %v4715_v21 = vld [vmem:[#allocation2 + $0xe0] sm:$0xff] }
 0x13c   : > { %1314 = vrot.lane.b32.xlu1 %v1235_v28, %s3890_s23  ;;  %1210 = vst.msk [vmem:[#allocation3 + $0xb0] sm:$0xff] %vm189_vm0, %v4731_v52 }
 0x13d   : > { %v1285_v31 = vpop.permute.xlu0 %1284  ;;  %v791_v32 = vld [vmem:[#allocation3 + $0xf8] sm:$0xff] }
 0x13e   : > { %v1287_v33 = vpop.permute.xlu1 %1286  ;;  %1380 = vst.msk [vmem:[#allocation3] sm:$0xff] %vm534_vm3, %v1285_v31  ;;  %3543 = vmatmul.mubr.msk.f32.gmra.mrb[14].mxu1 %vm801_vm5, %v791_v32  ;;  %v1433_v31 = vld [vmem:[#allocation2 + $0x12c] sm:$0xff]  ;;  %v4745_v32 = vld [vmem:[#allocation2 + $0x140] sm:$0xff] }
 0x13f   : > { %1381 = vst.msk [vmem:[#allocation3 + $0x8] sm:$0xff] %vm534_vm3, %v1287_v33  ;;  %1504 = vrot.lane.b32.xlu0 %v1426_v55, %s3891_s4 }
 0x140   : > { %1506 = vrot.lane.b32.xlu1 %v1427_v35, %s3891_s4  ;;  %1211 = vst.msk [vmem:[#allocation3 + $0xb8] sm:$0xff] %vm189_vm0, %v4745_v32 }
 0x141   : > { %v1477_v37 = vpop.permute.xlu0 %1476  ;;  %v770_v61 = vld [vmem:[#allocation3 + $0x50] sm:$0xff] }
 0x142   : > { %v463_v26 = vpop.permute.xlu1 %462  ;;  %v771_v63 = vld [vmem:[#allocation3 + $0x58] sm:$0xff]  ;;  %1572 = vst.msk [vmem:[#allocation3] sm:$0xff] %vm727_vm4, %v1477_v37  ;;  %3512 = vmatprep.mubr.msk.f32.mxu0 %vm801_vm5, %v770_v61 }
 0x143   : > { %547 = vst.msk [vmem:[#allocation3 + $0x60] sm:$0xff] %vm534_vm3, %v463_v26  ;;  %2212 = vrot.lane.b32.xlu0 %v1234_v17, %s3890_s23  ;;  %3513 = vmatmul.mubr.msk.f32.gmra.mrb[10].mxu0 %vm801_vm5, %v771_v63  ;;  %v1241_v17 = vld [vmem:[#allocation2 + $0x12a] sm:$0xff]  ;;  %v1242_v61 = vld [vmem:[#allocation2 + $0x13a] sm:$0xff] }
 0x144   : > { %1198 = vst.msk [vmem:[#allocation3 + $0x50] sm:$0xff] %vm189_vm0, %v4352_v11  ;;  %1199 = vst.msk [vmem:[#allocation3 + $0x58] sm:$0xff] %vm189_vm0, %v4366_v16  ;;  %2214 = vrot.lane.b32.xlu1 %v1235_v28, %s3890_s23  ;;  %v1432_v28 = vld [vmem:[#allocation2 + $0x124] sm:$0xff] }
 0x145   : > { %v1479_v29 = vpop.permute.xlu0 %1478 }
 0x146   : > { %v465_v1 = vpop.permute.xlu1 %464  ;;  %1573 = vst.msk [vmem:[#allocation3 + $0x8] sm:$0xff] %vm727_vm4, %v1479_v29 }
 0x147   : > { %548 = vst.msk [vmem:[#allocation3 + $0x68] sm:$0xff] %vm534_vm3, %v465_v1  ;;  %2404 = vrot.lane.b32.xlu0 %v1426_v55, %s3891_s4 }
 0x148   : > { %1316 = vrot.lane.b32.xlu1 %v1236_v40, %s3890_s23 }
 0x149   : > { %v656_v43 = vpop.permute.xlu0 %655  ;;  %v1604_v2 = vld [vmem:[#allocation3] sm:$0xff] }
 0x14a   : > { %740 = vst.msk [vmem:[#allocation3 + $0x60] sm:$0xff] %vm727_vm4, %v656_v43  ;;  %v658_v45 = vpop.permute.xlu1 %657  ;;  %3563 = vmatprep.mubr.msk.f32.mxu1 %vm801_vm5, %v1604_v2  ;;  %v4763_v43 = vld [vmem:[#allocation2 + $0x150] sm:$0xff] }
 0x14b   : > { %2096 = vst.msk [vmem:[#allocation3] sm:$0xff] %vm189_vm0, %v4252_v38  ;;  %2406 = vrot.lane.b32.xlu0 %v1427_v35, %s3891_s4  ;;  %v4672_v38 = vld [vmem:[#allocation2 + $0xc0] sm:$0xff]  ;;  %1212 = vst.msk [vmem:[#allocation3 + $0xc0] sm:$0xff] %vm189_vm0, %v4763_v43 }
 0x14c   : > { %741 = vst.msk [vmem:[#allocation3 + $0x68] sm:$0xff] %vm727_vm4, %v658_v45  ;;  %1318 = vrot.lane.b32.xlu1 %v1237_v44, %s3890_s23  ;;  %v1434_v45 = vld [vmem:[#allocation2 + $0x13c] sm:$0xff] }
 0x14d   : > { %v1289_v5 = vpop.permute.xlu0 %1288  ;;  %v1605_v8 = vld [vmem:[#allocation3 + $0x8] sm:$0xff] }
 0x14e   : > { %1382 = vst.msk [vmem:[#allocation3 + $0x10] sm:$0xff] %vm534_vm3, %v1289_v5  ;;  %v1291_v42 = vpop.permute.xlu1 %1290  ;;  %3564 = vmatmul.mubr.msk.f32.vlgmr.msra.gmra.mrb[16].mxu1 %vm801_vm5, %v1605_v8  ;;  %v1435_v5 = vld [vmem:[#allocation2 + $0x144] sm:$0xff]  ;;  %v4777_v8 = vld [vmem:[#allocation2 + $0x158] sm:$0xff] }
 0x14f   : > { %2097 = vst.msk [vmem:[#allocation3 + $0x8] sm:$0xff] %vm189_vm0, %v4261_v41  ;;  %1508 = vrot.lane.b32.xlu0 %v1428_v48, %s3891_s4  ;;  %1213 = vst.msk [vmem:[#allocation3 + $0xc8] sm:$0xff] %vm189_vm0, %v4777_v8 }
 0x150   : > { %1383 = vst.msk [vmem:[#allocation3 + $0x18] sm:$0xff] %vm534_vm3, %v1291_v42  ;;  %1510 = vrot.lane.b32.xlu1 %v1429_v53, %s3891_s4 }
 0x151   : > { %v1481_v58 = vpop.permute.xlu0 %1480  ;;  %v772_v15 = vld [vmem:[#allocation3 + $0x60] sm:$0xff] }
 0x152   : > { %1574 = vst.msk [vmem:[#allocation3 + $0x10] sm:$0xff] %vm727_vm4, %v1481_v58  ;;  %v467_v59 = vpop.permute.xlu1 %466  ;;  %3515 = vmatprep.mubr.msk.f32.mxu0 %vm801_vm5, %v772_v15 }
 0x153   : > { %v773_v41 = vld [vmem:[#allocation3 + $0x68] sm:$0xff]  ;;  %1200 = vst.msk [vmem:[#allocation3 + $0x60] sm:$0xff] %vm189_vm0, %v4672_v38  ;;  %2216 = vrot.lane.b32.xlu0 %v1236_v40, %s3890_s23 }
 0x154   : > { %549 = vst.msk [vmem:[#allocation3 + $0x70] sm:$0xff] %vm534_vm3, %v467_v59  ;;  %3516 = vmatmul.mubr.msk.f32.gmra.mrb[12].mxu0 %vm801_vm5, %v773_v41  ;;  %2218 = vrot.lane.b32.xlu1 %v1237_v44, %s3890_s23  ;;  %v1243_v40 = vld [vmem:[#allocation2 + $0x142] sm:$0xff]  ;;  %v1244_v59 = vld [vmem:[#allocation2 + $0x152] sm:$0xff] }
 0x155   : > { %1201 = vst.msk [vmem:[#allocation3 + $0x68] sm:$0xff] %vm189_vm0, %v4675_v57  ;;  %v1483_v60 = vpop.permute.xlu0 %1482 }
 0x156   : > { %1575 = vst.msk [vmem:[#allocation3 + $0x18] sm:$0xff] %vm727_vm4, %v1483_v60  ;;  %v469_v6 = vpop.permute.xlu1 %468 }
 0x157   : > { %550 = vst.msk [vmem:[#allocation3 + $0x78] sm:$0xff] %vm534_vm3, %v469_v6  ;;  %2408 = vrot.lane.b32.xlu0 %v1428_v48, %s3891_s4  ;;  %v1245_v6 = vld [vmem:[#allocation2 + $0x15a] sm:$0xff] }
 0x158   : > { %1320 = vrot.lane.b32.xlu1 %v1238_v62, %s3890_s23 }
 0x159   : > { %v660_v7 = vpop.permute.xlu0 %659  ;;  %v1606_v9 = vld [vmem:[#allocation3 + $0x10] sm:$0xff] }
 0x15a   : > { %742 = vst.msk [vmem:[#allocation3 + $0x70] sm:$0xff] %vm727_vm4, %v660_v7  ;;  %v662_v34 = vpop.permute.xlu1 %661  ;;  %3566 = vmatprep.mubr.msk.f32.mxu1 %vm801_vm5, %v1606_v9  ;;  %v4795_v7 = vld [vmem:[#allocation2 + $0x168] sm:$0xff] }
 0x15b   : > { %2098 = vst.msk [vmem:[#allocation3 + $0x10] sm:$0xff] %vm189_vm0, %v4282_v50  ;;  %2410 = vrot.lane.b32.xlu0 %v1429_v53, %s3891_s4  ;;  %v4712_v50 = vld [vmem:[#allocation2 + $0xd8] sm:$0xff]  ;;  %1214 = vst.msk [vmem:[#allocation3 + $0xd0] sm:$0xff] %vm189_vm0, %v4795_v7 }
 0x15c   : > { %743 = vst.msk [vmem:[#allocation3 + $0x78] sm:$0xff] %vm727_vm4, %v662_v34  ;;  %1322 = vrot.lane.b32.xlu1 %v1239_v10, %s3890_s23  ;;  %v1436_v34 = vld [vmem:[#allocation2 + $0x154] sm:$0xff] }
 0x15d   : > { %v1293_v14 = vpop.permute.xlu0 %1292  ;;  %v1607_v18 = vld [vmem:[#allocation3 + $0x18] sm:$0xff] }
 0x15e   : > { %1384 = vst.msk [vmem:[#allocation3 + $0x20] sm:$0xff] %vm534_vm3, %v1293_v14  ;;  %v1295_v20 = vpop.permute.xlu1 %1294  ;;  %3567 = vmatmul.mubr.msk.f32.gmra.mrb[18].mxu1 %vm801_vm5, %v1607_v18  ;;  %v1437_v14 = vld [vmem:[#allocation2 + $0x15c] sm:$0xff]  ;;  %v4809_v18 = vld [vmem:[#allocation2 + $0x170] sm:$0xff] }
 0x15f   : > { %2099 = vst.msk [vmem:[#allocation3 + $0x18] sm:$0xff] %vm189_vm0, %v4291_v54  ;;  %1512 = vrot.lane.b32.xlu0 %v1430_v13, %s3891_s4  ;;  %1215 = vst.msk [vmem:[#allocation3 + $0xd8] sm:$0xff] %vm189_vm0, %v4809_v18 }
 0x160   : > { %1385 = vst.msk [vmem:[#allocation3 + $0x28] sm:$0xff] %vm534_vm3, %v1295_v20  ;;  %1514 = vrot.lane.b32.xlu1 %v1431_v47, %s3891_s4 }
 0x161   : > { %v1485_v22 = vpop.permute.xlu0 %1484  ;;  %v774_v56 = vld [vmem:[#allocation3 + $0x70] sm:$0xff] }
 0x162   : > { %1576 = vst.msk [vmem:[#allocation3 + $0x20] sm:$0xff] %vm727_vm4, %v1485_v22  ;;  %v1487_v23 = vpop.permute.xlu1 %1486  ;;  %3518 = vmatprep.mubr.msk.f32.mxu0 %vm801_vm5, %v774_v56 }
 0x163   : > { %v775_v54 = vld [vmem:[#allocation3 + $0x78] sm:$0xff]  ;;  %1202 = vst.msk [vmem:[#allocation3 + $0x70] sm:$0xff] %vm189_vm0, %v4712_v50  ;;  %2220 = vrot.lane.b32.xlu0 %v1238_v62, %s3890_s23 }
 0x164   : > { %1577 = vst.msk [vmem:[#allocation3 + $0x28] sm:$0xff] %vm727_vm4, %v1487_v23  ;;  %3519 = vmatmul.mubr.msk.f32.gmra.mrb[14].mxu0 %vm801_vm5, %v775_v54  ;;  %2222 = vrot.lane.b32.xlu1 %v1239_v10, %s3890_s23  ;;  %v1246_v23 = vld [vmem:[#allocation2 + $0x16a] sm:$0xff] }
 0x165   : > { %1203 = vst.msk [vmem:[#allocation3 + $0x78] sm:$0xff] %vm189_vm0, %v4715_v21  ;;  %v2193_v4 = vpop.permute.xlu0 %2192 }
 0x166   : > { %2288 = vst.msk [vmem:[#allocation3] sm:$0xff] %vm534_vm3, %v2193_v4  ;;  %v2195_v49 = vpop.permute.xlu1 %2194 }
 0x167   : > { %2289 = vst.msk [vmem:[#allocation3 + $0x8] sm:$0xff] %vm534_vm3, %v2195_v49  ;;  %2412 = vrot.lane.b32.xlu0 %v1430_v13, %s3891_s4  ;;  %v1247_v49 = vld [vmem:[#allocation2 + $0x172] sm:$0xff] }
 0x168   : > { %1324 = vrot.lane.b32.xlu1 %v1240_v46, %s3890_s23 }
 0x169   : > { %v2385_v24 = vpop.permute.xlu0 %2384  ;;  %v1608_v25 = vld [vmem:[#allocation3 + $0x20] sm:$0xff] }
 0x16a   : > { %2480 = vst.msk [vmem:[#allocation3] sm:$0xff] %vm727_vm4, %v2385_v24  ;;  %v1297_v51 = vpop.permute.xlu1 %1296  ;;  %3569 = vmatprep.mubr.msk.f32.mxu1 %vm801_vm5, %v1608_v25  ;;  %v4827_v24 = vld [vmem:[#allocation2 + $0x180] sm:$0xff] }
 0x16b   : > { %v1609_v27 = vld [vmem:[#allocation3 + $0x28] sm:$0xff]  ;;  %2100 = vst.msk [vmem:[#allocation3 + $0x20] sm:$0xff] %vm189_vm0, %v4319_v0  ;;  %2414 = vrot.lane.b32.xlu0 %v1431_v47, %s3891_s4  ;;  %1216 = vst.msk [vmem:[#allocation3 + $0xe0] sm:$0xff] %vm189_vm0, %v4827_v24 }
 0x16c   : > { %1386 = vst.msk [vmem:[#allocation3 + $0x30] sm:$0xff] %vm534_vm3, %v1297_v51  ;;  %3570 = vmatmul.mubr.msk.f32.gmra.mrb[20].mxu1 %vm801_vm5, %v1609_v27  ;;  %1326 = vrot.lane.b32.xlu1 %v1241_v17, %s3890_s23  ;;  %v1438_v51 = vld [vmem:[#allocation2 + $0x16c] sm:$0xff] }
 0x16d   : > { %2101 = vst.msk [vmem:[#allocation3 + $0x28] sm:$0xff] %vm189_vm0, %v4330_v3  ;;  %v2387_v55 = vpop.permute.xlu0 %2386 }
 0x16e   : > { %2481 = vst.msk [vmem:[#allocation3 + $0x8] sm:$0xff] %vm727_vm4, %v2387_v55  ;;  %v1299_v0 = vpop.permute.xlu1 %1298  ;;  %v4841_v55 = vld [vmem:[#allocation2 + $0x188] sm:$0xff] }
 0x16f   : > { %1387 = vst.msk [vmem:[#allocation3 + $0x38] sm:$0xff] %vm534_vm3, %v1299_v0  ;;  %1516 = vrot.lane.b32.xlu0 %v1432_v28, %s3891_s4 }
 0x170   : > { %1518 = vrot.lane.b32.xlu1 %v1433_v31, %s3891_s4  ;;  %1217 = vst.msk [vmem:[#allocation3 + $0xe8] sm:$0xff] %vm189_vm0, %v4841_v55 }
 0x171   : > { %v1489_v3 = vpop.permute.xlu0 %1488  ;;  %v2512_v33 = vld [vmem:[#allocation3] sm:$0xff] }
 0x172   : > { %1578 = vst.msk [vmem:[#allocation3 + $0x30] sm:$0xff] %vm727_vm4, %v1489_v3  ;;  %v1491_v35 = vpop.permute.xlu1 %1490  ;;  %3629 = vmatprep.mubr.msk.f32.mxu0 %vm801_vm5, %v2512_v33 }
 0x173   : > { %1579 = vst.msk [vmem:[#allocation3 + $0x38] sm:$0xff] %vm727_vm4, %v1491_v35  ;;  %2224 = vrot.lane.b32.xlu0 %v1240_v46, %s3890_s23  ;;  %v1248_v35 = vld [vmem:[#allocation2 + $0x182] sm:$0xff] }
 0x174   : > { %2226 = vrot.lane.b32.xlu1 %v1241_v17, %s3890_s23 }
 0x175   : > { %v2197_v37 = vpop.permute.xlu0 %2196  ;;  %v2513_v26 = vld [vmem:[#allocation3 + $0x8] sm:$0xff] }
 0x176   : > { %2290 = vst.msk [vmem:[#allocation3 + $0x10] sm:$0xff] %vm534_vm3, %v2197_v37  ;;  %v2199_v63 = vpop.permute.xlu1 %2198  ;;  %3630 = vmatmul.mubr.msk.f32.vlgmr.msra.gmra.mrb[16].mxu0 %vm801_vm5, %v2513_v26  ;;  %v2076_v26 = vld [vmem:[#allocation2 + $0xf0] sm:$0xff] }
 0x177   : > { %2291 = vst.msk [vmem:[#allocation3 + $0x18] sm:$0xff] %vm534_vm3, %v2199_v63  ;;  %2416 = vrot.lane.b32.xlu0 %v1432_v28, %s3891_s4  ;;  %v1439_v28 = vld [vmem:[#allocation2 + $0x174] sm:$0xff] }
 0x178   : > { %1328 = vrot.lane.b32.xlu1 %v1242_v61, %s3890_s23 }
 0x179   : > { %v2389_v29 = vpop.permute.xlu0 %2388  ;;  %v1610_v1 = vld [vmem:[#allocation3 + $0x30] sm:$0xff] }
 0x17a   : > { %2482 = vst.msk [vmem:[#allocation3 + $0x10] sm:$0xff] %vm727_vm4, %v2389_v29  ;;  %v1301_v2 = vpop.permute.xlu1 %1300  ;;  %3572 = vmatprep.mubr.msk.f32.mxu1 %vm801_vm5, %v1610_v1  ;;  %v1611_v44 = vld [vmem:[#allocation3 + $0x38] sm:$0xff]  ;;  %v1249_v29 = vld [vmem:[#allocation2 + $0x18a] sm:$0xff] }
 0x17b   : > { %2102 = vst.msk [vmem:[#allocation3 + $0x30] sm:$0xff] %vm189_vm0, %v4352_v11  ;;  %2418 = vrot.lane.b32.xlu0 %v1433_v31, %s3891_s4  ;;  %3573 = vmatmul.mubr.msk.f32.gmra.mrb[22].mxu1 %vm801_vm5, %v1611_v44  ;;  %2103 = vst.msk [vmem:[#allocation3 + $0x38] sm:$0xff] %vm189_vm0, %v4366_v16  ;;  %v4859_v1 = vld [vmem:[#allocation2 + $0x198] sm:$0xff]  ;;  %v1440_v44 = vld [vmem:[#allocation2 + $0x184] sm:$0xff] }
 0x17c   : > { %1388 = vst.msk [vmem:[#allocation3 + $0x40] sm:$0xff] %vm534_vm3, %v1301_v2  ;;  %1330 = vrot.lane.b32.xlu1 %v1243_v40, %s3890_s23 }
 0x17d   : > { %v2391_v48 = vpop.permute.xlu0 %2390  ;;  %1218 = vst.msk [vmem:[#allocation3 + $0xf0] sm:$0xff] %vm189_vm0, %v4859_v1 }
 0x17e   : > { %2483 = vst.msk [vmem:[#allocation3 + $0x18] sm:$0xff] %vm727_vm4, %v2391_v48  ;;  %v1303_v11 = vpop.permute.xlu1 %1302  ;;  %v1441_v48 = vld [vmem:[#allocation2 + $0x18c] sm:$0xff] }
 0x17f   : > { %1389 = vst.msk [vmem:[#allocation3 + $0x48] sm:$0xff] %vm534_vm3, %v1303_v11  ;;  %1520 = vrot.lane.b32.xlu0 %v1434_v45, %s3891_s4 }
 0x180   : > { %1522 = vrot.lane.b32.xlu1 %v1435_v5, %s3891_s4 }
 0x181   : > { %v1493_v16 = vpop.permute.xlu0 %1492  ;;  %v2514_v53 = vld [vmem:[#allocation3 + $0x10] sm:$0xff] }
 0x182   : > { %1580 = vst.msk [vmem:[#allocation3 + $0x40] sm:$0xff] %vm727_vm4, %v1493_v16  ;;  %v1495_v42 = vpop.permute.xlu1 %1494  ;;  %3632 = vmatprep.mubr.msk.f32.mxu0 %vm801_vm5, %v2514_v53 }
 0x183   : > { %1581 = vst.msk [vmem:[#allocation3 + $0x48] sm:$0xff] %vm727_vm4, %v1495_v42  ;;  %2228 = vrot.lane.b32.xlu0 %v1242_v61, %s3890_s23 }
 0x184   : > { %2230 = vrot.lane.b32.xlu1 %v1243_v40, %s3890_s23 }
 0x185   : > { %v2201_v58 = vpop.permute.xlu0 %2200  ;;  %v2515_v15 = vld [vmem:[#allocation3 + $0x18] sm:$0xff] }
 0x186   : > { %2292 = vst.msk [vmem:[#allocation3 + $0x20] sm:$0xff] %vm534_vm3, %v2201_v58  ;;  %v2203_v41 = vpop.permute.xlu1 %2202  ;;  %3633 = vmatmul.mubr.msk.f32.gmra.mrb[18].mxu0 %vm801_vm5, %v2515_v15 }
 0x187   : > { %2293 = vst.msk [vmem:[#allocation3 + $0x28] sm:$0xff] %vm534_vm3, %v2203_v41  ;;  %2420 = vrot.lane.b32.xlu0 %v1434_v45, %s3891_s4  ;;  %v1250_v41 = vld [vmem:[#allocation2 + $0x19a] sm:$0xff] }
 0x188   : > { %1332 = vrot.lane.b32.xlu1 %v1244_v59, %s3890_s23 }
 0x189   : > { %v2393_v60 = vpop.permute.xlu0 %2392  ;;  %v1612_v62 = vld [vmem:[#allocation3 + $0x40] sm:$0xff] }
 0x18a   : > { %2484 = vst.msk [vmem:[#allocation3 + $0x20] sm:$0xff] %vm727_vm4, %v2393_v60  ;;  %v1305_v9 = vpop.permute.xlu1 %1304  ;;  %3575 = vmatprep.mubr.msk.f32.mxu1 %vm801_vm5, %v1612_v62  ;;  %v1613_v10 = vld [vmem:[#allocation3 + $0x48] sm:$0xff] }
 0x18b   : > { %2104 = vst.msk [vmem:[#allocation3 + $0x40] sm:$0xff] %vm189_vm0, %v4672_v38  ;;  %2422 = vrot.lane.b32.xlu0 %v1435_v5, %s3891_s4  ;;  %3576 = vmatmul.mubr.msk.f32.gmra.mrb[24].mxu1 %vm801_vm5, %v1613_v10  ;;  %2105 = vst.msk [vmem:[#allocation3 + $0x48] sm:$0xff] %vm189_vm0, %v4675_v57  ;;  %v4872_v5 = vld [vmem:[#allocation2 + $0x1a0] sm:$0xff] }
 0x18c   : > { %1390 = vst.msk [vmem:[#allocation3 + $0x50] sm:$0xff] %vm534_vm3, %v1305_v9  ;;  %1334 = vrot.lane.b32.xlu1 %v1245_v6, %s3890_s23 }
 0x18d   : > { %v2395_v13 = vpop.permute.xlu0 %2394  ;;  %1219 = vst.msk [vmem:[#allocation3 + $0xf8] sm:$0xff] %vm189_vm0, %v4872_v5 }
 0x18e   : > { %2485 = vst.msk [vmem:[#allocation3 + $0x28] sm:$0xff] %vm727_vm4, %v2395_v13  ;;  %v1307_v38 = vpop.permute.xlu1 %1306 }
 0x18f   : > { %1391 = vst.msk [vmem:[#allocation3 + $0x58] sm:$0xff] %vm534_vm3, %v1307_v38  ;;  %1524 = vrot.lane.b32.xlu0 %v1436_v34, %s3891_s4  ;;  %v1442_v38 = vld [vmem:[#allocation2 + $0x19c] sm:$0xff] }
 0x190   : > { %1526 = vrot.lane.b32.xlu1 %v1437_v14, %s3891_s4 }
 0x191   : > { %v1497_v57 = vpop.permute.xlu0 %1496  ;;  %v2516_v47 = vld [vmem:[#allocation3 + $0x20] sm:$0xff] }
 0x192   : > { %1582 = vst.msk [vmem:[#allocation3 + $0x50] sm:$0xff] %vm727_vm4, %v1497_v57  ;;  %v1499_v20 = vpop.permute.xlu1 %1498  ;;  %3635 = vmatprep.mubr.msk.f32.mxu0 %vm801_vm5, %v2516_v47  ;;  %v1443_v47 = vld [vmem:[#allocation2 + $0x1a4] sm:$0xff] }
 0x193   : > { %1583 = vst.msk [vmem:[#allocation3 + $0x58] sm:$0xff] %vm727_vm4, %v1499_v20  ;;  %2232 = vrot.lane.b32.xlu0 %v1244_v59, %s3890_s23 }
 0x194   : > { %2234 = vrot.lane.b32.xlu1 %v1245_v6, %s3890_s23 }
 0x195   : > { %v2205_v22 = vpop.permute.xlu0 %2204  ;;  %v2517_v56 = vld [vmem:[#allocation3 + $0x28] sm:$0xff] }
 0x196   : > { %2294 = vst.msk [vmem:[#allocation3 + $0x30] sm:$0xff] %vm534_vm3, %v2205_v22  ;;  %v2207_v54 = vpop.permute.xlu1 %2206  ;;  %3636 = vmatmul.mubr.msk.f32.gmra.mrb[20].mxu0 %vm801_vm5, %v2517_v56 }
 0x197   : > { %2295 = vst.msk [vmem:[#allocation3 + $0x38] sm:$0xff] %vm534_vm3, %v2207_v54  ;;  %2424 = vrot.lane.b32.xlu0 %v1436_v34, %s3891_s4  ;;  %v1251_v34 = vld [vmem:[#allocation2 + $0x1a2] sm:$0xff] }
 0x198   : > { %1336 = vrot.lane.b32.xlu1 %v1246_v23, %s3890_s23 }
 0x199   : > { %v2397_v4 = vpop.permute.xlu0 %2396  ;;  %v1614_v46 = vld [vmem:[#allocation3 + $0x50] sm:$0xff] }
 0x19a   : > { %2486 = vst.msk [vmem:[#allocation3 + $0x30] sm:$0xff] %vm727_vm4, %v2397_v4  ;;  %v1309_v25 = vpop.permute.xlu1 %1308  ;;  %3578 = vmatprep.mubr.msk.f32.mxu1 %vm801_vm5, %v1614_v46  ;;  %v1615_v17 = vld [vmem:[#allocation3 + $0x58] sm:$0xff] }
 0x19b   : > { %2106 = vst.msk [vmem:[#allocation3 + $0x50] sm:$0xff] %vm189_vm0, %v4712_v50  ;;  %2426 = vrot.lane.b32.xlu0 %v1437_v14, %s3891_s4  ;;  %3579 = vmatmul.mubr.msk.f32.gmra.mrb[26].mxu1 %vm801_vm5, %v1615_v17  ;;  %2107 = vst.msk [vmem:[#allocation3 + $0x58] sm:$0xff] %vm189_vm0, %v4715_v21 }
 0x19c   : > { %1392 = vst.msk [vmem:[#allocation3 + $0x60] sm:$0xff] %vm534_vm3, %v1309_v25  ;;  %1338 = vrot.lane.b32.xlu1 %v1247_v49, %s3890_s23 }
 0x19d   : > { %v2399_v27 = vpop.permute.xlu0 %2398 }
 0x19e   : > { %2487 = vst.msk [vmem:[#allocation3 + $0x38] sm:$0xff] %vm727_vm4, %v2399_v27  ;;  %v1311_v50 = vpop.permute.xlu1 %1310  ;;  %v2157_v27 = vld [vmem:[#allocation2 + $0x1ba] sm:$0xff] }
 0x19f   : > { %1393 = vst.msk [vmem:[#allocation3 + $0x68] sm:$0xff] %vm534_vm3, %v1311_v50  ;;  %1528 = vrot.lane.b32.xlu0 %v1438_v51, %s3891_s4 }
 0x1a0   : > { %1530 = vrot.lane.b32.xlu1 %v1439_v28, %s3891_s4 }
 0x1a1   : > { %v1501_v21 = vpop.permute.xlu0 %1500  ;;  %v2518_v31 = vld [vmem:[#allocation3 + $0x30] sm:$0xff] }
 0x1a2   : > { %1584 = vst.msk [vmem:[#allocation3 + $0x60] sm:$0xff] %vm727_vm4, %v1501_v21  ;;  %v1503_v0 = vpop.permute.xlu1 %1502  ;;  %3638 = vmatprep.mubr.msk.f32.mxu0 %vm801_vm5, %v2518_v31  ;;  %v2348_v31 = vld [vmem:[#allocation2 + $0x1b4] sm:$0xff] }
 0x1a3   : > { %1585 = vst.msk [vmem:[#allocation3 + $0x68] sm:$0xff] %vm727_vm4, %v1503_v0  ;;  %2236 = vrot.lane.b32.xlu0 %v1246_v23, %s3890_s23 }
 0x1a4   : > { %2238 = vrot.lane.b32.xlu1 %v1247_v49, %s3890_s23  ;;  %v2156_v49 = vld [vmem:[#allocation2 + $0x1b2] sm:$0xff] }
 0x1a5   : > { %v2209_v3 = vpop.permute.xlu0 %2208  ;;  %v2519_v33 = vld [vmem:[#allocation3 + $0x38] sm:$0xff] }
 0x1a6   : > { %2296 = vst.msk [vmem:[#allocation3 + $0x40] sm:$0xff] %vm534_vm3, %v2209_v3  ;;  %v2211_v37 = vpop.permute.xlu1 %2210  ;;  %3639 = vmatmul.mubr.msk.f32.gmra.mrb[22].mxu0 %vm801_vm5, %v2519_v33  ;;  %v2349_v3 = vld [vmem:[#allocation2 + $0x1bc] sm:$0xff] }
 0x1a7   : > { %2297 = vst.msk [vmem:[#allocation3 + $0x48] sm:$0xff] %vm534_vm3, %v2211_v37  ;;  %2428 = vrot.lane.b32.xlu0 %v1438_v51, %s3891_s4 }
 0x1a8   : > { %1340 = vrot.lane.b32.xlu1 %v1248_v35, %s3890_s23 }
 0x1a9   : > { %v2401_v61 = vpop.permute.xlu0 %2400  ;;  %v1616_v63 = vld [vmem:[#allocation3 + $0x60] sm:$0xff] }
 0x1aa   : > { %2488 = vst.msk [vmem:[#allocation3 + $0x40] sm:$0xff] %vm727_vm4, %v2401_v61  ;;  %v1313_v40 = vpop.permute.xlu1 %1312  ;;  %3581 = vmatprep.mubr.msk.f32.mxu1 %vm801_vm5, %v1616_v63  ;;  %v1617_v2 = vld [vmem:[#allocation3 + $0x68] sm:$0xff]  ;;  %v2159_v61 = vld [vmem:[#allocation2 + $0x1d2] sm:$0xff] }
 0x1ab   : > { %2108 = vst.msk [vmem:[#allocation3 + $0x60] sm:$0xff] %vm189_vm0, %v2076_v26  ;;  %2430 = vrot.lane.b32.xlu0 %v1439_v28, %s3891_s4  ;;  %3582 = vmatmul.mubr.msk.f32.gmra.mrb[28].mxu1 %vm801_vm5, %v1617_v2  ;;  %2109 = vst.msk [vmem:[#allocation3 + $0x68] sm:$0xff] %vm189_vm0, %v4628_v36 }
 0x1ac   : > { %1394 = vst.msk [vmem:[#allocation3 + $0x70] sm:$0xff] %vm534_vm3, %v1313_v40  ;;  %1342 = vrot.lane.b32.xlu1 %v1249_v29, %s3890_s23 }
 0x1ad   : > { %v2403_v45 = vpop.permute.xlu0 %2402 }
 0x1ae   : > { %2489 = vst.msk [vmem:[#allocation3 + $0x48] sm:$0xff] %vm727_vm4, %v2403_v45  ;;  %v3523_v11 = vpop.f32.mrb[0].mxu1  ;;  %v1315_v16 = vpop.permute.xlu1 %1314 }
 0x1af   : > { %1141 = vst.msk [vmem:[#allocation4 + $0x88] sm:$0xff] %vm1123_vm6, %v3523_v11  ;;  %v1044_v36 = vpop.f32.mrb[1].mxu1  ;;  %1532 = vrot.lane.b32.xlu0 %v1440_v44, %s3891_s4 }
 0x1b0   : > { %1395 = vst.msk [vmem:[#allocation3 + $0x78] sm:$0xff] %vm534_vm3, %v1315_v16  ;;  %1534 = vrot.lane.b32.xlu1 %v1441_v48, %s3891_s4 }
 0x1b1   : > { %1140 = vst.msk [vmem:[#allocation4 + $0x80] sm:$0xff] %vm1123_vm6, %v1044_v36  ;;  %v1505_v53 = vpop.permute.xlu0 %1504  ;;  %v2520_v42 = vld [vmem:[#allocation3 + $0x40] sm:$0xff] }
 0x1b2   : > { %1586 = vst.msk [vmem:[#allocation3 + $0x70] sm:$0xff] %vm727_vm4, %v1505_v53  ;;  %v1507_v58 = vpop.permute.xlu1 %1506  ;;  %3641 = vmatprep.mubr.msk.f32.mxu0 %vm801_vm5, %v2520_v42 }
 0x1b3   : > { %1587 = vst.msk [vmem:[#allocation3 + $0x78] sm:$0xff] %vm727_vm4, %v1507_v58  ;;  %2240 = vrot.lane.b32.xlu0 %v1248_v35, %s3890_s23 }
 0x1b4   : > { %2242 = vrot.lane.b32.xlu1 %v1249_v29, %s3890_s23  ;;  %v2350_v29 = vld [vmem:[#allocation2 + $0x1cc] sm:$0xff] }
 0x1b5   : > { %v2213_v15 = vpop.permute.xlu0 %2212  ;;  %v2521_v59 = vld [vmem:[#allocation3 + $0x48] sm:$0xff] }
 0x1b6   : > { %2298 = vst.msk [vmem:[#allocation3 + $0x50] sm:$0xff] %vm534_vm3, %v2213_v15  ;;  %v3526_v60 = vpop.f32.mrb[2].mxu1  ;;  %v2215_v62 = vpop.permute.xlu1 %2214  ;;  %3642 = vmatmul.mubr.msk.f32.gmra.mrb[24].mxu0 %vm801_vm5, %v2521_v59 }
 0x1b7   : > { %1143 = vst.msk [vmem:[#allocation4 + $0x98] sm:$0xff] %vm1123_vm6, %v3526_v60  ;;  %v1054_v6 = vpop.f32.mrb[3].mxu1  ;;  %2432 = vrot.lane.b32.xlu0 %v1440_v44, %s3891_s4  ;;  %v2351_v44 = vld [vmem:[#allocation2 + $0x1d4] sm:$0xff] }
 0x1b8   : > { %2299 = vst.msk [vmem:[#allocation3 + $0x58] sm:$0xff] %vm534_vm3, %v2215_v62  ;;  %1344 = vrot.lane.b32.xlu1 %v1250_v41, %s3890_s23 }
 0x1b9   : > { %1142 = vst.msk [vmem:[#allocation4 + $0x90] sm:$0xff] %vm1123_vm6, %v1054_v6  ;;  %v2405_v9 = vpop.permute.xlu0 %2404  ;;  %v1618_v10 = vld [vmem:[#allocation3 + $0x70] sm:$0xff] }
 0x1ba   : > { %2490 = vst.msk [vmem:[#allocation3 + $0x50] sm:$0xff] %vm727_vm4, %v2405_v9  ;;  %v1317_v13 = vpop.permute.xlu1 %1316  ;;  %3584 = vmatprep.mubr.msk.f32.mxu1 %vm801_vm5, %v1618_v10  ;;  %v1619_v14 = vld [vmem:[#allocation3 + $0x78] sm:$0xff] }
 0x1bb   : > { %2110 = vst.msk [vmem:[#allocation3 + $0x70] sm:$0xff] %vm189_vm0, %v4651_v39  ;;  %2434 = vrot.lane.b32.xlu0 %v1441_v48, %s3891_s4  ;;  %3585 = vmatmul.mubr.msk.f32.gmra.mrb[30].mxu1 %vm801_vm5, %v1619_v14  ;;  %2111 = vst.msk [vmem:[#allocation3 + $0x78] sm:$0xff] %vm189_vm0, %v4662_v12 }
 0x1bc   : > { %1396 = vst.msk [vmem:[#allocation3 + $0x80] sm:$0xff] %vm534_vm3, %v1317_v13  ;;  %1346 = vrot.lane.b32.xlu1 %v1251_v34, %s3890_s23 }
 0x1bd   : > { %v2407_v57 = vpop.permute.xlu0 %2406 }
 0x1be   : > { %2491 = vst.msk [vmem:[#allocation3 + $0x58] sm:$0xff] %vm727_vm4, %v2407_v57  ;;  %v1319_v20 = vpop.permute.xlu1 %1318 }
 0x1bf   : > { %1397 = vst.msk [vmem:[#allocation3 + $0x88] sm:$0xff] %vm534_vm3, %v1319_v20  ;;  %1536 = vrot.lane.b32.xlu0 %v1442_v38, %s3891_s4 }
 0x1c0   : > { %1538 = vrot.lane.b32.xlu1 %v1443_v47, %s3891_s4 }
 0x1c1   : > { %v3529_v39 = vpop.f32.mrb[4].mxu1  ;;  %v1509_v22 = vpop.permute.xlu0 %1508  ;;  %v2522_v56 = vld [vmem:[#allocation3 + $0x50] sm:$0xff] }
 0x1c2   : > { %1145 = vst.msk [vmem:[#allocation4 + $0xa8] sm:$0xff] %vm1123_vm6, %v3529_v39  ;;  %v1064_v12 = vpop.f32.mrb[5].mxu1  ;;  %v1511_v23 = vpop.permute.xlu1 %1510  ;;  %3644 = vmatprep.mubr.msk.f32.mxu0 %vm801_vm5, %v2522_v56 }
 0x1c3   : > { %1588 = vst.msk [vmem:[#allocation3 + $0x80] sm:$0xff] %vm727_vm4, %v1509_v22  ;;  %1589 = vst.msk [vmem:[#allocation3 + $0x88] sm:$0xff] %vm727_vm4, %v1511_v23  ;;  %2244 = vrot.lane.b32.xlu0 %v1250_v41, %s3890_s23 }
 0x1c4   : > { %1144 = vst.msk [vmem:[#allocation4 + $0xa0] sm:$0xff] %vm1123_vm6, %v1064_v12  ;;  %2246 = vrot.lane.b32.xlu1 %v1251_v34, %s3890_s23 }
 0x1c5   : > { %v2217_v54 = vpop.permute.xlu0 %2216  ;;  %v2523_v4 = vld [vmem:[#allocation3 + $0x58] sm:$0xff] }
 0x1c6   : > { %2300 = vst.msk [vmem:[#allocation3 + $0x60] sm:$0xff] %vm534_vm3, %v2217_v54  ;;  %v2219_v46 = vpop.permute.xlu1 %2218  ;;  %3645 = vmatmul.mubr.msk.f32.gmra.mrb[26].mxu0 %vm801_vm5, %v2523_v4 }
 0x1c7   : > { %2301 = vst.msk [vmem:[#allocation3 + $0x68] sm:$0xff] %vm534_vm3, %v2219_v46  ;;  %2436 = vrot.lane.b32.xlu0 %v1442_v38, %s3891_s4 }
 0x1c8   : > { %2438 = vrot.lane.b32.xlu1 %v1443_v47, %s3891_s4 }
 0x1c9   : > { %v2409_v25 = vpop.permute.xlu0 %2408  ;;  %v3499_v17 = vpop.f32.mrb[0].mxu0 }
 0x1ca   : > { %v1620_v51 = vld [vmem:[#allocation3 + $0x80] sm:$0xff]  ;;  %2492 = vst.msk [vmem:[#allocation3 + $0x60] sm:$0xff] %vm727_vm4, %v2409_v25  ;;  %v1321_v28 = vpop.permute.xlu1 %1320  ;;  %v964_v50 = vpop.f32.mrb[1].mxu0  ;;  %v1621_v21 = vld [vmem:[#allocation3 + $0x88] sm:$0xff] }
 0x1cb   : > { %1125 = vst.msk [vmem:[#allocation4 + $0x8] sm:$0xff] %vm1123_vm6, %v3499_v17  ;;  %3587 = vmatprep.mubr.msk.f32.mxu1 %vm801_vm5, %v1620_v51  ;;  %1124 = vst.msk [vmem:[#allocation4] sm:$0xff] %vm1123_vm6, %v964_v50  ;;  %2248 = vrot.lane.b32.xlu0 %v2156_v49, %s3890_s23 }
 0x1cc   : > { %2112 = vst.msk [vmem:[#allocation3 + $0x80] sm:$0xff] %vm189_vm0, %v4691_v30  ;;  %3588 = vmatmul.mubr.msk.f32.gmra.mrb[32].mxu1 %vm801_vm5, %v1621_v21  ;;  %2113 = vst.msk [vmem:[#allocation3 + $0x88] sm:$0xff] %vm189_vm0, %v4702_v19  ;;  %2250 = vrot.lane.b32.xlu1 %v2157_v27, %s3890_s23  ;;  %v2158_v30 = vld [vmem:[#allocation2 + $0x1ca] sm:$0xff] }
 0x1cd   : > { %1398 = vst.msk [vmem:[#allocation3 + $0x90] sm:$0xff] %vm534_vm3, %v1321_v28  ;;  %v2411_v0 = vpop.permute.xlu0 %2410 }
 0x1ce   : > { %2493 = vst.msk [vmem:[#allocation3 + $0x68] sm:$0xff] %vm727_vm4, %v2411_v0  ;;  %v1323_v33 = vpop.permute.xlu1 %1322 }
 0x1cf   : > { %1399 = vst.msk [vmem:[#allocation3 + $0x98] sm:$0xff] %vm534_vm3, %v1323_v33  ;;  %2440 = vrot.lane.b32.xlu0 %v2348_v31, %s3891_s4 }
 0x1d0   : > { %2442 = vrot.lane.b32.xlu1 %v2349_v3, %s3891_s4 }
 0x1d1   : > { %v1513_v35 = vpop.permute.xlu0 %1512  ;;  %v3532_v37 = vpop.f32.mrb[6].mxu1  ;;  %v2524_v26 = vld [vmem:[#allocation3 + $0x60] sm:$0xff] }
 0x1d2   : > { %1590 = vst.msk [vmem:[#allocation3 + $0x90] sm:$0xff] %vm727_vm4, %v1513_v35  ;;  %v1074_v19 = vpop.f32.mrb[7].mxu1  ;;  %v1515_v63 = vpop.permute.xlu1 %1514  ;;  %3647 = vmatprep.mubr.msk.f32.mxu0 %vm801_vm5, %v2524_v26 }
 0x1d3   : > { %1147 = vst.msk [vmem:[#allocation4 + $0xb8] sm:$0xff] %vm1123_vm6, %v3532_v37  ;;  %1146 = vst.msk [vmem:[#allocation4 + $0xb0] sm:$0xff] %vm1123_vm6, %v1074_v19  ;;  %2252 = vrot.lane.b32.xlu0 %v2158_v30, %s3890_s23 }
 0x1d4   : > { %1591 = vst.msk [vmem:[#allocation3 + $0x98] sm:$0xff] %vm727_vm4, %v1515_v63  ;;  %2254 = vrot.lane.b32.xlu1 %v2159_v61, %s3890_s23 }
 0x1d5   : > { %v2221_v40 = vpop.permute.xlu0 %2220  ;;  %v2525_v2 = vld [vmem:[#allocation3 + $0x68] sm:$0xff] }
 0x1d6   : > { %2302 = vst.msk [vmem:[#allocation3 + $0x70] sm:$0xff] %vm534_vm3, %v2221_v40  ;;  %v2223_v45 = vpop.permute.xlu1 %2222  ;;  %3648 = vmatmul.mubr.msk.f32.gmra.mrb[28].mxu0 %vm801_vm5, %v2525_v2 }
 0x1d7   : > { %2303 = vst.msk [vmem:[#allocation3 + $0x78] sm:$0xff] %vm534_vm3, %v2223_v45  ;;  %2444 = vrot.lane.b32.xlu0 %v2350_v29, %s3891_s4 }
 0x1d8   : > { %2446 = vrot.lane.b32.xlu1 %v2351_v44, %s3891_s4  ;;  %s5103_s4 = scalar_lea.vmem [#allocation8], %s3232_s9  ;;  %s3355_s9 = sshll.u32 %s3936_s16, 12 }
 0x1d9   : > { %v2413_v48 = vpop.permute.xlu0 %2412  ;;  %v3502_v11 = vpop.f32.mrb[2].mxu0  ;;  %v1622_v16 = vld [vmem:[#allocation3 + $0x90] sm:$0xff]  ;;  %s3152_s8 = sshll.u32 %s5103_s4, 4  ;;  %s5254_s20 = scalar_lea.hbm %s5307_s3, %s3355_s9  ;;  %s5256_s8 = int_to_ptr.vmem [resolvable:$true] %s3152_s8 }
 0x1da   : > { %2494 = vst.msk [vmem:[#allocation3 + $0x70] sm:$0xff] %vm727_vm4, %v2413_v48  ;;  %v1325_v36 = vpop.permute.xlu1 %1324  ;;  %v974_v53 = vpop.f32.mrb[3].mxu0  ;;  %3590 = vmatprep.mubr.msk.f32.mxu1 %vm801_vm5, %v1622_v16  ;;  %s3139_s16 = scalar_lea.sflag [#allocation7], %s4019_s5  ;;  %s3818_s22 = scalar_lea.vmem %s5256_s8, 4096 }
 0x1db   : > { %1127 = vst.msk [vmem:[#allocation4 + $0x18] sm:$0xff] %vm1123_vm6, %v3502_v11  ;;  %v1623_v42 = vld [vmem:[#allocation3 + $0x98] sm:$0xff]  ;;  %1126 = vst.msk [vmem:[#allocation4 + $0x10] sm:$0xff] %vm1123_vm6, %v974_v53  ;;  %p3819_p6 = scmp.ne.s32.totalorder %s5256_s8, %s3818_s22  ;;  %p3825_p8 = scmp.lt.s32.totalorder %s5256_s8, %s3823_s27 }
 0x1dc   : > { %2114 = vst.msk [vmem:[#allocation3 + $0x90] sm:$0xff] %vm189_vm0, %v4731_v52  ;;  %3591 = vmatmul.mubr.msk.f32.gmra.mrb[34].mxu1 %vm801_vm5, %v1623_v42  ;;  %2115 = vst.msk [vmem:[#allocation3 + $0x98] sm:$0xff] %vm189_vm0, %v4745_v32  ;;  %p3826_p10 = scmp.lt.s32.totalorder %s3824_s28, %s3818_s22 }
 0x1dd   : > { %1400 = vst.msk [vmem:[#allocation3 + $0xa0] sm:$0xff] %vm534_vm3, %v1325_v36  ;;  %v2415_v58 = vpop.permute.xlu0 %2414  ;;  %p3820_p12 = pnand %p3819_p6, %p5314_p11 }
 0x1de   : > { %2495 = vst.msk [vmem:[#allocation3 + $0x78] sm:$0xff] %vm727_vm4, %v2415_v58  ;;  %v1327_v15 = vpop.permute.xlu1 %1326  ;;  %p3827_p0 = por %p3826_p10, %p3825_p8 }
 0x1df   : > { %1401 = vst.msk [vmem:[#allocation3 + $0xa8] sm:$0xff] %vm534_vm3, %v1327_v15  ;;  %p3821_p13 = pneg %p3820_p12 }
 0x1e1   : > { %v1517_v59 = vpop.permute.xlu0 %1516  ;;  %v3535_v41 = vpop.f32.mrb[8].mxu1  ;;  %v2526_v60 = vld [vmem:[#allocation3 + $0x70] sm:$0xff]  ;;  %p3828_p2 = pnand %p3827_p0, %p3821_p13 }
 0x1e2   : > { %1592 = vst.msk [vmem:[#allocation3 + $0xa0] sm:$0xff] %vm727_vm4, %v1517_v59  ;;  %v1084_v52 = vpop.f32.mrb[9].mxu1  ;;  %v1519_v62 = vpop.permute.xlu1 %1518  ;;  %3650 = vmatprep.mubr.msk.f32.mxu0 %vm801_vm5, %v2526_v60 }
 0x1e3   : > { %1149 = vst.msk [vmem:[#allocation4 + $0xc8] sm:$0xff] %vm1123_vm6, %v3535_v41  ;;  %1148 = vst.msk [vmem:[#allocation4 + $0xc0] sm:$0xff] %vm1123_vm6, %v1084_v52 }
 0x1e4   : > { %1593 = vst.msk [vmem:[#allocation3 + $0xa8] sm:$0xff] %vm727_vm4, %v1519_v62  ;;  %v1968_v62 = vld [vmem:[#allocation4 + $0x8] sm:$0xff] }
 0x1e5   : > { %v2225_v32 = vpop.permute.xlu0 %2224  ;;  %v2527_v6 = vld [vmem:[#allocation3 + $0x78] sm:$0xff] }
 0x1e6   : > { %2304 = vst.msk [vmem:[#allocation3 + $0x80] sm:$0xff] %vm534_vm3, %v2225_v32  ;;  %v2227_v9 = vpop.permute.xlu1 %2226  ;;  %3651 = vmatmul.mubr.msk.f32.gmra.mrb[30].mxu0 %vm801_vm5, %v2527_v6 }
 0x1e7   : > { %2305 = vst.msk [vmem:[#allocation3 + $0x88] sm:$0xff] %vm534_vm3, %v2227_v9 }
 0x1e9   : > { %v2417_v10 = vpop.permute.xlu0 %2416  ;;  %v3505_v34 = vpop.f32.mrb[4].mxu0  ;;  %v1624_v13 = vld [vmem:[#allocation3 + $0xa0] sm:$0xff] }
 0x1ea   : > { %2496 = vst.msk [vmem:[#allocation3 + $0x80] sm:$0xff] %vm727_vm4, %v2417_v10  ;;  %v1329_v14 = vpop.permute.xlu1 %1328  ;;  %v984_v38 = vpop.f32.mrb[5].mxu0  ;;  %3593 = vmatprep.mubr.msk.f32.mxu1 %vm801_vm5, %v1624_v13  ;;  %v1967_v10 = vld [vmem:[#allocation4] sm:$0xff] }
 0x1eb   : > { %1129 = vst.msk [vmem:[#allocation4 + $0x28] sm:$0xff] %vm1123_vm6, %v3505_v34  ;;  %v1625_v57 = vld [vmem:[#allocation3 + $0xa8] sm:$0xff]  ;;  %1128 = vst.msk [vmem:[#allocation4 + $0x20] sm:$0xff] %vm1123_vm6, %v984_v38 }
 0x1ec   : > { %2116 = vst.msk [vmem:[#allocation3 + $0xa0] sm:$0xff] %vm189_vm0, %v4763_v43  ;;  %3594 = vmatmul.mubr.msk.f32.gmra.mrb[36].mxu1 %vm801_vm5, %v1625_v57  ;;  %2117 = vst.msk [vmem:[#allocation3 + $0xa8] sm:$0xff] %vm189_vm0, %v4777_v8 }
 0x1ed   : > { %1402 = vst.msk [vmem:[#allocation3 + $0xb0] sm:$0xff] %vm534_vm3, %v1329_v14  ;;  %v2419_v47 = vpop.permute.xlu0 %2418 }
 0x1ee   : > { %2497 = vst.msk [vmem:[#allocation3 + $0x88] sm:$0xff] %vm727_vm4, %v2419_v47  ;;  %v1331_v20 = vpop.permute.xlu1 %1330  ;;  %v2092_v47 = vld [vmem:[#allocation2 + $0x1b0] sm:$0xff] }
 0x1ef   : > { %1403 = vst.msk [vmem:[#allocation3 + $0xb8] sm:$0xff] %vm534_vm3, %v1331_v20  ;;  %v2093_v20 = vld [vmem:[#allocation2 + $0x1b8] sm:$0xff] }
 0x1f1   : > { %v1521_v39 = vpop.permute.xlu0 %1520  ;;  %v3538_v22 = vpop.f32.mrb[10].mxu1  ;;  %v2528_v56 = vld [vmem:[#allocation3 + $0x80] sm:$0xff] }
 0x1f2   : > { %1594 = vst.msk [vmem:[#allocation3 + $0xb0] sm:$0xff] %vm727_vm4, %v1521_v39  ;;  %v1094_v43 = vpop.f32.mrb[11].mxu1  ;;  %v1523_v12 = vpop.permute.xlu1 %1522  ;;  %3653 = vmatprep.mubr.msk.f32.mxu0 %vm801_vm5, %v2528_v56 }
 0x1f3   : > { %1151 = vst.msk [vmem:[#allocation4 + $0xd8] sm:$0xff] %vm1123_vm6, %v3538_v22  ;;  %1150 = vst.msk [vmem:[#allocation4 + $0xd0] sm:$0xff] %vm1123_vm6, %v1094_v43 }
 0x1f4   : > { %1595 = vst.msk [vmem:[#allocation3 + $0xb8] sm:$0xff] %vm727_vm4, %v1523_v12 }
 0x1f5   : > { %v2229_v8 = vpop.permute.xlu0 %2228  ;;  %v2529_v23 = vld [vmem:[#allocation3 + $0x88] sm:$0xff] }
 0x1f6   : > { %2306 = vst.msk [vmem:[#allocation3 + $0x90] sm:$0xff] %vm534_vm3, %v2229_v8  ;;  %v2231_v54 = vpop.permute.xlu1 %2230  ;;  %3654 = vmatmul.mubr.msk.f32.gmra.mrb[32].mxu0 %vm801_vm5, %v2529_v23 }
 0x1f7   : > { %2307 = vst.msk [vmem:[#allocation3 + $0x98] sm:$0xff] %vm534_vm3, %v2231_v54 }
 0x1f9   : > { %v2421_v4 = vpop.permute.xlu0 %2420  ;;  %v3508_v46 = vpop.f32.mrb[6].mxu0  ;;  %v1626_v49 = vld [vmem:[#allocation3 + $0xb0] sm:$0xff] }
 0x1fa   : > { %2498 = vst.msk [vmem:[#allocation3 + $0x90] sm:$0xff] %vm727_vm4, %v2421_v4  ;;  %v1333_v25 = vpop.permute.xlu1 %1332  ;;  %v994_v17 = vpop.f32.mrb[7].mxu0  ;;  %3596 = vmatprep.mubr.msk.f32.mxu1 %vm801_vm5, %v1626_v49  ;;  %v1970_v4 = vld [vmem:[#allocation4 + $0x18] sm:$0xff] }
 0x1fb   : > { %1131 = vst.msk [vmem:[#allocation4 + $0x38] sm:$0xff] %vm1123_vm6, %v3508_v46  ;;  %v1627_v51 = vld [vmem:[#allocation3 + $0xb8] sm:$0xff]  ;;  %1130 = vst.msk [vmem:[#allocation4 + $0x30] sm:$0xff] %vm1123_vm6, %v994_v17 }
 0x1fc   : > { %2118 = vst.msk [vmem:[#allocation3 + $0xb0] sm:$0xff] %vm189_vm0, %v4795_v7  ;;  %3597 = vmatmul.mubr.msk.f32.gmra.mrb[38].mxu1 %vm801_vm5, %v1627_v51  ;;  %2119 = vst.msk [vmem:[#allocation3 + $0xb8] sm:$0xff] %vm189_vm0, %v4809_v18  ;;  %v1969_v51 = vld [vmem:[#allocation4 + $0x10] sm:$0xff] }
 0x1fd   : > { %1404 = vst.msk [vmem:[#allocation3 + $0xc0] sm:$0xff] %vm534_vm3, %v1333_v25  ;;  %v2423_v27 = vpop.permute.xlu0 %2422 }
 0x1fe   : > { %2499 = vst.msk [vmem:[#allocation3 + $0x98] sm:$0xff] %vm727_vm4, %v2423_v27  ;;  %v1335_v28 = vpop.permute.xlu1 %1334 }
 0x1ff   : > { %1405 = vst.msk [vmem:[#allocation3 + $0xc8] sm:$0xff] %vm534_vm3, %v1335_v28 }
 0x201   : > { %v1525_v50 = vpop.permute.xlu0 %1524  ;;  %v3541_v21 = vpop.f32.mrb[12].mxu1  ;;  %v2530_v31 = vld [vmem:[#allocation3 + $0x90] sm:$0xff] }
 0x202   : > { %1596 = vst.msk [vmem:[#allocation3 + $0xc0] sm:$0xff] %vm727_vm4, %v1525_v50  ;;  %v1104_v7 = vpop.f32.mrb[13].mxu1  ;;  %v1527_v0 = vpop.permute.xlu1 %1526  ;;  %3656 = vmatprep.mubr.msk.f32.mxu0 %vm801_vm5, %v2530_v31 }
 0x203   : > { %1153 = vst.msk [vmem:[#allocation4 + $0xe8] sm:$0xff] %vm1123_vm6, %v3541_v21  ;;  %1152 = vst.msk [vmem:[#allocation4 + $0xe0] sm:$0xff] %vm1123_vm6, %v1104_v7 }
 0x204   : > { %1597 = vst.msk [vmem:[#allocation3 + $0xc8] sm:$0xff] %vm727_vm4, %v1527_v0  ;;  %v2094_v0 = vld [vmem:[#allocation2 + $0x1c8] sm:$0xff] }
 0x205   : > { %v2233_v18 = vpop.permute.xlu0 %2232  ;;  %v2531_v3 = vld [vmem:[#allocation3 + $0x98] sm:$0xff] }
 0x206   : > { %2308 = vst.msk [vmem:[#allocation3 + $0xa0] sm:$0xff] %vm534_vm3, %v2233_v18  ;;  %v2235_v33 = vpop.permute.xlu1 %2234  ;;  %3657 = vmatmul.mubr.msk.f32.gmra.mrb[34].mxu0 %vm801_vm5, %v2531_v3  ;;  %v2095_v18 = vld [vmem:[#allocation2 + $0x1d0] sm:$0xff] }
 0x207   : > { %2309 = vst.msk [vmem:[#allocation3 + $0xa8] sm:$0xff] %vm534_vm3, %v2235_v33 }
 0x209   : > { %v2425_v30 = vpop.permute.xlu0 %2424  ;;  %v3511_v35 = vpop.f32.mrb[8].mxu0  ;;  %v1628_v37 = vld [vmem:[#allocation3 + $0xc0] sm:$0xff] }
 0x20a   : > { %2500 = vst.msk [vmem:[#allocation3 + $0xa0] sm:$0xff] %vm727_vm4, %v2425_v30  ;;  %v1337_v26 = vpop.permute.xlu1 %1336  ;;  %v1004_v61 = vpop.f32.mrb[9].mxu0  ;;  %3599 = vmatprep.mubr.msk.f32.mxu1 %vm801_vm5, %v1628_v37 }
 0x20b   : > { %1133 = vst.msk [vmem:[#allocation4 + $0x48] sm:$0xff] %vm1123_vm6, %v3511_v35  ;;  %v1629_v19 = vld [vmem:[#allocation3 + $0xc8] sm:$0xff]  ;;  %1132 = vst.msk [vmem:[#allocation4 + $0x40] sm:$0xff] %vm1123_vm6, %v1004_v61 }
 0x20c   : > { %2120 = vst.msk [vmem:[#allocation3 + $0xc0] sm:$0xff] %vm189_vm0, %v4827_v24  ;;  %3600 = vmatmul.mubr.msk.f32.gmra.mrb[40].mxu1 %vm801_vm5, %v1629_v19  ;;  %2121 = vst.msk [vmem:[#allocation3 + $0xc8] sm:$0xff] %vm189_vm0, %v4841_v55  ;;  %v1972_v19 = vld [vmem:[#allocation4 + $0x28] sm:$0xff] }
 0x20d   : > { %1406 = vst.msk [vmem:[#allocation3 + $0xd0] sm:$0xff] %vm534_vm3, %v1337_v26  ;;  %v2427_v63 = vpop.permute.xlu0 %2426 }
 0x20e   : > { %2501 = vst.msk [vmem:[#allocation3 + $0xa8] sm:$0xff] %vm727_vm4, %v2427_v63  ;;  %v1339_v29 = vpop.permute.xlu1 %1338 }
 0x20f   : > { %1407 = vst.msk [vmem:[#allocation3 + $0xd8] sm:$0xff] %vm534_vm3, %v1339_v29 }
 0x211   : > { %v1529_v40 = vpop.permute.xlu0 %1528  ;;  %v3544_v2 = vpop.f32.mrb[14].mxu1  ;;  %v2532_v44 = vld [vmem:[#allocation3 + $0xa0] sm:$0xff] }
 0x212   : > { %1598 = vst.msk [vmem:[#allocation3 + $0xd0] sm:$0xff] %vm727_vm4, %v1529_v40  ;;  %v1114_v24 = vpop.f32.mrb[15].mxu1  ;;  %v1531_v45 = vpop.permute.xlu1 %1530  ;;  %3659 = vmatprep.mubr.msk.f32.mxu0 %vm801_vm5, %v2532_v44  ;;  %v1971_v40 = vld [vmem:[#allocation4 + $0x20] sm:$0xff] }
 0x213   : > { %1155 = vst.msk [vmem:[#allocation4 + $0xf8] sm:$0xff] %vm1123_vm6, %v3544_v2  ;;  %1154 = vst.msk [vmem:[#allocation4 + $0xf0] sm:$0xff] %vm1123_vm6, %v1114_v24 }
 0x214   : > { %1599 = vst.msk [vmem:[#allocation3 + $0xd8] sm:$0xff] %vm727_vm4, %v1531_v45 }
 0x215   : > { %v2237_v55 = vpop.permute.xlu0 %2236  ;;  %v2533_v48 = vld [vmem:[#allocation3 + $0xa8] sm:$0xff] }
 0x216   : > { %2310 = vst.msk [vmem:[#allocation3 + $0xb0] sm:$0xff] %vm534_vm3, %v2237_v55  ;;  %v2239_v11 = vpop.permute.xlu1 %2238  ;;  %v3514_v16 = vpop.f32.mrb[10].mxu0  ;;  %3660 = vmatmul.mubr.msk.f32.gmra.mrb[36].mxu0 %vm801_vm5, %v2533_v48 }
 0x217   : > { %2311 = vst.msk [vmem:[#allocation3 + $0xb8] sm:$0xff] %vm534_vm3, %v2239_v11  ;;  %v1014_v36 = vpop.f32.mrb[11].mxu0 }
 0x218   : > { %1135 = vst.msk [vmem:[#allocation4 + $0x58] sm:$0xff] %vm1123_vm6, %v3514_v16  ;;  %1134 = vst.msk [vmem:[#allocation4 + $0x50] sm:$0xff] %vm1123_vm6, %v1014_v36 }
 0x219   : > { %v2429_v53 = vpop.permute.xlu0 %2428  ;;  %v1630_v42 = vld [vmem:[#allocation3 + $0xd0] sm:$0xff] }
 0x21a   : > { %2502 = vst.msk [vmem:[#allocation3 + $0xb0] sm:$0xff] %vm727_vm4, %v2429_v53  ;;  %v1341_v58 = vpop.permute.xlu1 %1340  ;;  %3602 = vmatprep.mubr.msk.f32.mxu1 %vm801_vm5, %v1630_v42 }
 0x21b   : > { %v1631_v15 = vld [vmem:[#allocation3 + $0xd8] sm:$0xff]  ;;  %2122 = vst.msk [vmem:[#allocation3 + $0xd0] sm:$0xff] %vm189_vm0, %v4859_v1 }
 0x21c   : > { %1408 = vst.msk [vmem:[#allocation3 + $0xe0] sm:$0xff] %vm534_vm3, %v1341_v58  ;;  %3603 = vmatmul.mubr.msk.f32.gmra.mrb[42].mxu1 %vm801_vm5, %v1631_v15 }
 0x21d   : > { %2123 = vst.msk [vmem:[#allocation3 + $0xd8] sm:$0xff] %vm189_vm0, %v4872_v5  ;;  %v2431_v59 = vpop.permute.xlu0 %2430 }
 0x21e   : > { %2503 = vst.msk [vmem:[#allocation3 + $0xb8] sm:$0xff] %vm727_vm4, %v2431_v59  ;;  %v1343_v41 = vpop.permute.xlu1 %1342 }
 0x21f   : > { %1409 = vst.msk [vmem:[#allocation3 + $0xe8] sm:$0xff] %vm534_vm3, %v1343_v41 }
 0x221   : > { %v1533_v60 = vpop.permute.xlu0 %1532  ;;  %v3565_v52 = vpop.f32.mrb[16].mxu1  ;;  %v2534_v32 = vld [vmem:[#allocation3 + $0xb0] sm:$0xff] }
 0x222   : > { %1600 = vst.msk [vmem:[#allocation3 + $0xe0] sm:$0xff] %vm727_vm4, %v1533_v60  ;;  %v2000_v1 = vadd.f32 %v3565_v52, %v1968_v62  ;;  %v1535_v6 = vpop.permute.xlu1 %1534  ;;  %v1808_v9 = vpop.f32.mrb[17].mxu1  ;;  %3662 = vmatprep.mubr.msk.f32.mxu0 %vm801_vm5, %v2534_v32  ;;  %v1974_v32 = vld [vmem:[#allocation4 + $0x38] sm:$0xff] }
 0x223   : > { %1601 = vst.msk [vmem:[#allocation3 + $0xe8] sm:$0xff] %vm727_vm4, %v1535_v6  ;;  %v1999_v5 = vadd.f32 %v1967_v10, %v1808_v9  ;;  %v1973_v9 = vld [vmem:[#allocation4 + $0x30] sm:$0xff] }
 0x224   : > { %2032 = vst.msk [vmem:[#allocation4 + $0x8] sm:$0xff] %vm1123_vm6, %v2000_v1 }
 0x225   : > { %2031 = vst.msk [vmem:[#allocation4] sm:$0xff] %vm1123_vm6, %v1999_v5  ;;  %v2241_v34 = vpop.permute.xlu0 %2240  ;;  %v2535_v13 = vld [vmem:[#allocation3 + $0xb8] sm:$0xff]  ;;  %v5093_v5 = vld [vmem:[%s5306_s2] ss:$0 sm:$0xff] }
 0x226   : > { %2312 = vst.msk [vmem:[#allocation3 + $0xc0] sm:$0xff] %vm534_vm3, %v2241_v34  ;;  %v2243_v14 = vpop.permute.xlu1 %2242  ;;  %3663 = vmatmul.mubr.msk.f32.gmra.mrb[38].mxu0 %vm801_vm5, %v2535_v13 }
 0x227   : > { %v3517_v38 = vpop.f32.mrb[12].mxu0  ;;  %2313 = vst.msk [vmem:[#allocation3 + $0xc8] sm:$0xff] %vm534_vm3, %v2243_v14 }
 0x228   : > { %1137 = vst.msk [vmem:[#allocation4 + $0x68] sm:$0xff] %vm1123_vm6, %v3517_v38  ;;  %v1024_v57 = vpop.f32.mrb[13].mxu0 }
 0x229   : > { %1136 = vst.msk [vmem:[#allocation4 + $0x60] sm:$0xff] %vm1123_vm6, %v1024_v57  ;;  %v2433_v39 = vpop.permute.xlu0 %2432  ;;  %v1632_v22 = vld [vmem:[#allocation3 + $0xe0] sm:$0xff] }
 0x22a   : > { %2504 = vst.msk [vmem:[#allocation3 + $0xc0] sm:$0xff] %vm727_vm4, %v2433_v39  ;;  %v1345_v56 = vpop.permute.xlu1 %1344  ;;  %3605 = vmatprep.mubr.msk.f32.mxu1 %vm801_vm5, %v1632_v22  ;;  %v1633_v43 = vld [vmem:[#allocation3 + $0xe8] sm:$0xff] }
 0x22b   : > { %2124 = vst.msk [vmem:[#allocation3 + $0xe0] sm:$0xff] %vm189_vm0, %v2092_v47  ;;  %3606 = vmatmul.mubr.msk.f32.gmra.mrb[44].mxu1 %vm801_vm5, %v1633_v43  ;;  %2125 = vst.msk [vmem:[#allocation3 + $0xe8] sm:$0xff] %vm189_vm0, %v2093_v20  ;;  %v2876_v53 = vld [vmem:[#allocation4 + $0x8] sm:$0xff] }
 0x22c   : > { %1410 = vst.msk [vmem:[#allocation3 + $0xf0] sm:$0xff] %vm534_vm3, %v1345_v56  ;;  %v2875_v41 = vld [vmem:[#allocation4] sm:$0xff] }
 0x22d   : > { %v2435_v12 = vpop.permute.xlu0 %2434 }
 0x22e   : > { %2505 = vst.msk [vmem:[#allocation3 + $0xc8] sm:$0xff] %vm727_vm4, %v2435_v12  ;;  %v1347_v8 = vpop.permute.xlu1 %1346 }
 0x22f   : > { %1411 = vst.msk [vmem:[#allocation3 + $0xf8] sm:$0xff] %vm534_vm3, %v1347_v8 }
 0x231   : > { %v1537_v23 = vpop.permute.xlu0 %1536  ;;  %v3568_v54 = vpop.f32.mrb[18].mxu1  ;;  %v2536_v46 = vld [vmem:[#allocation3 + $0xc0] sm:$0xff] }
 0x232   : > { %1602 = vst.msk [vmem:[#allocation3 + $0xf0] sm:$0xff] %vm727_vm4, %v1537_v23  ;;  %v2002_v49 = vadd.f32 %v3568_v54, %v1970_v4  ;;  %v1539_v25 = vpop.permute.xlu1 %1538  ;;  %v1818_v17 = vpop.f32.mrb[19].mxu1  ;;  %3665 = vmatprep.mubr.msk.f32.mxu0 %vm801_vm5, %v2536_v46 }
 0x233   : > { %1603 = vst.msk [vmem:[#allocation3 + $0xf8] sm:$0xff] %vm727_vm4, %v1539_v25  ;;  %v2001_v27 = vadd.f32 %v1969_v51, %v1818_v17  ;;  %v1975_v51 = vld [vmem:[#allocation4 + $0x40] sm:$0xff] }
 0x234   : > { %2034 = vst.msk [vmem:[#allocation4 + $0x18] sm:$0xff] %vm1123_vm6, %v2002_v49  ;;  %v1976_v49 = vld [vmem:[#allocation4 + $0x48] sm:$0xff] }
 0x235   : > { %2033 = vst.msk [vmem:[#allocation4 + $0x10] sm:$0xff] %vm1123_vm6, %v2001_v27  ;;  %v2245_v28 = vpop.permute.xlu0 %2244  ;;  %v2537_v50 = vld [vmem:[#allocation3 + $0xc8] sm:$0xff] }
 0x236   : > { %2314 = vst.msk [vmem:[#allocation3 + $0xd0] sm:$0xff] %vm534_vm3, %v2245_v28  ;;  %v2247_v21 = vpop.permute.xlu1 %2246  ;;  %3666 = vmatmul.mubr.msk.f32.gmra.mrb[40].mxu0 %vm801_vm5, %v2537_v50 }
 0x237   : > { %v3520_v31 = vpop.f32.mrb[14].mxu0  ;;  %2315 = vst.msk [vmem:[#allocation3 + $0xd8] sm:$0xff] %vm534_vm3, %v2247_v21 }
 0x238   : > { %1139 = vst.msk [vmem:[#allocation4 + $0x78] sm:$0xff] %vm1123_vm6, %v3520_v31  ;;  %v1034_v7 = vpop.f32.mrb[15].mxu0 }
 0x239   : > { %1138 = vst.msk [vmem:[#allocation4 + $0x70] sm:$0xff] %vm1123_vm6, %v1034_v7  ;;  %v2437_v3 = vpop.permute.xlu0 %2436  ;;  %v1634_v33 = vld [vmem:[#allocation3 + $0xf0] sm:$0xff] }
 0x23a   : > { %2506 = vst.msk [vmem:[#allocation3 + $0xd0] sm:$0xff] %vm727_vm4, %v2437_v3  ;;  %v2439_v30 = vpop.permute.xlu1 %2438  ;;  %3608 = vmatprep.mubr.msk.f32.mxu1 %vm801_vm5, %v1634_v33  ;;  %v1635_v35 = vld [vmem:[#allocation3 + $0xf8] sm:$0xff] }
 0x23b   : > { %2126 = vst.msk [vmem:[#allocation3 + $0xf0] sm:$0xff] %vm189_vm0, %v2094_v0  ;;  %3609 = vmatmul.mubr.msk.f32.gmra.mrb[46].mxu1 %vm801_vm5, %v1635_v35  ;;  %2127 = vst.msk [vmem:[#allocation3 + $0xf8] sm:$0xff] %vm189_vm0, %v2095_v18  ;;  %v2878_v12 = vld [vmem:[#allocation4 + $0x18] sm:$0xff] }
 0x23c   : > { %2507 = vst.msk [vmem:[#allocation3 + $0xd8] sm:$0xff] %vm727_vm4, %v2439_v30  ;;  %v2877_v54 = vld [vmem:[#allocation4 + $0x10] sm:$0xff] }
 0x23d   : > { %v2249_v37 = vpop.permute.xlu0 %2248 }
 0x23e   : > { %2316 = vst.msk [vmem:[#allocation3 + $0xe0] sm:$0xff] %vm534_vm3, %v2249_v37  ;;  %v2251_v26 = vpop.permute.xlu1 %2250 }
 0x23f   : > { %v3571_v61 = vpop.f32.mrb[20].mxu1  ;;  %2317 = vst.msk [vmem:[#allocation3 + $0xe8] sm:$0xff] %vm534_vm3, %v2251_v26 }
 0x240   : > { %v2004_v63 = vadd.f32 %v3571_v61, %v1972_v19  ;;  %v1828_v29 = vpop.f32.mrb[21].mxu1 }
 0x241   : > { %v2003_v2 = vadd.f32 %v1971_v40, %v1828_v29  ;;  %v2441_v44 = vpop.permute.xlu0 %2440  ;;  %v2538_v24 = vld [vmem:[#allocation3 + $0xd0] sm:$0xff] }
 0x242   : > { %2036 = vst.msk [vmem:[#allocation4 + $0x28] sm:$0xff] %vm1123_vm6, %v2004_v63  ;;  %v2443_v45 = vpop.permute.xlu1 %2442  ;;  %3668 = vmatprep.mubr.msk.f32.mxu0 %vm801_vm5, %v2538_v24  ;;  %v1978_v63 = vld [vmem:[#allocation4 + $0x58] sm:$0xff] }
 0x243   : > { %2035 = vst.msk [vmem:[#allocation4 + $0x20] sm:$0xff] %vm1123_vm6, %v2003_v2  ;;  %v2539_v55 = vld [vmem:[#allocation3 + $0xd8] sm:$0xff]  ;;  %v1977_v2 = vld [vmem:[#allocation4 + $0x50] sm:$0xff] }
 0x244   : > { %2508 = vst.msk [vmem:[#allocation3 + $0xe0] sm:$0xff] %vm727_vm4, %v2441_v44  ;;  %2509 = vst.msk [vmem:[#allocation3 + $0xe8] sm:$0xff] %vm727_vm4, %v2443_v45  ;;  %3669 = vmatmul.mubr.msk.f32.gmra.mrb[42].mxu0 %vm801_vm5, %v2539_v55 }
 0x245   : > { %v2253_v48 = vpop.permute.xlu0 %2252 }
 0x246   : > { %2318 = vst.msk [vmem:[#allocation3 + $0xf0] sm:$0xff] %vm534_vm3, %v2253_v48  ;;  %v2255_v11 = vpop.permute.xlu1 %2254 }
 0x247   : > { %2319 = vst.msk [vmem:[#allocation3 + $0xf8] sm:$0xff] %vm534_vm3, %v2255_v11 }
 0x249   : > { %v2445_v16 = vpop.permute.xlu0 %2444  ;;  %v3631_v36 = vpop.f32.mrb[16].mxu0  ;;  %v2880_v30 = vld [vmem:[#allocation4 + $0x28] sm:$0xff] }
 0x24a   : > { %2510 = vst.msk [vmem:[#allocation3 + $0xf0] sm:$0xff] %vm727_vm4, %v2445_v16  ;;  %v2908_v58 = vadd.f32 %v3631_v36, %v2876_v53  ;;  %v2447_v15 = vpop.permute.xlu1 %2446  ;;  %v2716_v59 = vpop.f32.mrb[17].mxu0  ;;  %v2879_v26 = vld [vmem:[#allocation4 + $0x20] sm:$0xff] }
 0x24b   : > { %v2540_v42 = vld [vmem:[#allocation3 + $0xe0] sm:$0xff]  ;;  %v2541_v60 = vld [vmem:[#allocation3 + $0xe8] sm:$0xff]  ;;  %2511 = vst.msk [vmem:[#allocation3 + $0xf8] sm:$0xff] %vm727_vm4, %v2447_v15  ;;  %v2907_v52 = vadd.f32 %v2875_v41, %v2716_v59 }
 0x24c   : > { %3671 = vmatprep.mubr.msk.f32.mxu0 %vm801_vm5, %v2540_v42  ;;  %2940 = vst.msk [vmem:[#allocation4 + $0x8] sm:$0xff] %vm1123_vm6, %v2908_v58 }
 0x24d   : > { %3672 = vmatmul.mubr.msk.f32.gmra.mrb[44].mxu0 %vm801_vm5, %v2541_v60  ;;  %2939 = vst.msk [vmem:[#allocation4] sm:$0xff] %vm1123_vm6, %v2907_v52 }
 0x24e   : > { %v3574_v62 = vpop.f32.mrb[22].mxu1 }
 0x24f   : > { %v2006_v1 = vadd.f32 %v3574_v62, %v1974_v32  ;;  %v1838_v6 = vpop.f32.mrb[23].mxu1  ;;  %v1980_v62 = vld [vmem:[#allocation4 + $0x68] sm:$0xff] }
 0x250   : > { %v2005_v10 = vadd.f32 %v1973_v9, %v1838_v6  ;;  %v1979_v6 = vld [vmem:[#allocation4 + $0x60] sm:$0xff] }
 0x251   : > { %2038 = vst.msk [vmem:[#allocation4 + $0x38] sm:$0xff] %vm1123_vm6, %v2006_v1  ;;  %v2542_v34 = vld [vmem:[#allocation3 + $0xf0] sm:$0xff] }
 0x252   : > { %2037 = vst.msk [vmem:[#allocation4 + $0x30] sm:$0xff] %vm1123_vm6, %v2005_v10  ;;  %3674 = vmatprep.mubr.msk.f32.mxu0 %vm801_vm5, %v2542_v34  ;;  %v2543_v13 = vld [vmem:[#allocation3 + $0xf8] sm:$0xff] }
 0x253   : > { %v2972_v14 = vld [vmem:[#allocation4 + $0x8] sm:$0xff]  ;;  %3675 = vmatmul.mubr.msk.f32.gmra.mrb[46].mxu0 %vm801_vm5, %v2543_v13 }
 0x254   : > { %v3011_v38 = vadd.f32 %v5093_v5, %v2972_v14  ;;  %v2971_v57 = vld [vmem:[#allocation4] sm:$0xff] }
 0x255   : > { %v3010_v47 = vadd.f32 %v5093_v5, %v2971_v57 }
 0x256   : > { %v3043_v20 = vmul.f32 0.1, %v3011_v38 }
 0x257   : > { %v3042_v39 = vmul.f32 0.1, %v3010_v47 }
 0x258   : > { %v3075_v22 = vmax.f32 %v3011_v38, %v3043_v20  ;;  %v2882_v58 = vld [vmem:[#allocation4 + $0x38] sm:$0xff] }
 0x259   : > { %v3074_v56 = vmax.f32 %v3010_v47, %v3042_v39  ;;  %v3634_v43 = vpop.f32.mrb[18].mxu0  ;;  %v2881_v41 = vld [vmem:[#allocation4 + $0x30] sm:$0xff] }
 0x25a   : > { %3107 = vst.msk [vmem:[%s5103_s4 + $0x8] sm:$0xff] %vm1123_vm6, %v3075_v22  ;;  %v2910_v8 = vadd.f32 %v3634_v43, %v2878_v12  ;;  %v2726_v23 = vpop.f32.mrb[19].mxu0 }
 0x25b   : > { %3106 = vst.msk [vmem:[%s5103_s4] sm:$0xff] %vm1123_vm6, %v3074_v56  ;;  %v2909_v4 = vadd.f32 %v2877_v54, %v2726_v23  ;;  %v1982_v54 = vld [vmem:[#allocation4 + $0x78] sm:$0xff] }
 0x25c   : > { %2942 = vst.msk [vmem:[#allocation4 + $0x18] sm:$0xff] %vm1123_vm6, %v2910_v8 }
 0x25d   : > { %2941 = vst.msk [vmem:[#allocation4 + $0x10] sm:$0xff] %vm1123_vm6, %v2909_v4 }
 0x25e   : > { %v3577_v46 = vpop.f32.mrb[24].mxu1 }
 0x25f   : > { %v2008_v25 = vadd.f32 %v3577_v46, %v1976_v49  ;;  %v1848_v17 = vpop.f32.mrb[25].mxu1  ;;  %v1981_v49 = vld [vmem:[#allocation4 + $0x70] sm:$0xff] }
 0x260   : > { %v2007_v27 = vadd.f32 %v1975_v51, %v1848_v17 }
 0x261   : > { %2040 = vst.msk [vmem:[#allocation4 + $0x48] sm:$0xff] %vm1123_vm6, %v2008_v25 }
 0x262   : > { %2039 = vst.msk [vmem:[#allocation4 + $0x40] sm:$0xff] %vm1123_vm6, %v2007_v27 }
 0x263   : > { %v2974_v28 = vld [vmem:[#allocation4 + $0x18] sm:$0xff] }
 0x264   : > { %v3013_v50 = vadd.f32 %v5093_v5, %v2974_v28  ;;  %v2973_v21 = vld [vmem:[#allocation4 + $0x10] sm:$0xff] }
 0x265   : > { %v3012_v31 = vadd.f32 %v5093_v5, %v2973_v21 }
 0x266   : > { %v3045_v7 = vmul.f32 0.1, %v3013_v50 }
 0x267   : > { %v3044_v0 = vmul.f32 0.1, %v3012_v31 }
 0x268   : > { %v3077_v18 = vmax.f32 %v3013_v50, %v3045_v7  ;;  %v2884_v22 = vld [vmem:[#allocation4 + $0x48] sm:$0xff] }
 0x269   : > { %v3076_v3 = vmax.f32 %v3012_v31, %v3044_v0  ;;  %v3637_v33 = vpop.f32.mrb[20].mxu0  ;;  %v2883_v12 = vld [vmem:[#allocation4 + $0x40] sm:$0xff] }
 0x26a   : > { %3109 = vst.msk [vmem:[%s5103_s4 + $0x18] sm:$0xff] %vm1123_vm6, %v3077_v18  ;;  %v2912_v35 = vadd.f32 %v3637_v33, %v2880_v30  ;;  %v2736_v37 = vpop.f32.mrb[21].mxu0 }
 0x26b   : > { %3108 = vst.msk [vmem:[%s5103_s4 + $0x10] sm:$0xff] %vm1123_vm6, %v3076_v3  ;;  %v2911_v61 = vadd.f32 %v2879_v26, %v2736_v37  ;;  %v1984_v26 = vld [vmem:[#allocation4 + $0x88] sm:$0xff] }
 0x26c   : > { %2944 = vst.msk [vmem:[#allocation4 + $0x28] sm:$0xff] %vm1123_vm6, %v2912_v35 }
 0x26d   : > { %2943 = vst.msk [vmem:[#allocation4 + $0x20] sm:$0xff] %vm1123_vm6, %v2911_v61 }
 0x26e   : > { %v3580_v19 = vpop.f32.mrb[26].mxu1 }
 0x26f   : > { %v2010_v29 = vadd.f32 %v3580_v19, %v1978_v63  ;;  %v1858_v40 = vpop.f32.mrb[27].mxu1  ;;  %v1983_v63 = vld [vmem:[#allocation4 + $0x80] sm:$0xff] }
 0x270   : > { %v2009_v44 = vadd.f32 %v1977_v2, %v1858_v40 }
 0x271   : > { %2042 = vst.msk [vmem:[#allocation4 + $0x58] sm:$0xff] %vm1123_vm6, %v2010_v29 }
 0x272   : > { %2041 = vst.msk [vmem:[#allocation4 + $0x50] sm:$0xff] %vm1123_vm6, %v2009_v44 }
 0x273   : > { %v2976_v24 = vld [vmem:[#allocation4 + $0x28] sm:$0xff] }
 0x274   : > { %v3015_v45 = vadd.f32 %v5093_v5, %v2976_v24  ;;  %v2975_v55 = vld [vmem:[#allocation4 + $0x20] sm:$0xff] }
 0x275   : > { %v3014_v48 = vadd.f32 %v5093_v5, %v2975_v55 }
 0x276   : > { %v3047_v11 = vmul.f32 0.1, %v3015_v45 }
 0x277   : > { %v3046_v16 = vmul.f32 0.1, %v3014_v48 }
 0x278   : > { %v3079_v36 = vmax.f32 %v3015_v45, %v3047_v11  ;;  %v2886_v18 = vld [vmem:[#allocation4 + $0x58] sm:$0xff] }
 0x279   : > { %v3078_v53 = vmax.f32 %v3014_v48, %v3046_v16  ;;  %v3640_v42 = vpop.f32.mrb[22].mxu0  ;;  %v2885_v30 = vld [vmem:[#allocation4 + $0x50] sm:$0xff] }
 0x27a   : > { %3111 = vst.msk [vmem:[%s5103_s4 + $0x28] sm:$0xff] %vm1123_vm6, %v3079_v36  ;;  %v2914_v15 = vadd.f32 %v3640_v42, %v2882_v58  ;;  %v2746_v59 = vpop.f32.mrb[23].mxu0 }
 0x27b   : > { %3110 = vst.msk [vmem:[%s5103_s4 + $0x20] sm:$0xff] %vm1123_vm6, %v3078_v53  ;;  %v2913_v60 = vadd.f32 %v2881_v41, %v2746_v59  ;;  %v1986_v41 = vld [vmem:[#allocation4 + $0x98] sm:$0xff] }
 0x27c   : > { %2946 = vst.msk [vmem:[#allocation4 + $0x38] sm:$0xff] %vm1123_vm6, %v2914_v15 }
 0x27d   : > { %2945 = vst.msk [vmem:[#allocation4 + $0x30] sm:$0xff] %vm1123_vm6, %v2913_v60 }
 0x27e   : > { %v3583_v52 = vpop.f32.mrb[28].mxu1 }
 0x27f   : > { %v2012_v32 = vadd.f32 %v3583_v52, %v1980_v62  ;;  %v1868_v1 = vpop.f32.mrb[29].mxu1  ;;  %v1985_v62 = vld [vmem:[#allocation4 + $0x90] sm:$0xff] }
 0x280   : > { %v2011_v9 = vadd.f32 %v1979_v6, %v1868_v1 }
 0x281   : > { %2044 = vst.msk [vmem:[#allocation4 + $0x68] sm:$0xff] %vm1123_vm6, %v2012_v32 }
 0x282   : > { %2043 = vst.msk [vmem:[#allocation4 + $0x60] sm:$0xff] %vm1123_vm6, %v2011_v9 }
 0x283   : > { %v2978_v10 = vld [vmem:[#allocation4 + $0x38] sm:$0xff] }
 0x284   : > { %v3017_v34 = vadd.f32 %v5093_v5, %v2978_v10  ;;  %v2977_v13 = vld [vmem:[#allocation4 + $0x30] sm:$0xff] }
 0x285   : > { %v3016_v14 = vadd.f32 %v5093_v5, %v2977_v13 }
 0x286   : > { %v3049_v38 = vmul.f32 0.1, %v3017_v34 }
 0x287   : > { %v3048_v57 = vmul.f32 0.1, %v3016_v14 }
 0x288   : > { %v3081_v47 = vmax.f32 %v3017_v34, %v3049_v38  ;;  %v2888_v36 = vld [vmem:[#allocation4 + $0x68] sm:$0xff] }
 0x289   : > { %v3080_v20 = vmax.f32 %v3016_v14, %v3048_v57  ;;  %v3643_v39 = vpop.f32.mrb[24].mxu0  ;;  %v2887_v58 = vld [vmem:[#allocation4 + $0x60] sm:$0xff] }
 0x28a   : > { %3113 = vst.msk [vmem:[%s5103_s4 + $0x38] sm:$0xff] %vm1123_vm6, %v3081_v47  ;;  %v2916_v56 = vadd.f32 %v3643_v39, %v2884_v22  ;;  %v2756_v43 = vpop.f32.mrb[25].mxu0 }
 0x28b   : > { %3112 = vst.msk [vmem:[%s5103_s4 + $0x30] sm:$0xff] %vm1123_vm6, %v3080_v20  ;;  %v2915_v8 = vadd.f32 %v2883_v12, %v2756_v43  ;;  %v1988_v12 = vld [vmem:[#allocation4 + $0xa8] sm:$0xff] }
 0x28c   : > { %2948 = vst.msk [vmem:[#allocation4 + $0x48] sm:$0xff] %vm1123_vm6, %v2916_v56 }
 0x28d   : > { %2947 = vst.msk [vmem:[#allocation4 + $0x40] sm:$0xff] %vm1123_vm6, %v2915_v8 }
 0x28e   : > { %v3586_v23 = vpop.f32.mrb[30].mxu1 }
 0x28f   : > { %v2014_v4 = vadd.f32 %v3586_v23, %v1982_v54  ;;  %v1878_v46 = vpop.f32.mrb[31].mxu1  ;;  %v1987_v54 = vld [vmem:[#allocation4 + $0xa0] sm:$0xff] }
 0x290   : > { %v2013_v25 = vadd.f32 %v1981_v49, %v1878_v46 }
 0x291   : > { %2046 = vst.msk [vmem:[#allocation4 + $0x78] sm:$0xff] %vm1123_vm6, %v2014_v4 }
 0x292   : > { %2045 = vst.msk [vmem:[#allocation4 + $0x70] sm:$0xff] %vm1123_vm6, %v2013_v25 }
 0x293   : > { %v2980_v17 = vld [vmem:[#allocation4 + $0x48] sm:$0xff] }
 0x294   : > { %v3019_v51 = vadd.f32 %v5093_v5, %v2980_v17  ;;  %v2979_v27 = vld [vmem:[#allocation4 + $0x40] sm:$0xff] }
 0x295   : > { %v3018_v28 = vadd.f32 %v5093_v5, %v2979_v27 }
 0x296   : > { %v3051_v50 = vmul.f32 0.1, %v3019_v51 }
 0x297   : > { %v3050_v21 = vmul.f32 0.1, %v3018_v28 }
 0x298   : > { %v3083_v31 = vmax.f32 %v3019_v51, %v3051_v50  ;;  %v2890_v47 = vld [vmem:[#allocation4 + $0x78] sm:$0xff] }
 0x299   : > { %v3082_v7 = vmax.f32 %v3018_v28, %v3050_v21  ;;  %v3646_v0 = vpop.f32.mrb[26].mxu0  ;;  %v2889_v22 = vld [vmem:[#allocation4 + $0x70] sm:$0xff] }
 0x29a   : > { %3115 = vst.msk [vmem:[%s5103_s4 + $0x48] sm:$0xff] %vm1123_vm6, %v3083_v31  ;;  %v2918_v3 = vadd.f32 %v3646_v0, %v2886_v18  ;;  %v2766_v33 = vpop.f32.mrb[27].mxu0 }
 0x29b   : > { %3114 = vst.msk [vmem:[%s5103_s4 + $0x40] sm:$0xff] %vm1123_vm6, %v3082_v7  ;;  %v2917_v35 = vadd.f32 %v2885_v30, %v2766_v33  ;;  %v1990_v30 = vld [vmem:[#allocation4 + $0xb8] sm:$0xff] }
 0x29c   : > { %2950 = vst.msk [vmem:[#allocation4 + $0x58] sm:$0xff] %vm1123_vm6, %v2918_v3 }
 0x29d   : > { %2949 = vst.msk [vmem:[#allocation4 + $0x50] sm:$0xff] %vm1123_vm6, %v2917_v35 }
 0x29f   : > { %v3589_v37 = vpop.f32.mrb[32].mxu1 }
 0x2a0   : > { %v2016_v61 = vadd.f32 %v3589_v37, %v1984_v26  ;;  %v1888_v19 = vpop.f32.mrb[33].mxu1  ;;  %v1989_v26 = vld [vmem:[#allocation4 + $0xb0] sm:$0xff] }
 0x2a1   : > { %v2015_v29 = vadd.f32 %v1983_v63, %v1888_v19 }
 0x2a2   : > { %2048 = vst.msk [vmem:[#allocation4 + $0x88] sm:$0xff] %vm1123_vm6, %v2016_v61 }
 0x2a3   : > { %2047 = vst.msk [vmem:[#allocation4 + $0x80] sm:$0xff] %vm1123_vm6, %v2015_v29  ;;  %v2982_v40 = vld [vmem:[#allocation4 + $0x58] sm:$0xff] }
 0x2a4   : > { %v3021_v2 = vadd.f32 %v5093_v5, %v2982_v40  ;;  %v2981_v44 = vld [vmem:[#allocation4 + $0x50] sm:$0xff] }
 0x2a5   : > { %v3020_v24 = vadd.f32 %v5093_v5, %v2981_v44 }
 0x2a6   : > { %v3053_v45 = vmul.f32 0.1, %v3021_v2 }
 0x2a7   : > { %v3052_v55 = vmul.f32 0.1, %v3020_v24 }
 0x2a8   : > { %v3085_v48 = vmax.f32 %v3021_v2, %v3053_v45 }
 0x2a9   : > { %v3084_v11 = vmax.f32 %v3020_v24, %v3052_v55  ;;  %v3649_v16 = vpop.f32.mrb[28].mxu0  ;;  %v2892_v31 = vld [vmem:[#allocation4 + $0x88] sm:$0xff] }
 0x2aa   : > { %3117 = vst.msk [vmem:[%s5103_s4 + $0x58] sm:$0xff] %vm1123_vm6, %v3085_v48  ;;  %v2920_v53 = vadd.f32 %v3649_v16, %v2888_v36  ;;  %v2776_v42 = vpop.f32.mrb[29].mxu0  ;;  %v2891_v18 = vld [vmem:[#allocation4 + $0x80] sm:$0xff] }
 0x2ab   : > { %3116 = vst.msk [vmem:[%s5103_s4 + $0x50] sm:$0xff] %vm1123_vm6, %v3084_v11  ;;  %v2919_v15 = vadd.f32 %v2887_v58, %v2776_v42  ;;  %v1992_v58 = vld [vmem:[#allocation4 + $0xc8] sm:$0xff] }
 0x2ac   : > { %2952 = vst.msk [vmem:[#allocation4 + $0x68] sm:$0xff] %vm1123_vm6, %v2920_v53 }
 0x2ad   : > { %2951 = vst.msk [vmem:[#allocation4 + $0x60] sm:$0xff] %vm1123_vm6, %v2919_v15 }
 0x2af   : > { %v3592_v59 = vpop.f32.mrb[34].mxu1 }
 0x2b0   : > { %v2018_v60 = vadd.f32 %v3592_v59, %v1986_v41  ;;  %v1898_v52 = vpop.f32.mrb[35].mxu1  ;;  %v1991_v41 = vld [vmem:[#allocation4 + $0xc0] sm:$0xff] }
 0x2b1   : > { %v2017_v32 = vadd.f32 %v1985_v62, %v1898_v52 }
 0x2b2   : > { %2050 = vst.msk [vmem:[#allocation4 + $0x98] sm:$0xff] %vm1123_vm6, %v2018_v60 }
 0x2b3   : > { %2049 = vst.msk [vmem:[#allocation4 + $0x90] sm:$0xff] %vm1123_vm6, %v2017_v32  ;;  %v2984_v1 = vld [vmem:[#allocation4 + $0x68] sm:$0xff] }
 0x2b4   : > { %v3023_v6 = vadd.f32 %v5093_v5, %v2984_v1  ;;  %v2983_v9 = vld [vmem:[#allocation4 + $0x60] sm:$0xff] }
 0x2b5   : > { %v3022_v10 = vadd.f32 %v5093_v5, %v2983_v9 }
 0x2b6   : > { %v3055_v34 = vmul.f32 0.1, %v3023_v6 }
 0x2b7   : > { %v3054_v13 = vmul.f32 0.1, %v3022_v10 }
 0x2b8   : > { %v3087_v14 = vmax.f32 %v3023_v6, %v3055_v34 }
 0x2b9   : > { %v3086_v38 = vmax.f32 %v3022_v10, %v3054_v13  ;;  %v3652_v57 = vpop.f32.mrb[30].mxu0  ;;  %v2894_v48 = vld [vmem:[#allocation4 + $0x98] sm:$0xff] }
 0x2ba   : > { %3119 = vst.msk [vmem:[%s5103_s4 + $0x68] sm:$0xff] %vm1123_vm6, %v3087_v14  ;;  %v2922_v20 = vadd.f32 %v3652_v57, %v2890_v47  ;;  %v2786_v39 = vpop.f32.mrb[31].mxu0  ;;  %v2893_v36 = vld [vmem:[#allocation4 + $0x90] sm:$0xff] }
 0x2bb   : > { %3118 = vst.msk [vmem:[%s5103_s4 + $0x60] sm:$0xff] %vm1123_vm6, %v3086_v38  ;;  %v2921_v56 = vadd.f32 %v2889_v22, %v2786_v39  ;;  %v1994_v22 = vld [vmem:[#allocation4 + $0xd8] sm:$0xff] }
 0x2bc   : > { %2954 = vst.msk [vmem:[#allocation4 + $0x78] sm:$0xff] %vm1123_vm6, %v2922_v20 }
 0x2bd   : > { %2953 = vst.msk [vmem:[#allocation4 + $0x70] sm:$0xff] %vm1123_vm6, %v2921_v56 }
 0x2bf   : > { %v3595_v43 = vpop.f32.mrb[36].mxu1 }
 0x2c0   : > { %v2020_v8 = vadd.f32 %v3595_v43, %v1988_v12  ;;  %v1908_v23 = vpop.f32.mrb[37].mxu1  ;;  %v1993_v12 = vld [vmem:[#allocation4 + $0xd0] sm:$0xff] }
 0x2c1   : > { %v2019_v4 = vadd.f32 %v1987_v54, %v1908_v23 }
 0x2c2   : > { %2052 = vst.msk [vmem:[#allocation4 + $0xa8] sm:$0xff] %vm1123_vm6, %v2020_v8 }
 0x2c3   : > { %2051 = vst.msk [vmem:[#allocation4 + $0xa0] sm:$0xff] %vm1123_vm6, %v2019_v4  ;;  %v2986_v46 = vld [vmem:[#allocation4 + $0x78] sm:$0xff] }
 0x2c4   : > { %v3025_v49 = vadd.f32 %v5093_v5, %v2986_v46  ;;  %v2985_v25 = vld [vmem:[#allocation4 + $0x70] sm:$0xff] }
 0x2c5   : > { %v3024_v17 = vadd.f32 %v5093_v5, %v2985_v25 }
 0x2c6   : > { %v3057_v51 = vmul.f32 0.1, %v3025_v49 }
 0x2c7   : > { %v3056_v27 = vmul.f32 0.1, %v3024_v17 }
 0x2c8   : > { %v3089_v28 = vmax.f32 %v3025_v49, %v3057_v51 }
 0x2c9   : > { %v3088_v50 = vmax.f32 %v3024_v17, %v3056_v27  ;;  %v3655_v21 = vpop.f32.mrb[32].mxu0  ;;  %v2896_v14 = vld [vmem:[#allocation4 + $0xa8] sm:$0xff] }
 0x2ca   : > { %3121 = vst.msk [vmem:[%s5103_s4 + $0x78] sm:$0xff] %vm1123_vm6, %v3089_v28  ;;  %v2924_v7 = vadd.f32 %v3655_v21, %v2892_v31  ;;  %v2796_v0 = vpop.f32.mrb[33].mxu0  ;;  %v2895_v47 = vld [vmem:[#allocation4 + $0xa0] sm:$0xff] }
 0x2cb   : > { %3120 = vst.msk [vmem:[%s5103_s4 + $0x70] sm:$0xff] %vm1123_vm6, %v3088_v50  ;;  %v2923_v3 = vadd.f32 %v2891_v18, %v2796_v0  ;;  %v1996_v18 = vld [vmem:[#allocation4 + $0xe8] sm:$0xff] }
 0x2cc   : > { %2956 = vst.msk [vmem:[#allocation4 + $0x88] sm:$0xff] %vm1123_vm6, %v2924_v7 }
 0x2cd   : > { %2955 = vst.msk [vmem:[#allocation4 + $0x80] sm:$0xff] %vm1123_vm6, %v2923_v3 }
 0x2cf   : > { %v3598_v33 = vpop.f32.mrb[38].mxu1 }
 0x2d0   : > { %v2022_v35 = vadd.f32 %v3598_v33, %v1990_v30  ;;  %v1918_v37 = vpop.f32.mrb[39].mxu1  ;;  %v1995_v30 = vld [vmem:[#allocation4 + $0xe0] sm:$0xff] }
 0x2d1   : > { %v2021_v61 = vadd.f32 %v1989_v26, %v1918_v37 }
 0x2d2   : > { %2054 = vst.msk [vmem:[#allocation4 + $0xb8] sm:$0xff] %vm1123_vm6, %v2022_v35 }
 0x2d3   : > { %2053 = vst.msk [vmem:[#allocation4 + $0xb0] sm:$0xff] %vm1123_vm6, %v2021_v61  ;;  %v2988_v19 = vld [vmem:[#allocation4 + $0x88] sm:$0xff] }
 0x2d4   : > { %v3027_v63 = vadd.f32 %v5093_v5, %v2988_v19  ;;  %v2987_v29 = vld [vmem:[#allocation4 + $0x80] sm:$0xff] }
 0x2d5   : > { %v3026_v40 = vadd.f32 %v5093_v5, %v2987_v29 }
 0x2d6   : > { %v3059_v2 = vmul.f32 0.1, %v3027_v63 }
 0x2d7   : > { %v3058_v44 = vmul.f32 0.1, %v3026_v40 }
 0x2d8   : > { %v3091_v24 = vmax.f32 %v3027_v63, %v3059_v2 }
 0x2d9   : > { %v3090_v45 = vmax.f32 %v3026_v40, %v3058_v44  ;;  %v3658_v55 = vpop.f32.mrb[34].mxu0  ;;  %v2898_v28 = vld [vmem:[#allocation4 + $0xb8] sm:$0xff] }
 0x2da   : > { %3123 = vst.msk [vmem:[%s5103_s4 + $0x88] sm:$0xff] %vm1123_vm6, %v3091_v24  ;;  %v2926_v11 = vadd.f32 %v3658_v55, %v2894_v48  ;;  %v2806_v16 = vpop.f32.mrb[35].mxu0  ;;  %v2897_v31 = vld [vmem:[#allocation4 + $0xb0] sm:$0xff] }
 0x2db   : > { %3122 = vst.msk [vmem:[%s5103_s4 + $0x80] sm:$0xff] %vm1123_vm6, %v3090_v45  ;;  %v2925_v53 = vadd.f32 %v2893_v36, %v2806_v16  ;;  %v1998_v36 = vld [vmem:[#allocation4 + $0xf8] sm:$0xff] }
 0x2dc   : > { %2958 = vst.msk [vmem:[#allocation4 + $0x98] sm:$0xff] %vm1123_vm6, %v2926_v11 }
 0x2dd   : > { %2957 = vst.msk [vmem:[#allocation4 + $0x90] sm:$0xff] %vm1123_vm6, %v2925_v53 }
 0x2df   : > { %v3601_v42 = vpop.f32.mrb[40].mxu1 }
 0x2e0   : > { %v2024_v15 = vadd.f32 %v3601_v42, %v1992_v58  ;;  %v1928_v59 = vpop.f32.mrb[41].mxu1  ;;  %v1997_v58 = vld [vmem:[#allocation4 + $0xf0] sm:$0xff] }
 0x2e1   : > { %v2023_v60 = vadd.f32 %v1991_v41, %v1928_v59 }
 0x2e2   : > { %2056 = vst.msk [vmem:[#allocation4 + $0xc8] sm:$0xff] %vm1123_vm6, %v2024_v15 }
 0x2e3   : > { %2055 = vst.msk [vmem:[#allocation4 + $0xc0] sm:$0xff] %vm1123_vm6, %v2023_v60  ;;  %v2990_v52 = vld [vmem:[#allocation4 + $0x98] sm:$0xff] }
 0x2e4   : > { %v3029_v62 = vadd.f32 %v5093_v5, %v2990_v52  ;;  %v2989_v32 = vld [vmem:[#allocation4 + $0x90] sm:$0xff] }
 0x2e5   : > { %v3028_v1 = vadd.f32 %v5093_v5, %v2989_v32 }
 0x2e6   : > { %v3061_v6 = vmul.f32 0.1, %v3029_v62 }
 0x2e7   : > { %v3060_v9 = vmul.f32 0.1, %v3028_v1 }
 0x2e8   : > { %v3093_v10 = vmax.f32 %v3029_v62, %v3061_v6 }
 0x2e9   : > { %v3092_v34 = vmax.f32 %v3028_v1, %v3060_v9  ;;  %v3661_v13 = vpop.f32.mrb[36].mxu0  ;;  %v2900_v24 = vld [vmem:[#allocation4 + $0xc8] sm:$0xff] }
 0x2ea   : > { %3125 = vst.msk [vmem:[%s5103_s4 + $0x98] sm:$0xff] %vm1123_vm6, %v3093_v10  ;;  %v2928_v38 = vadd.f32 %v3661_v13, %v2896_v14  ;;  %v2816_v57 = vpop.f32.mrb[37].mxu0  ;;  %v2899_v48 = vld [vmem:[#allocation4 + $0xc0] sm:$0xff] }
 0x2eb   : > { %3124 = vst.msk [vmem:[%s5103_s4 + $0x90] sm:$0xff] %vm1123_vm6, %v3092_v34  ;;  %v2927_v20 = vadd.f32 %v2895_v47, %v2816_v57 }
 0x2ec   : > { %2960 = vst.msk [vmem:[#allocation4 + $0xa8] sm:$0xff] %vm1123_vm6, %v2928_v38 }
 0x2ed   : > { %2959 = vst.msk [vmem:[#allocation4 + $0xa0] sm:$0xff] %vm1123_vm6, %v2927_v20 }
 0x2ef   : > { %v3604_v39 = vpop.f32.mrb[42].mxu1 }
 0x2f0   : > { %v2026_v56 = vadd.f32 %v3604_v39, %v1994_v22  ;;  %v1938_v43 = vpop.f32.mrb[43].mxu1 }
 0x2f1   : > { %v2025_v8 = vadd.f32 %v1993_v12, %v1938_v43 }
 0x2f2   : > { %2058 = vst.msk [vmem:[#allocation4 + $0xd8] sm:$0xff] %vm1123_vm6, %v2026_v56 }
 0x2f3   : > { %2057 = vst.msk [vmem:[#allocation4 + $0xd0] sm:$0xff] %vm1123_vm6, %v2025_v8  ;;  %v2992_v23 = vld [vmem:[#allocation4 + $0xa8] sm:$0xff] }
 0x2f4   : > { %v3031_v54 = vadd.f32 %v5093_v5, %v2992_v23  ;;  %v2991_v4 = vld [vmem:[#allocation4 + $0xa0] sm:$0xff] }
 0x2f5   : > { %v3030_v46 = vadd.f32 %v5093_v5, %v2991_v4 }
 0x2f6   : > { %v3063_v49 = vmul.f32 0.1, %v3031_v54 }
 0x2f7   : > { %v3062_v25 = vmul.f32 0.1, %v3030_v46 }
 0x2f8   : > { %v3095_v17 = vmax.f32 %v3031_v54, %v3063_v49 }
 0x2f9   : > { %v3094_v51 = vmax.f32 %v3030_v46, %v3062_v25  ;;  %v3664_v27 = vpop.f32.mrb[38].mxu0  ;;  %v2902_v1 = vld [vmem:[#allocation4 + $0xd8] sm:$0xff] }
 0x2fa   : > { %3127 = vst.msk [vmem:[%s5103_s4 + $0xa8] sm:$0xff] %vm1123_vm6, %v3095_v17  ;;  %v2930_v50 = vadd.f32 %v3664_v27, %v2898_v28  ;;  %v2826_v21 = vpop.f32.mrb[39].mxu0  ;;  %v2901_v34 = vld [vmem:[#allocation4 + $0xd0] sm:$0xff] }
 0x2fb   : > { %3126 = vst.msk [vmem:[%s5103_s4 + $0xa0] sm:$0xff] %vm1123_vm6, %v3094_v51  ;;  %v2929_v7 = vadd.f32 %v2897_v31, %v2826_v21 }
 0x2fc   : > { %2962 = vst.msk [vmem:[#allocation4 + $0xb8] sm:$0xff] %vm1123_vm6, %v2930_v50 }
 0x2fd   : > { %2961 = vst.msk [vmem:[#allocation4 + $0xb0] sm:$0xff] %vm1123_vm6, %v2929_v7 }
 0x2fe   : > { %v3607_v0 = vpop.f32.mrb[44].mxu1 }
 0x2ff   : > { %v2028_v3 = vadd.f32 %v3607_v0, %v1996_v18  ;;  %v1948_v33 = vpop.f32.mrb[45].mxu1 }
 0x300   : > { %v2027_v35 = vadd.f32 %v1995_v30, %v1948_v33 }
 0x301   : > { %2060 = vst.msk [vmem:[#allocation4 + $0xe8] sm:$0xff] %vm1123_vm6, %v2028_v3 }
 0x302   : > { %2059 = vst.msk [vmem:[#allocation4 + $0xe0] sm:$0xff] %vm1123_vm6, %v2027_v35 }
 0x303   : > { %v2994_v37 = vld [vmem:[#allocation4 + $0xb8] sm:$0xff] }
 0x304   : > { %v3033_v26 = vadd.f32 %v5093_v5, %v2994_v37  ;;  %v2993_v61 = vld [vmem:[#allocation4 + $0xb0] sm:$0xff] }
 0x305   : > { %v3032_v19 = vadd.f32 %v5093_v5, %v2993_v61 }
 0x306   : > { %v3065_v63 = vmul.f32 0.1, %v3033_v26 }
 0x307   : > { %v3064_v29 = vmul.f32 0.1, %v3032_v19 }
 0x308   : > { %v3097_v40 = vmax.f32 %v3033_v26, %v3065_v63  ;;  %v2904_v47 = vld [vmem:[#allocation4 + $0xe8] sm:$0xff] }
 0x309   : > { %v3096_v2 = vmax.f32 %v3032_v19, %v3064_v29  ;;  %v3667_v44 = vpop.f32.mrb[40].mxu0  ;;  %v2903_v22 = vld [vmem:[#allocation4 + $0xe0] sm:$0xff] }
 0x30a   : > { %3129 = vst.msk [vmem:[%s5103_s4 + $0xb8] sm:$0xff] %vm1123_vm6, %v3097_v40  ;;  %v2932_v45 = vadd.f32 %v3667_v44, %v2900_v24  ;;  %v2836_v55 = vpop.f32.mrb[41].mxu0 }
 0x30b   : > { %3128 = vst.msk [vmem:[%s5103_s4 + $0xb0] sm:$0xff] %vm1123_vm6, %v3096_v2  ;;  %v2931_v11 = vadd.f32 %v2899_v48, %v2836_v55 }
 0x30c   : > { %2964 = vst.msk [vmem:[#allocation4 + $0xc8] sm:$0xff] %vm1123_vm6, %v2932_v45 }
 0x30d   : > { %2963 = vst.msk [vmem:[#allocation4 + $0xc0] sm:$0xff] %vm1123_vm6, %v2931_v11 }
 0x30e   : > { %v3610_v16 = vpop.f32.mrb[46].mxu1 }
 0x30f   : > { %v2030_v53 = vadd.f32 %v3610_v16, %v1998_v36  ;;  %v1958_v42 = vpop.f32.mrb[47].mxu1 }
 0x310   : > { %v2029_v15 = vadd.f32 %v1997_v58, %v1958_v42 }
 0x311   : > { %2062 = vst.msk [vmem:[#allocation4 + $0xf8] sm:$0xff] %vm1123_vm6, %v2030_v53 }
 0x312   : > { %2061 = vst.msk [vmem:[#allocation4 + $0xf0] sm:$0xff] %vm1123_vm6, %v2029_v15 }
 0x313   : > { %v2996_v59 = vld [vmem:[#allocation4 + $0xc8] sm:$0xff] }
 0x314   : > { %v3035_v41 = vadd.f32 %v5093_v5, %v2996_v59  ;;  %v2995_v60 = vld [vmem:[#allocation4 + $0xc0] sm:$0xff] }
 0x315   : > { %v3034_v52 = vadd.f32 %v5093_v5, %v2995_v60 }
 0x316   : > { %v3067_v62 = vmul.f32 0.1, %v3035_v41 }
 0x317   : > { %v3670_v32 = vpop.f32.mrb[42].mxu0  ;;  %v3066_v6 = vmul.f32 0.1, %v3034_v52 }
 0x318   : > { %v2934_v9 = vadd.f32 %v3670_v32, %v2902_v1  ;;  %v2846_v10 = vpop.f32.mrb[43].mxu0  ;;  %v3099_v13 = vmax.f32 %v3035_v41, %v3067_v62  ;;  %v2906_v17 = vld [vmem:[#allocation4 + $0xf8] sm:$0xff] }
 0x319   : > { %v2933_v14 = vadd.f32 %v2901_v34, %v2846_v10  ;;  %v3098_v38 = vmax.f32 %v3034_v52, %v3066_v6  ;;  %v2905_v28 = vld [vmem:[#allocation4 + $0xf0] sm:$0xff] }
 0x31a   : > { %2966 = vst.msk [vmem:[#allocation4 + $0xd8] sm:$0xff] %vm1123_vm6, %v2934_v9  ;;  %3131 = vst.msk [vmem:[%s5103_s4 + $0xc8] sm:$0xff] %vm1123_vm6, %v3099_v13 }
 0x31b   : > { %2965 = vst.msk [vmem:[#allocation4 + $0xd0] sm:$0xff] %vm1123_vm6, %v2933_v14  ;;  %3130 = vst.msk [vmem:[%s5103_s4 + $0xc0] sm:$0xff] %vm1123_vm6, %v3098_v38 }
 0x320   : > { %v3673_v57 = vpop.f32.mrb[44].mxu0 }
 0x321   : > { %v2936_v20 = vadd.f32 %v3673_v57, %v2904_v47  ;;  %v2856_v39 = vpop.f32.mrb[45].mxu0  ;;  %v2998_v56 = vld [vmem:[#allocation4 + $0xd8] sm:$0xff] }
 0x322   : > { %v2935_v43 = vadd.f32 %v2903_v22, %v2856_v39  ;;  %v3037_v12 = vadd.f32 %v5093_v5, %v2998_v56  ;;  %v2997_v8 = vld [vmem:[#allocation4 + $0xd0] sm:$0xff] }
 0x323   : > { %2968 = vst.msk [vmem:[#allocation4 + $0xe8] sm:$0xff] %vm1123_vm6, %v2936_v20  ;;  %v3036_v23 = vadd.f32 %v5093_v5, %v2997_v8 }
 0x324   : > { %2967 = vst.msk [vmem:[#allocation4 + $0xe0] sm:$0xff] %vm1123_vm6, %v2935_v43  ;;  %v3069_v54 = vmul.f32 0.1, %v3037_v12 }
 0x325   : > { %v3068_v4 = vmul.f32 0.1, %v3036_v23 }
 0x326   : > { %v3101_v46 = vmax.f32 %v3037_v12, %v3069_v54  ;;  %v3676_v25 = vpop.f32.mrb[46].mxu0 }
 0x327   : > { %v3100_v49 = vmax.f32 %v3036_v23, %v3068_v4  ;;  %v2938_v51 = vadd.f32 %v3676_v25, %v2906_v17  ;;  %v2866_v27 = vpop.f32.mrb[47].mxu0 }
 0x328   : > { %3133 = vst.msk [vmem:[%s5103_s4 + $0xd8] sm:$0xff] %vm1123_vm6, %v3101_v46  ;;  %v2937_v21 = vadd.f32 %v2905_v28, %v2866_v27 }
 0x329   : > { %3132 = vst.msk [vmem:[%s5103_s4 + $0xd0] sm:$0xff] %vm1123_vm6, %v3100_v49  ;;  %2970 = vst.msk [vmem:[#allocation4 + $0xf8] sm:$0xff] %vm1123_vm6, %v2938_v51 }
 0x32a   : > { %v3000_v50 = vld [vmem:[#allocation4 + $0xe8] sm:$0xff]  ;;  %2969 = vst.msk [vmem:[#allocation4 + $0xf0] sm:$0xff] %vm1123_vm6, %v2937_v21 }
 0x32b   : > { %v3039_v31 = vadd.f32 %v5093_v5, %v3000_v50  ;;  %v2999_v7 = vld [vmem:[#allocation4 + $0xe0] sm:$0xff] }
 0x32c   : > { %v3038_v0 = vadd.f32 %v5093_v5, %v2999_v7 }
 0x32d   : > { %v3071_v18 = vmul.f32 0.1, %v3039_v31 }
 0x32e   : > { %v3070_v3 = vmul.f32 0.1, %v3038_v0 }
 0x32f   : > { %v3103_v33 = vmax.f32 %v3039_v31, %v3071_v18 }
 0x330   : > { %v3102_v30 = vmax.f32 %v3038_v0, %v3070_v3  ;;  %v3002_v35 = vld [vmem:[#allocation4 + $0xf8] sm:$0xff] }
 0x331   : > { %3135 = vst.msk [vmem:[%s5103_s4 + $0xe8] sm:$0xff] %vm1123_vm6, %v3103_v33  ;;  %v3041_v37 = vadd.f32 %v5093_v5, %v3002_v35  ;;  %v3001_v26 = vld [vmem:[#allocation4 + $0xf0] sm:$0xff] }
 0x332   : > { %3134 = vst.msk [vmem:[%s5103_s4 + $0xe0] sm:$0xff] %vm1123_vm6, %v3102_v30  ;;  %v3040_v61 = vadd.f32 %v5093_v5, %v3001_v26 }
 0x333   : > { %v3073_v19 = vmul.f32 0.1, %v3041_v37 }
 0x334   : > { %v3072_v63 = vmul.f32 0.1, %v3040_v61 }
 0x335   : > { %v3105_v29 = vmax.f32 %v3041_v37, %v3073_v19 }
 0x336   : > { %v3104_v40 = vmax.f32 %v3040_v61, %v3072_v63 }
 0x337   : > { %3137 = vst.msk [vmem:[%s5103_s4 + $0xf8] sm:$0xff] %vm1123_vm6, %v3105_v29 }
 0x338   : > { %3136 = vst.msk [vmem:[%s5103_s4 + $0xf0] sm:$0xff] %vm1123_vm6, %v3104_v40 }
 0x339   : > { %3831 = shalt.err (!%p3828_p2)
}
 0x33a   : > { %s3832_s29 = scalar_lea.hbm %s5254_s20, 4096  ;;  %s3836_s6 = scalar_lea.hbm %s5307_s3, 8192 }
 0x33b   : > { %p3833_p4 = scmp.ne.s32.totalorder %s5254_s20, %s3832_s29  ;;  %p3837_p9 = scmp.lt.u32.totalorder %s5254_s20, %s5307_s3 }
 0x33c   : > { %p3838_p1 = scmp.lt.u32.totalorder %s3836_s6, %s3832_s29  ;;  %p3840_p6 = scmp.lt.u32.totalorder %s3832_s29, %s5254_s20 }
 0x33d   : > { %p3834_p5 = pnand %p3833_p4, %p5314_p11 }
 0x33e   : > { %p3839_p3 = por %p3838_p1, %p3837_p9 }
 0x33f   : > { %p3835_p7 = pneg %p3834_p5 }
 0x340   : > { %p3841_p12 = por %p3840_p6, %p3839_p3 }
 0x342   : > { %p3842_p13 = pnand %p3841_p12, %p3835_p7 }
 0x344   : > { %3845 = shalt.err (!%p3842_p13)
}
 0x345   : > { %s3893_s23 = smov 128   ;;  %s3894_s4 = smov 8  }
 0x346   : > { %3737 = dma.vmem_to_hbm [thread:$0]  (%p5314_p11), %s5256_s8, 4096, %s5254_s20, %s3139_s16, %s3893_s23, %s3893_s23, %s3894_s4  }
 0x347 PF: > { %s3167_s9 = sand.u32 1, %s3872_s12   ;;  %p5315_p8 = scmp.ne.s32.totalorder %s5312_s25, 0 }
 0x348   : > { %p5316_p10 = scmp.ge.s32.totalorder %s3884_s15, 2  ;;  %s3168_s17 = scalar_lea.sflag [#allocation7], %s3167_s9 }
 0x34a   : > { %p3744_p0 = pnand %p5316_p10, %p5315_p8 }
 0x34c   : > { %3867 = dma.done.wait (!%p3744_p0), %s3168_s17, 4096  }
 0x34d   : > { %3869 = vsyncadd (!%p3744_p0), %s3168_s17, 4294963200  ;;  %p16_p2 = scmp.ge.s32.totalorder %s3940_s18, 4   ;;  %s5317_s12 = smov %s3876_s13 }
 0x34e   : > { %s5318_s13 = smov %s3880_s14  ;;  %s5319_s14 = smov %s3952_s21 }
 0x34f   : > { %s5320_s15 = smov %s3940_s18  ;;  %18 = sbr.rel (!%p16_p2) target bundleno = 5 (0x5), region = 82 }
 0x356   :  { %3173 = vsyncpa [#allocation6], 1 }
 0x357   :  { %3175 = vsyncpa [#allocation6 + $0x1], 1 }
 0x358   :  { %3176 = vsyncpa [#allocation7], 1 }
 0x359   :  { %3178 = vsyncpa [#allocation7 + $0x1], 1 }

</bundles_post_ra>
